<compile_context>
chip_gen: v7x
topology: tpu7x:2x2x1
jax: 0.10.0
libtpu: 0.0.40
codegen_flags: <defaults>
</compile_context>

<pallas_src>
import functools
import math

import jax
import jax.numpy as jnp
from jax.experimental import pallas as pl
from jax.experimental.pallas import tpu as pltpu


# Row order of the packed (L, 16, P) small-parameter slab (P = max(D, F)).
_SMALL_ORDER = (
    "b_q", "b_k", "b_v", "b_o", "ln1_g", "ln1_b",
    "b_cq", "b_ck", "b_cv", "b_co", "ln2_g", "ln2_b",
    "b_ff1", "b_ff2", "ln3_g", "ln3_b",
)


# ----------------------------------------------------------------------------
# In-kernel helpers (pure jnp, traced inside the Pallas kernel body)
# ----------------------------------------------------------------------------
def _layernorm(x, g, b, eps=1e-5):
    # x: (B, S, D) f32; g, b: (1, D) f32
    mu = jnp.mean(x, axis=-1, keepdims=True)
    var = jnp.mean((x - mu) ** 2, axis=-1, keepdims=True)
    return (x - mu) * jax.lax.rsqrt(var + eps) * g + b


def _linear(x, w_bf16, b):
    # x: (B, S, Din) f32 -> flatten rows, bf16 MXU operands, f32 accumulation.
    B, S, Din = x.shape
    y = jnp.dot(x.reshape(B * S, Din).astype(jnp.bfloat16), w_bf16,
                preferred_element_type=jnp.float32) + b
    return y.reshape(B, S, -1)


def _mha(q_src, kv_src, w_in_ref, w_out_ref, i_q, i_k, i_v, i_o,
         b_q, b_k, b_v, b_o, num_heads, bias):
    """Multi-head attention without lane-axis activation slices / concat.

    q_src: (B, Sq, D) f32; kv_src: (B, Sk, D) f32
    w_in_ref : streamed bf16 ref, block (1, 6, H, D, dh)  (q,k,v,cq,ck,cv)
    w_out_ref: streamed bf16 ref, block (1, 2, H, dh, D)  (o,co)
    b_* : (1, D) f32 biases; bias: (Sq, Sk) additive mask or None.
    """
    B, Sq, D = q_src.shape
    Sk = kv_src.shape[1]
    H = num_heads
    dh = D // H
    scale = 1.0 / math.sqrt(dh)

    q2 = q_src.reshape(B * Sq, D).astype(jnp.bfloat16)
    kv2 = kv_src.reshape(B * Sk, D).astype(jnp.bfloat16)

    # Per-head projections with host-pre-split weights (no activation slicing).
    q_hs, k_hs, v_hs = [], [], []
    for h in range(H):
        hs = slice(h * dh, (h + 1) * dh)
        qh = jnp.dot(q2, w_in_ref[0, i_q, h],
                     preferred_element_type=jnp.float32) + b_q[:, hs]
        kh = jnp.dot(kv2, w_in_ref[0, i_k, h],
                     preferred_element_type=jnp.float32) + b_k[:, hs]
        vh = jnp.dot(kv2, w_in_ref[0, i_v, h],
                     preferred_element_type=jnp.float32) + b_v[:, hs]
        q_hs.append(qh.reshape(B, Sq, dh))
        k_hs.append(kh.reshape(B, Sk, dh))
        v_hs.append(vh.reshape(B, Sk, dh))

    # Head-major batch: (H*B, S, dh) via leading-axis concat (no lane relayout).
    qa = jnp.concatenate(q_hs, axis=0)
    ka = jnp.concatenate(k_hs, axis=0)
    va = jnp.concatenate(v_hs, axis=0)

    # One batched score matmul + ONE softmax for all heads.
    s = jnp.einsum('bqd,bkd->bqk', qa.astype(jnp.bfloat16), ka.astype(jnp.bfloat16),
                   preferred_element_type=jnp.float32) * scale
    if bias is not None:
        s = s + bias                                   # additive 0 / -1e30 mask
    m = jnp.max(s, axis=-1, keepdims=True)
    p = jnp.exp(s - m)
    p = p * pl.reciprocal(jnp.sum(p, axis=-1, keepdims=True), approx=True)

    o = jnp.einsum('bqk,bkd->bqd', p.astype(jnp.bfloat16), va.astype(jnp.bfloat16),
                   preferred_element_type=jnp.float32)  # (H*B, Sq, dh)

    # Output projection absorbs the head concatenation: sum_h o_h @ W_o[h].
    acc = jnp.zeros((B * Sq, D), jnp.float32)
    for h in range(H):
        oh = o[h * B:(h + 1) * B].reshape(B * Sq, dh).astype(jnp.bfloat16)
        acc = acc + jnp.dot(oh, w_out_ref[0, i_o, h],
                            preferred_element_type=jnp.float32)
    return (acc + b_o).reshape(B, Sq, D)


# ----------------------------------------------------------------------------
# Fused decoder kernel.  Grid = (batch_tiles ["parallel"], layers ["arbitrary"]).
# out_ref is the layer-resident activation (same block across the layer axis).
# ----------------------------------------------------------------------------
def _decoder_kernel(x_ref, enc_ref, w_in_ref, w_out_ref, w_ff1_ref, w_ff2_ref,
                    small_ref, norm_g_ref, norm_b_ref,
                    out_ref, mask_ref, *, num_heads):
    layer = pl.program_id(1)
    last = pl.num_programs(1) - 1

    B, S, D = out_ref.shape
    F = w_ff1_ref.shape[-1]

    @pl.when(layer == 0)
    def _():
        # Load the initial activation into the resident output block and build
        # the additive causal mask once per batch tile.
        out_ref[...] = x_ref[...]
        row = jax.lax.broadcasted_iota(jnp.int32, (S, S), 0)
        col = jax.lax.broadcasted_iota(jnp.int32, (S, S), 1)
        mask_ref[...] = jnp.where(row >= col, 0.0, -1e30).astype(jnp.float32)

    x = out_ref[...]              # (B, S, D) f32, resident across layers
    enc = enc_ref[...]            # (B, Se, D) f32
    causal = mask_ref[...]        # (S, S) f32 additive bias
    sp = small_ref[0]             # (16, P) f32 bias / LN slab

    def prm(i, n):                # row i of the slab, first n lanes -> (1, n)
        return sp[i:i + 1, :n]

    # ---- masked (causal) self-attention + residual + LayerNorm ----
    attn = _mha(x, x, w_in_ref, w_out_ref, 0, 1, 2, 0,
                prm(0, D), prm(1, D), prm(2, D), prm(3, D),
                num_heads, causal)
    x = _layernorm(x + attn, prm(4, D), prm(5, D))

    # ---- cross-attention over encoder output + residual + LayerNorm ----
    cross = _mha(x, enc, w_in_ref, w_out_ref, 3, 4, 5, 1,
                 prm(6, D), prm(7, D), prm(8, D), prm(9, D),
                 num_heads, None)
    x = _layernorm(x + cross, prm(10, D), prm(11, D))

    # ---- position-wise feed-forward (ReLU) + residual + LayerNorm ----
    h = jnp.maximum(_linear(x, w_ff1_ref[0], prm(12, F)), 0.0)
    ff = _linear(h, w_ff2_ref[0], prm(13, D))
    x = _layernorm(x + ff, prm(14, D), prm(15, D))

    @pl.when(layer < last)
    def _():
        out_ref[...] = x

    @pl.when(layer == last)                 # fused final LayerNorm
    def _():
        out_ref[...] = _layernorm(x, norm_g_ref[...], norm_b_ref[...])


def fused_decoder(x, encoder_output, w_in, w_out, w_ff1, w_ff2, small,
                  norm_g, norm_b, *, num_heads, num_layers, batch_tile=None):
    B, S, D = x.shape
    Se = encoder_output.shape[1]
    bt = B if batch_tile is None else batch_tile
    assert B % bt == 0

    in_specs = [
        pl.BlockSpec((bt, S, D), lambda b, l: (b, 0, 0)),        # x (resident per tile)
        pl.BlockSpec((bt, Se, D), lambda b, l: (b, 0, 0)),       # encoder output
        pl.BlockSpec((1,) + w_in.shape[1:], lambda b, l: (l, 0, 0, 0, 0)),
        pl.BlockSpec((1,) + w_out.shape[1:], lambda b, l: (l, 0, 0, 0, 0)),
        pl.BlockSpec((1,) + w_ff1.shape[1:], lambda b, l: (l, 0, 0)),
        pl.BlockSpec((1,) + w_ff2.shape[1:], lambda b, l: (l, 0, 0)),
        pl.BlockSpec((1,) + small.shape[1:], lambda b, l: (l, 0, 0)),
        pl.BlockSpec(norm_g.shape, lambda b, l: (0, 0)),
        pl.BlockSpec(norm_b.shape, lambda b, l: (0, 0)),
    ]

    # Explicit VMEM budget: resident act/enc/out/mask + 2x double-buffered
    # streamed layer weights, with headroom; clamped for v7x-class parts.
    resident = 4 * (2 * bt * S * D + bt * Se * D + S * S)
    per_layer_w = sum(int(w.size) * w.dtype.itemsize
                      for w in (w_in, w_out, w_ff1, w_ff2, small)) // num_layers
    vmem_limit = int(min(max(2 * resident + 4 * per_layer_w + (8 << 20),
                             32 << 20), 96 << 20))

    kernel = functools.partial(_decoder_kernel, num_heads=num_heads)
    return pl.pallas_call(
        kernel,
        out_shape=jax.ShapeDtypeStruct((B, S, D), jnp.float32),
        grid=(B // bt, num_layers),
        in_specs=in_specs,
        out_specs=pl.BlockSpec((bt, S, D), lambda b, l: (b, 0, 0)),
        scratch_shapes=[pltpu.VMEM((S, S), jnp.float32)],        # causal bias
        compiler_params=pltpu.CompilerParams(
            dimension_semantics=("parallel", "arbitrary"),
            vmem_limit_bytes=vmem_limit),
    )(x, encoder_output, w_in, w_out, w_ff1, w_ff2, small, norm_g, norm_b)


# ----------------------------------------------------------------------------
# Parameter init (deterministic, in-script), host-side packing, full forward
# ----------------------------------------------------------------------------
def _sinusoidal_pe(max_seq_len, d_model):
    pos = jnp.arange(max_seq_len, dtype=jnp.float32)[:, None]
    i = jnp.arange(d_model // 2, dtype=jnp.float32)[None, :]
    angle = pos / jnp.power(10000.0, (2.0 * i) / d_model)
    pe = jnp.zeros((max_seq_len, d_model), jnp.float32)
    pe = pe.at[:, 0::2].set(jnp.sin(angle))
    pe = pe.at[:, 1::2].set(jnp.cos(angle))
    return pe


def init_layer_params(key, d_model, ff_dim):
    D, F = d_model, ff_dim
    ks = jax.random.split(key, 20)
    s = 0.02

    def w(k, shape):
        return s * jax.random.normal(k, shape, jnp.float32)

    return {
        "w_q": w(ks[0], (D, D)), "b_q": w(ks[10], (1, D)),
        "w_k": w(ks[1], (D, D)), "b_k": w(ks[11], (1, D)),
        "w_v": w(ks[2], (D, D)), "b_v": w(ks[12], (1, D)),
        "w_o": w(ks[3], (D, D)), "b_o": w(ks[13], (1, D)),
        "ln1_g": jnp.ones((1, D), jnp.float32), "ln1_b": jnp.zeros((1, D), jnp.float32),
        "w_cq": w(ks[4], (D, D)), "b_cq": w(ks[14], (1, D)),
        "w_ck": w(ks[5], (D, D)), "b_ck": w(ks[15], (1, D)),
        "w_cv": w(ks[6], (D, D)), "b_cv": w(ks[16], (1, D)),
        "w_co": w(ks[7], (D, D)), "b_co": w(ks[17], (1, D)),
        "ln2_g": jnp.ones((1, D), jnp.float32), "ln2_b": jnp.zeros((1, D), jnp.float32),
        "w_ff1": w(ks[8], (D, F)), "b_ff1": w(ks[18], (1, F)),
        "w_ff2": w(ks[9], (F, D)), "b_ff2": w(ks[19], (1, D)),
        "ln3_g": jnp.ones((1, D), jnp.float32), "ln3_b": jnp.zeros((1, D), jnp.float32),
    }


def init_decoder_params(key, vocab_size, d_model, ff_dim, num_layers):
    keys = jax.random.split(key, num_layers + 1)
    return {
        "embedding": 0.02 * jax.random.normal(keys[0], (vocab_size, d_model), jnp.float32),
        "layers": [init_layer_params(keys[1 + l], d_model, ff_dim)
                   for l in range(num_layers)],
        "norm_g": jnp.ones((1, d_model), jnp.float32),
        "norm_b": jnp.zeros((1, d_model), jnp.float32),
    }


def pack_decoder_params(params, num_heads):
    """Pack per-layer weights into the 5 streamed slabs the kernel expects."""
    layers = params["layers"]
    L = len(layers)
    D = layers[0]["w_q"].shape[0]
    F = layers[0]["w_ff1"].shape[1]
    H = num_heads
    dh = D // H
    P = max(D, F)

    def head_in(w):       # (D, D), heads = contiguous column groups -> (H, D, dh)
        return jnp.transpose(w.reshape(D, H, dh), (1, 0, 2))

    def head_out(w):      # (D, D), heads = contiguous row groups -> (H, dh, D)
        return w.reshape(H, dh, D)

    w_in = jnp.stack([
        jnp.stack([head_in(lp[k]) for k in
                   ("w_q", "w_k", "w_v", "w_cq", "w_ck", "w_cv")], 0)
        for lp in layers], 0).astype(jnp.bfloat16)               # (L, 6, H, D, dh)
    w_out = jnp.stack([
        jnp.stack([head_out(lp[k]) for k in ("w_o", "w_co")], 0)
        for lp in layers], 0).astype(jnp.bfloat16)               # (L, 2, H, dh, D)
    w_ff1 = jnp.stack([lp["w_ff1"] for lp in layers], 0).astype(jnp.bfloat16)
    w_ff2 = jnp.stack([lp["w_ff2"] for lp in layers], 0).astype(jnp.bfloat16)

    def pad_row(p):        # (1, n) -> (P,)
        return jnp.pad(p[0], (0, P - p.shape[1]))

    small = jnp.stack([
        jnp.stack([pad_row(lp[k]) for k in _SMALL_ORDER], 0)
        for lp in layers], 0).astype(jnp.float32)                # (L, 16, P)

    return w_in, w_out, w_ff1, w_ff2, small


def decoder_forward(token_ids, encoder_output, params, *, num_heads, max_seq_len,
                    batch_tile=None):
    # Embedding lookup + positional encoding (plain-JAX gather glue; the
    # .cpu()/.to(device) hops in the PyTorch module are semantic no-ops).
    B, S = token_ids.shape
    x = jnp.take(params["embedding"], token_ids, axis=0)             # (B, S, D)
    pe = _sinusoidal_pe(max_seq_len, x.shape[-1])[:S]                # (S, D)
    x = x + pe[None, :, :]

    w_in, w_out, w_ff1, w_ff2, small = pack_decoder_params(params, num_heads)
    return fused_decoder(x, encoder_output, w_in, w_out, w_ff1, w_ff2, small,
                         params["norm_g"], params["norm_b"],
                         num_heads=num_heads,
                         num_layers=len(params["layers"]),
                         batch_tile=batch_tile)


# ----------------------------------------------------------------------------
if __name__ == "__main__":
    vocab_size = 50
    d_model = 32
    num_heads = 4
    ff_dim = 64
    num_layers = 2
    max_seq_len = 16
    B, S, S_enc = 2, 8, 8

    key = jax.random.PRNGKey(0)
    k_ids, k_enc, k_params = jax.random.split(key, 3)
    token_ids = jax.random.randint(k_ids, (B, S), 0, vocab_size, dtype=jnp.int32)
    encoder_output = jax.random.normal(k_enc, (B, S_enc, d_model), jnp.float32)
    params = init_decoder_params(k_params, vocab_size, d_model, ff_dim, num_layers)

    out = decoder_forward(token_ids, encoder_output, params,
                          num_heads=num_heads, max_seq_len=max_seq_len)
    jax.block_until_ready(out)
    assert out.shape == (B, S, d_model) and out.dtype == jnp.float32
    assert bool(jnp.all(jnp.isfinite(out)))
    print("KERNEL_OK")
</pallas_src>

<mosaic_0001>
module attributes {stable_mosaic.version = 11 : i64} {
  func.func @_decoder_kernel(%arg0: i32, %arg1: i32, %arg2: memref<2x8x32xf32, #tpu.memory_space<vmem>>, %arg3: memref<2x8x32xf32, #tpu.memory_space<vmem>>, %arg4: memref<1x6x4x32x8xbf16, #tpu.memory_space<vmem>>, %arg5: memref<1x2x4x8x32xbf16, #tpu.memory_space<vmem>>, %arg6: memref<1x32x64xbf16, #tpu.memory_space<vmem>>, %arg7: memref<1x64x32xbf16, #tpu.memory_space<vmem>>, %arg8: memref<1x16x64xf32, #tpu.memory_space<vmem>>, %arg9: memref<1x32xf32, #tpu.memory_space<vmem>>, %arg10: memref<1x32xf32, #tpu.memory_space<vmem>>, %arg11: memref<2x8x32xf32, #tpu.memory_space<vmem>>, %arg12: memref<8x8xf32, #tpu.memory_space<vmem>>) attributes {dimension_semantics = [#tpu.dimension_semantics<parallel>, #tpu.dimension_semantics<arbitrary>], iteration_bounds = array<i64: 1, 2>, scalar_prefetch = 0 : i64, scratch_operands = 1 : i64, tpu.core_type = #tpu.core_type<tc>, window_params = [{transform_indices = @transform_0, window_bounds = array<i64: 2, 8, 32>}, {transform_indices = @transform_1, window_bounds = array<i64: 2, 8, 32>}, {transform_indices = @transform_2, window_bounds = array<i64: 1, 6, 4, 32, 8>}, {transform_indices = @transform_3, window_bounds = array<i64: 1, 2, 4, 8, 32>}, {transform_indices = @transform_4, window_bounds = array<i64: 1, 32, 64>}, {transform_indices = @transform_5, window_bounds = array<i64: 1, 64, 32>}, {transform_indices = @transform_6, window_bounds = array<i64: 1, 16, 64>}, {pipeline_mode = #tpu.pipeline_mode<synchronous>, transform_indices = @transform_7, window_bounds = array<i64: 1, 32>}, {pipeline_mode = #tpu.pipeline_mode<synchronous>, transform_indices = @transform_8, window_bounds = array<i64: 1, 32>}, {transform_indices = @transform_9, window_bounds = array<i64: 2, 8, 32>}]} {
    %c0_i32 = arith.constant 0 : i32
    %0 = arith.cmpi eq, %arg1, %c0_i32 : i32
    %1 = arith.extui %0 : i1 to i32
    %c0_i32_0 = arith.constant 0 : i32
    %2 = arith.cmpi ne, %1, %c0_i32_0 : i32
    scf.if %2 {
      %c0_236 = arith.constant 0 : index
      %c0_237 = arith.constant 0 : index
      %c0_238 = arith.constant 0 : index
      %408 = vector.load %arg2[%c0_236, %c0_237, %c0_238] : memref<2x8x32xf32, #tpu.memory_space<vmem>>, vector<2x8x32xf32>
      %c0_239 = arith.constant 0 : index
      %c0_240 = arith.constant 0 : index
      %c0_241 = arith.constant 0 : index
      %409 = vector.load %arg11[%c0_239, %c0_240, %c0_241] : memref<2x8x32xf32, #tpu.memory_space<vmem>>, vector<2x8x32xf32>
      tpu.vector_store %arg11[%c0_239, %c0_240, %c0_241], %408 {strides = array<i32>} : memref<2x8x32xf32, #tpu.memory_space<vmem>>, vector<2x8x32xf32>,
      %410 = tpu.iota {dimensions = array<i32: 0>} : vector<8x8xi32>
      %411 = tpu.iota {dimensions = array<i32: 1>} : vector<8x8xi32>
      %412 = arith.cmpi sge, %410, %411 : vector<8x8xi32>
      %cst_242 = arith.constant 0.000000e+00 : f32
      %cst_243 = arith.constant -1.000000e+30 : f32
      %413 = vector.broadcast %cst_242 : f32 to vector<8x8xf32>
      %414 = vector.broadcast %cst_243 : f32 to vector<8x8xf32>
      %415 = arith.select %412, %413, %414 : vector<8x8xi1>, vector<8x8xf32>
      %c0_244 = arith.constant 0 : index
      %c0_245 = arith.constant 0 : index
      %416 = vector.load %arg12[%c0_244, %c0_245] : memref<8x8xf32, #tpu.memory_space<vmem>>, vector<8x8xf32>
      tpu.vector_store %arg12[%c0_244, %c0_245], %415 {strides = array<i32>} : memref<8x8xf32, #tpu.memory_space<vmem>>, vector<8x8xf32>,
    } else {
    }
    %c0 = arith.constant 0 : index
    %c0_1 = arith.constant 0 : index
    %c0_2 = arith.constant 0 : index
    %3 = vector.load %arg11[%c0, %c0_1, %c0_2] : memref<2x8x32xf32, #tpu.memory_space<vmem>>, vector<2x8x32xf32>
    %c0_3 = arith.constant 0 : index
    %c0_4 = arith.constant 0 : index
    %c0_5 = arith.constant 0 : index
    %4 = vector.load %arg3[%c0_3, %c0_4, %c0_5] : memref<2x8x32xf32, #tpu.memory_space<vmem>>, vector<2x8x32xf32>
    %c0_6 = arith.constant 0 : index
    %c0_7 = arith.constant 0 : index
    %5 = vector.load %arg12[%c0_6, %c0_7] : memref<8x8xf32, #tpu.memory_space<vmem>>, vector<8x8xf32>
    %c0_8 = arith.constant 0 : index
    %c0_9 = arith.constant 0 : index
    %c0_10 = arith.constant 0 : index
    %6 = vector.load %arg8[%c0_8, %c0_9, %c0_10] : memref<1x16x64xf32, #tpu.memory_space<vmem>>, vector<1x16x64xf32>
    %7 = vector.shape_cast %6 : vector<1x16x64xf32> to vector<16x64xf32>
    %8 = vector.extract_strided_slice %7 {offsets = [0, 0], sizes = [1, 32], strides = [1, 1]} : vector<16x64xf32> to vector<1x32xf32>
    %9 = vector.extract_strided_slice %7 {offsets = [1, 0], sizes = [1, 32], strides = [1, 1]} : vector<16x64xf32> to vector<1x32xf32>
    %10 = vector.extract_strided_slice %7 {offsets = [2, 0], sizes = [1, 32], strides = [1, 1]} : vector<16x64xf32> to vector<1x32xf32>
    %11 = vector.extract_strided_slice %7 {offsets = [3, 0], sizes = [1, 32], strides = [1, 1]} : vector<16x64xf32> to vector<1x32xf32>
    %12 = vector.shape_cast %3 : vector<2x8x32xf32> to vector<16x32xf32>
    %13 = arith.truncf %12 : vector<16x32xf32> to vector<16x32xbf16>
    %14 = vector.shape_cast %3 : vector<2x8x32xf32> to vector<16x32xf32>
    %15 = arith.truncf %14 : vector<16x32xf32> to vector<16x32xbf16>
    %c0_11 = arith.constant 0 : index
    %c0_12 = arith.constant 0 : index
    %c0_13 = arith.constant 0 : index
    %c0_14 = arith.constant 0 : index
    %c0_15 = arith.constant 0 : index
    %16 = vector.load %arg4[%c0_11, %c0_12, %c0_13, %c0_14, %c0_15] : memref<1x6x4x32x8xbf16, #tpu.memory_space<vmem>>, vector<1x1x1x32x8xbf16>
    %17 = vector.shape_cast %16 : vector<1x1x1x32x8xbf16> to vector<32x8xbf16>
    %cst = arith.constant dense<0.000000e+00> : vector<16x8xf32>
    %18 = tpu.matmul %13, %17, %cst {dimension_numbers = #tpu.dot_dimension_numbers<[1], [0], [0], [1], [0, 0, 1, 1], [], []>} : vector<16x32xbf16>, vector<32x8xbf16>, vector<16x8xf32> -> vector<16x8xf32>
    %19 = vector.extract_strided_slice %8 {offsets = [0, 0], sizes = [1, 8], strides = [1, 1]} : vector<1x32xf32> to vector<1x8xf32>
    %20 = vector.broadcast %19 : vector<1x8xf32> to vector<16x8xf32>
    %21 = arith.addf %18, %20 : vector<16x8xf32>
    %c0_16 = arith.constant 0 : index
    %c1 = arith.constant 1 : index
    %c0_17 = arith.constant 0 : index
    %c0_18 = arith.constant 0 : index
    %c0_19 = arith.constant 0 : index
    %22 = vector.load %arg4[%c0_16, %c1, %c0_17, %c0_18, %c0_19] : memref<1x6x4x32x8xbf16, #tpu.memory_space<vmem>>, vector<1x1x1x32x8xbf16>
    %23 = vector.shape_cast %22 : vector<1x1x1x32x8xbf16> to vector<32x8xbf16>
    %cst_20 = arith.constant dense<0.000000e+00> : vector<16x8xf32>
    %24 = tpu.matmul %15, %23, %cst_20 {dimension_numbers = #tpu.dot_dimension_numbers<[1], [0], [0], [1], [0, 0, 1, 1], [], []>} : vector<16x32xbf16>, vector<32x8xbf16>, vector<16x8xf32> -> vector<16x8xf32>
    %25 = vector.extract_strided_slice %9 {offsets = [0, 0], sizes = [1, 8], strides = [1, 1]} : vector<1x32xf32> to vector<1x8xf32>
    %26 = vector.broadcast %25 : vector<1x8xf32> to vector<16x8xf32>
    %27 = arith.addf %24, %26 : vector<16x8xf32>
    %c0_21 = arith.constant 0 : index
    %c2 = arith.constant 2 : index
    %c0_22 = arith.constant 0 : index
    %c0_23 = arith.constant 0 : index
    %c0_24 = arith.constant 0 : index
    %28 = vector.load %arg4[%c0_21, %c2, %c0_22, %c0_23, %c0_24] : memref<1x6x4x32x8xbf16, #tpu.memory_space<vmem>>, vector<1x1x1x32x8xbf16>
    %29 = vector.shape_cast %28 : vector<1x1x1x32x8xbf16> to vector<32x8xbf16>
    %cst_25 = arith.constant dense<0.000000e+00> : vector<16x8xf32>
    %30 = tpu.matmul %15, %29, %cst_25 {dimension_numbers = #tpu.dot_dimension_numbers<[1], [0], [0], [1], [0, 0, 1, 1], [], []>} : vector<16x32xbf16>, vector<32x8xbf16>, vector<16x8xf32> -> vector<16x8xf32>
    %31 = vector.extract_strided_slice %10 {offsets = [0, 0], sizes = [1, 8], strides = [1, 1]} : vector<1x32xf32> to vector<1x8xf32>
    %32 = vector.broadcast %31 : vector<1x8xf32> to vector<16x8xf32>
    %33 = arith.addf %30, %32 : vector<16x8xf32>
    %34 = vector.shape_cast %21 : vector<16x8xf32> to vector<2x8x8xf32>
    %35 = vector.shape_cast %27 : vector<16x8xf32> to vector<2x8x8xf32>
    %36 = vector.shape_cast %33 : vector<16x8xf32> to vector<2x8x8xf32>
    %c0_26 = arith.constant 0 : index
    %c0_27 = arith.constant 0 : index
    %c1_28 = arith.constant 1 : index
    %c0_29 = arith.constant 0 : index
    %c0_30 = arith.constant 0 : index
    %37 = vector.load %arg4[%c0_26, %c0_27, %c1_28, %c0_29, %c0_30] : memref<1x6x4x32x8xbf16, #tpu.memory_space<vmem>>, vector<1x1x1x32x8xbf16>
    %38 = vector.shape_cast %37 : vector<1x1x1x32x8xbf16> to vector<32x8xbf16>
    %cst_31 = arith.constant dense<0.000000e+00> : vector<16x8xf32>
    %39 = tpu.matmul %13, %38, %cst_31 {dimension_numbers = #tpu.dot_dimension_numbers<[1], [0], [0], [1], [0, 0, 1, 1], [], []>} : vector<16x32xbf16>, vector<32x8xbf16>, vector<16x8xf32> -> vector<16x8xf32>
    %40 = vector.extract_strided_slice %8 {offsets = [0, 8], sizes = [1, 8], strides = [1, 1]} : vector<1x32xf32> to vector<1x8xf32>
    %41 = vector.broadcast %40 : vector<1x8xf32> to vector<16x8xf32>
    %42 = arith.addf %39, %41 : vector<16x8xf32>
    %c0_32 = arith.constant 0 : index
    %c1_33 = arith.constant 1 : index
    %c1_34 = arith.constant 1 : index
    %c0_35 = arith.constant 0 : index
    %c0_36 = arith.constant 0 : index
    %43 = vector.load %arg4[%c0_32, %c1_33, %c1_34, %c0_35, %c0_36] : memref<1x6x4x32x8xbf16, #tpu.memory_space<vmem>>, vector<1x1x1x32x8xbf16>
    %44 = vector.shape_cast %43 : vector<1x1x1x32x8xbf16> to vector<32x8xbf16>
    %cst_37 = arith.constant dense<0.000000e+00> : vector<16x8xf32>
    %45 = tpu.matmul %15, %44, %cst_37 {dimension_numbers = #tpu.dot_dimension_numbers<[1], [0], [0], [1], [0, 0, 1, 1], [], []>} : vector<16x32xbf16>, vector<32x8xbf16>, vector<16x8xf32> -> vector<16x8xf32>
    %46 = vector.extract_strided_slice %9 {offsets = [0, 8], sizes = [1, 8], strides = [1, 1]} : vector<1x32xf32> to vector<1x8xf32>
    %47 = vector.broadcast %46 : vector<1x8xf32> to vector<16x8xf32>
    %48 = arith.addf %45, %47 : vector<16x8xf32>
    %c0_38 = arith.constant 0 : index
    %c2_39 = arith.constant 2 : index
    %c1_40 = arith.constant 1 : index
    %c0_41 = arith.constant 0 : index
    %c0_42 = arith.constant 0 : index
    %49 = vector.load %arg4[%c0_38, %c2_39, %c1_40, %c0_41, %c0_42] : memref<1x6x4x32x8xbf16, #tpu.memory_space<vmem>>, vector<1x1x1x32x8xbf16>
    %50 = vector.shape_cast %49 : vector<1x1x1x32x8xbf16> to vector<32x8xbf16>
    %cst_43 = arith.constant dense<0.000000e+00> : vector<16x8xf32>
    %51 = tpu.matmul %15, %50, %cst_43 {dimension_numbers = #tpu.dot_dimension_numbers<[1], [0], [0], [1], [0, 0, 1, 1], [], []>} : vector<16x32xbf16>, vector<32x8xbf16>, vector<16x8xf32> -> vector<16x8xf32>
    %52 = vector.extract_strided_slice %10 {offsets = [0, 8], sizes = [1, 8], strides = [1, 1]} : vector<1x32xf32> to vector<1x8xf32>
    %53 = vector.broadcast %52 : vector<1x8xf32> to vector<16x8xf32>
    %54 = arith.addf %51, %53 : vector<16x8xf32>
    %55 = vector.shape_cast %42 : vector<16x8xf32> to vector<2x8x8xf32>
    %56 = vector.shape_cast %48 : vector<16x8xf32> to vector<2x8x8xf32>
    %57 = vector.shape_cast %54 : vector<16x8xf32> to vector<2x8x8xf32>
    %c0_44 = arith.constant 0 : index
    %c0_45 = arith.constant 0 : index
    %c2_46 = arith.constant 2 : index
    %c0_47 = arith.constant 0 : index
    %c0_48 = arith.constant 0 : index
    %58 = vector.load %arg4[%c0_44, %c0_45, %c2_46, %c0_47, %c0_48] : memref<1x6x4x32x8xbf16, #tpu.memory_space<vmem>>, vector<1x1x1x32x8xbf16>
    %59 = vector.shape_cast %58 : vector<1x1x1x32x8xbf16> to vector<32x8xbf16>
    %cst_49 = arith.constant dense<0.000000e+00> : vector<16x8xf32>
    %60 = tpu.matmul %13, %59, %cst_49 {dimension_numbers = #tpu.dot_dimension_numbers<[1], [0], [0], [1], [0, 0, 1, 1], [], []>} : vector<16x32xbf16>, vector<32x8xbf16>, vector<16x8xf32> -> vector<16x8xf32>
    %61 = vector.extract_strided_slice %8 {offsets = [0, 16], sizes = [1, 8], strides = [1, 1]} : vector<1x32xf32> to vector<1x8xf32>
    %62 = vector.broadcast %61 : vector<1x8xf32> to vector<16x8xf32>
    %63 = arith.addf %60, %62 : vector<16x8xf32>
    %c0_50 = arith.constant 0 : index
    %c1_51 = arith.constant 1 : index
    %c2_52 = arith.constant 2 : index
    %c0_53 = arith.constant 0 : index
    %c0_54 = arith.constant 0 : index
    %64 = vector.load %arg4[%c0_50, %c1_51, %c2_52, %c0_53, %c0_54] : memref<1x6x4x32x8xbf16, #tpu.memory_space<vmem>>, vector<1x1x1x32x8xbf16>
    %65 = vector.shape_cast %64 : vector<1x1x1x32x8xbf16> to vector<32x8xbf16>
    %cst_55 = arith.constant dense<0.000000e+00> : vector<16x8xf32>
    %66 = tpu.matmul %15, %65, %cst_55 {dimension_numbers = #tpu.dot_dimension_numbers<[1], [0], [0], [1], [0, 0, 1, 1], [], []>} : vector<16x32xbf16>, vector<32x8xbf16>, vector<16x8xf32> -> vector<16x8xf32>
    %67 = vector.extract_strided_slice %9 {offsets = [0, 16], sizes = [1, 8], strides = [1, 1]} : vector<1x32xf32> to vector<1x8xf32>
    %68 = vector.broadcast %67 : vector<1x8xf32> to vector<16x8xf32>
    %69 = arith.addf %66, %68 : vector<16x8xf32>
    %c0_56 = arith.constant 0 : index
    %c2_57 = arith.constant 2 : index
    %c2_58 = arith.constant 2 : index
    %c0_59 = arith.constant 0 : index
    %c0_60 = arith.constant 0 : index
    %70 = vector.load %arg4[%c0_56, %c2_57, %c2_58, %c0_59, %c0_60] : memref<1x6x4x32x8xbf16, #tpu.memory_space<vmem>>, vector<1x1x1x32x8xbf16>
    %71 = vector.shape_cast %70 : vector<1x1x1x32x8xbf16> to vector<32x8xbf16>
    %cst_61 = arith.constant dense<0.000000e+00> : vector<16x8xf32>
    %72 = tpu.matmul %15, %71, %cst_61 {dimension_numbers = #tpu.dot_dimension_numbers<[1], [0], [0], [1], [0, 0, 1, 1], [], []>} : vector<16x32xbf16>, vector<32x8xbf16>, vector<16x8xf32> -> vector<16x8xf32>
    %73 = vector.extract_strided_slice %10 {offsets = [0, 16], sizes = [1, 8], strides = [1, 1]} : vector<1x32xf32> to vector<1x8xf32>
    %74 = vector.broadcast %73 : vector<1x8xf32> to vector<16x8xf32>
    %75 = arith.addf %72, %74 : vector<16x8xf32>
    %76 = vector.shape_cast %63 : vector<16x8xf32> to vector<2x8x8xf32>
    %77 = vector.shape_cast %69 : vector<16x8xf32> to vector<2x8x8xf32>
    %78 = vector.shape_cast %75 : vector<16x8xf32> to vector<2x8x8xf32>
    %c0_62 = arith.constant 0 : index
    %c0_63 = arith.constant 0 : index
    %c3 = arith.constant 3 : index
    %c0_64 = arith.constant 0 : index
    %c0_65 = arith.constant 0 : index
    %79 = vector.load %arg4[%c0_62, %c0_63, %c3, %c0_64, %c0_65] : memref<1x6x4x32x8xbf16, #tpu.memory_space<vmem>>, vector<1x1x1x32x8xbf16>
    %80 = vector.shape_cast %79 : vector<1x1x1x32x8xbf16> to vector<32x8xbf16>
    %cst_66 = arith.constant dense<0.000000e+00> : vector<16x8xf32>
    %81 = tpu.matmul %13, %80, %cst_66 {dimension_numbers = #tpu.dot_dimension_numbers<[1], [0], [0], [1], [0, 0, 1, 1], [], []>} : vector<16x32xbf16>, vector<32x8xbf16>, vector<16x8xf32> -> vector<16x8xf32>
    %82 = vector.extract_strided_slice %8 {offsets = [0, 24], sizes = [1, 8], strides = [1, 1]} : vector<1x32xf32> to vector<1x8xf32>
    %83 = vector.broadcast %82 : vector<1x8xf32> to vector<16x8xf32>
    %84 = arith.addf %81, %83 : vector<16x8xf32>
    %c0_67 = arith.constant 0 : index
    %c1_68 = arith.constant 1 : index
    %c3_69 = arith.constant 3 : index
    %c0_70 = arith.constant 0 : index
    %c0_71 = arith.constant 0 : index
    %85 = vector.load %arg4[%c0_67, %c1_68, %c3_69, %c0_70, %c0_71] : memref<1x6x4x32x8xbf16, #tpu.memory_space<vmem>>, vector<1x1x1x32x8xbf16>
    %86 = vector.shape_cast %85 : vector<1x1x1x32x8xbf16> to vector<32x8xbf16>
    %cst_72 = arith.constant dense<0.000000e+00> : vector<16x8xf32>
    %87 = tpu.matmul %15, %86, %cst_72 {dimension_numbers = #tpu.dot_dimension_numbers<[1], [0], [0], [1], [0, 0, 1, 1], [], []>} : vector<16x32xbf16>, vector<32x8xbf16>, vector<16x8xf32> -> vector<16x8xf32>
    %88 = vector.extract_strided_slice %9 {offsets = [0, 24], sizes = [1, 8], strides = [1, 1]} : vector<1x32xf32> to vector<1x8xf32>
    %89 = vector.broadcast %88 : vector<1x8xf32> to vector<16x8xf32>
    %90 = arith.addf %87, %89 : vector<16x8xf32>
    %c0_73 = arith.constant 0 : index
    %c2_74 = arith.constant 2 : index
    %c3_75 = arith.constant 3 : index
    %c0_76 = arith.constant 0 : index
    %c0_77 = arith.constant 0 : index
    %91 = vector.load %arg4[%c0_73, %c2_74, %c3_75, %c0_76, %c0_77] : memref<1x6x4x32x8xbf16, #tpu.memory_space<vmem>>, vector<1x1x1x32x8xbf16>
    %92 = vector.shape_cast %91 : vector<1x1x1x32x8xbf16> to vector<32x8xbf16>
    %cst_78 = arith.constant dense<0.000000e+00> : vector<16x8xf32>
    %93 = tpu.matmul %15, %92, %cst_78 {dimension_numbers = #tpu.dot_dimension_numbers<[1], [0], [0], [1], [0, 0, 1, 1], [], []>} : vector<16x32xbf16>, vector<32x8xbf16>, vector<16x8xf32> -> vector<16x8xf32>
    %94 = vector.extract_strided_slice %10 {offsets = [0, 24], sizes = [1, 8], strides = [1, 1]} : vector<1x32xf32> to vector<1x8xf32>
    %95 = vector.broadcast %94 : vector<1x8xf32> to vector<16x8xf32>
    %96 = arith.addf %93, %95 : vector<16x8xf32>
    %97 = vector.shape_cast %84 : vector<16x8xf32> to vector<2x8x8xf32>
    %98 = vector.shape_cast %90 : vector<16x8xf32> to vector<2x8x8xf32>
    %99 = vector.shape_cast %96 : vector<16x8xf32> to vector<2x8x8xf32>
    %100 = tpu.concatenate %34, %55, %76, %97 in 0 : vector<2x8x8xf32>, vector<2x8x8xf32>, vector<2x8x8xf32>, vector<2x8x8xf32> -> vector<8x8x8xf32>
    %101 = tpu.concatenate %35, %56, %77, %98 in 0 : vector<2x8x8xf32>, vector<2x8x8xf32>, vector<2x8x8xf32>, vector<2x8x8xf32> -> vector<8x8x8xf32>
    %102 = tpu.concatenate %36, %57, %78, %99 in 0 : vector<2x8x8xf32>, vector<2x8x8xf32>, vector<2x8x8xf32>, vector<2x8x8xf32> -> vector<8x8x8xf32>
    %103 = arith.truncf %100 : vector<8x8x8xf32> to vector<8x8x8xbf16>
    %104 = arith.truncf %101 : vector<8x8x8xf32> to vector<8x8x8xbf16>
    "tpu.trace_start"() <{level = 10 : i32, message = "bqd,bkd->bqk"}> : () -> ()
    %cst_79 = arith.constant dense<0.000000e+00> : vector<8x8x8xf32>
    %105 = tpu.matmul %103, %104, %cst_79 {dimension_numbers = #tpu.dot_dimension_numbers<[2], [2], [1], [1], [0, 0, 0, 1, 1, 1], [0], [0]>} : vector<8x8x8xbf16>, vector<8x8x8xbf16>, vector<8x8x8xf32> -> vector<8x8x8xf32>
    "tpu.trace_stop"() : () -> ()
    %cst_80 = arith.constant 0.353553385 : f32
    %106 = vector.broadcast %cst_80 : f32 to vector<8x8x8xf32>
    %107 = arith.mulf %105, %106 : vector<8x8x8xf32>
    %108 = vector.shape_cast %5 : vector<8x8xf32> to vector<1x8x8xf32>
    %109 = vector.broadcast %108 : vector<1x8x8xf32> to vector<8x8x8xf32>
    %110 = arith.addf %107, %109 : vector<8x8x8xf32>
    %cst_81 = arith.constant dense<0xFF800000> : vector<8x8xf32>
    %111 = vector.multi_reduction <maximumf>, %110, %cst_81 [2] : vector<8x8x8xf32> to vector<8x8xf32>
    %112 = vector.shape_cast %111 : vector<8x8xf32> to vector<8x8x1xf32>
    %113 = vector.broadcast %112 : vector<8x8x1xf32> to vector<8x8x8xf32>
    %114 = arith.subf %110, %113 : vector<8x8x8xf32>
    %115 = math.exp %114 : vector<8x8x8xf32>
    %cst_82 = arith.constant dense<0.000000e+00> : vector<8x8xf32>
    %116 = vector.multi_reduction <add>, %115, %cst_82 [2] : vector<8x8x8xf32> to vector<8x8xf32>
    %117 = vector.shape_cast %116 : vector<8x8xf32> to vector<8x8x1xf32>
    %118 = tpu.reciprocal %117 {approx = true} : vector<8x8x1xf32> -> vector<8x8x1xf32>
    %119 = vector.broadcast %118 : vector<8x8x1xf32> to vector<8x8x8xf32>
    %120 = arith.mulf %115, %119 : vector<8x8x8xf32>
    %121 = arith.truncf %120 : vector<8x8x8xf32> to vector<8x8x8xbf16>
    %122 = arith.truncf %102 : vector<8x8x8xf32> to vector<8x8x8xbf16>
    "tpu.trace_start"() <{level = 10 : i32, message = "bqk,bkd->bqd"}> : () -> ()
    %cst_83 = arith.constant dense<0.000000e+00> : vector<8x8x8xf32>
    %123 = tpu.matmul %121, %122, %cst_83 {dimension_numbers = #tpu.dot_dimension_numbers<[2], [1], [1], [2], [0, 0, 0, 1, 1, 2], [0], [0]>} : vector<8x8x8xbf16>, vector<8x8x8xbf16>, vector<8x8x8xf32> -> vector<8x8x8xf32>
    %cst_84 = arith.constant 0.000000e+00 : f32
    "tpu.trace_stop"() : () -> ()
    %124 = vector.broadcast %cst_84 : f32 to vector<16x32xf32>
    %125 = vector.extract_strided_slice %123 {offsets = [0, 0, 0], sizes = [2, 8, 8], strides = [1, 1, 1]} : vector<8x8x8xf32> to vector<2x8x8xf32>
    %126 = vector.shape_cast %125 : vector<2x8x8xf32> to vector<16x8xf32>
    %127 = arith.truncf %126 : vector<16x8xf32> to vector<16x8xbf16>
    %c0_85 = arith.constant 0 : index
    %c0_86 = arith.constant 0 : index
    %c0_87 = arith.constant 0 : index
    %c0_88 = arith.constant 0 : index
    %c0_89 = arith.constant 0 : index
    %128 = vector.load %arg5[%c0_85, %c0_86, %c0_87, %c0_88, %c0_89] : memref<1x2x4x8x32xbf16, #tpu.memory_space<vmem>>, vector<1x1x1x8x32xbf16>
    %129 = vector.shape_cast %128 : vector<1x1x1x8x32xbf16> to vector<8x32xbf16>
    %cst_90 = arith.constant dense<0.000000e+00> : vector<16x32xf32>
    %130 = tpu.matmul %127, %129, %cst_90 {dimension_numbers = #tpu.dot_dimension_numbers<[1], [0], [0], [1], [0, 0, 1, 1], [], []>} : vector<16x8xbf16>, vector<8x32xbf16>, vector<16x32xf32> -> vector<16x32xf32>
    %131 = arith.addf %124, %130 : vector<16x32xf32>
    %132 = vector.extract_strided_slice %123 {offsets = [2, 0, 0], sizes = [2, 8, 8], strides = [1, 1, 1]} : vector<8x8x8xf32> to vector<2x8x8xf32>
    %133 = vector.shape_cast %132 : vector<2x8x8xf32> to vector<16x8xf32>
    %134 = arith.truncf %133 : vector<16x8xf32> to vector<16x8xbf16>
    %c0_91 = arith.constant 0 : index
    %c0_92 = arith.constant 0 : index
    %c1_93 = arith.constant 1 : index
    %c0_94 = arith.constant 0 : index
    %c0_95 = arith.constant 0 : index
    %135 = vector.load %arg5[%c0_91, %c0_92, %c1_93, %c0_94, %c0_95] : memref<1x2x4x8x32xbf16, #tpu.memory_space<vmem>>, vector<1x1x1x8x32xbf16>
    %136 = vector.shape_cast %135 : vector<1x1x1x8x32xbf16> to vector<8x32xbf16>
    %cst_96 = arith.constant dense<0.000000e+00> : vector<16x32xf32>
    %137 = tpu.matmul %134, %136, %cst_96 {dimension_numbers = #tpu.dot_dimension_numbers<[1], [0], [0], [1], [0, 0, 1, 1], [], []>} : vector<16x8xbf16>, vector<8x32xbf16>, vector<16x32xf32> -> vector<16x32xf32>
    %138 = arith.addf %131, %137 : vector<16x32xf32>
    %139 = vector.extract_strided_slice %123 {offsets = [4, 0, 0], sizes = [2, 8, 8], strides = [1, 1, 1]} : vector<8x8x8xf32> to vector<2x8x8xf32>
    %140 = vector.shape_cast %139 : vector<2x8x8xf32> to vector<16x8xf32>
    %141 = arith.truncf %140 : vector<16x8xf32> to vector<16x8xbf16>
    %c0_97 = arith.constant 0 : index
    %c0_98 = arith.constant 0 : index
    %c2_99 = arith.constant 2 : index
    %c0_100 = arith.constant 0 : index
    %c0_101 = arith.constant 0 : index
    %142 = vector.load %arg5[%c0_97, %c0_98, %c2_99, %c0_100, %c0_101] : memref<1x2x4x8x32xbf16, #tpu.memory_space<vmem>>, vector<1x1x1x8x32xbf16>
    %143 = vector.shape_cast %142 : vector<1x1x1x8x32xbf16> to vector<8x32xbf16>
    %cst_102 = arith.constant dense<0.000000e+00> : vector<16x32xf32>
    %144 = tpu.matmul %141, %143, %cst_102 {dimension_numbers = #tpu.dot_dimension_numbers<[1], [0], [0], [1], [0, 0, 1, 1], [], []>} : vector<16x8xbf16>, vector<8x32xbf16>, vector<16x32xf32> -> vector<16x32xf32>
    %145 = arith.addf %138, %144 : vector<16x32xf32>
    %146 = vector.extract_strided_slice %123 {offsets = [6, 0, 0], sizes = [2, 8, 8], strides = [1, 1, 1]} : vector<8x8x8xf32> to vector<2x8x8xf32>
    %147 = vector.shape_cast %146 : vector<2x8x8xf32> to vector<16x8xf32>
    %148 = arith.truncf %147 : vector<16x8xf32> to vector<16x8xbf16>
    %c0_103 = arith.constant 0 : index
    %c0_104 = arith.constant 0 : index
    %c3_105 = arith.constant 3 : index
    %c0_106 = arith.constant 0 : index
    %c0_107 = arith.constant 0 : index
    %149 = vector.load %arg5[%c0_103, %c0_104, %c3_105, %c0_106, %c0_107] : memref<1x2x4x8x32xbf16, #tpu.memory_space<vmem>>, vector<1x1x1x8x32xbf16>
    %150 = vector.shape_cast %149 : vector<1x1x1x8x32xbf16> to vector<8x32xbf16>
    %cst_108 = arith.constant dense<0.000000e+00> : vector<16x32xf32>
    %151 = tpu.matmul %148, %150, %cst_108 {dimension_numbers = #tpu.dot_dimension_numbers<[1], [0], [0], [1], [0, 0, 1, 1], [], []>} : vector<16x8xbf16>, vector<8x32xbf16>, vector<16x32xf32> -> vector<16x32xf32>
    %152 = arith.addf %145, %151 : vector<16x32xf32>
    %153 = vector.broadcast %11 : vector<1x32xf32> to vector<16x32xf32>
    %154 = arith.addf %152, %153 : vector<16x32xf32>
    %155 = vector.shape_cast %154 : vector<16x32xf32> to vector<2x8x32xf32>
    %156 = arith.addf %3, %155 : vector<2x8x32xf32>
    %157 = vector.extract_strided_slice %7 {offsets = [4, 0], sizes = [1, 32], strides = [1, 1]} : vector<16x64xf32> to vector<1x32xf32>
    %158 = vector.extract_strided_slice %7 {offsets = [5, 0], sizes = [1, 32], strides = [1, 1]} : vector<16x64xf32> to vector<1x32xf32>
    %cst_109 = arith.constant dense<0.000000e+00> : vector<2x8xf32>
    %159 = vector.multi_reduction <add>, %156, %cst_109 [2] : vector<2x8x32xf32> to vector<2x8xf32>
    %160 = vector.shape_cast %159 : vector<2x8xf32> to vector<2x8x1xf32>
    %cst_110 = arith.constant 3.200000e+01 : f32
    %161 = vector.broadcast %cst_110 : f32 to vector<2x8x1xf32>
    %162 = arith.divf %160, %161 : vector<2x8x1xf32>
    %163 = vector.broadcast %162 : vector<2x8x1xf32> to vector<2x8x32xf32>
    %164 = arith.subf %156, %163 : vector<2x8x32xf32>
    %165 = arith.mulf %164, %164 : vector<2x8x32xf32>
    %cst_111 = arith.constant dense<0.000000e+00> : vector<2x8xf32>
    %166 = vector.multi_reduction <add>, %165, %cst_111 [2] : vector<2x8x32xf32> to vector<2x8xf32>
    %167 = vector.shape_cast %166 : vector<2x8xf32> to vector<2x8x1xf32>
    %cst_112 = arith.constant 3.200000e+01 : f32
    %168 = vector.broadcast %cst_112 : f32 to vector<2x8x1xf32>
    %169 = arith.divf %167, %168 : vector<2x8x1xf32>
    %170 = vector.broadcast %162 : vector<2x8x1xf32> to vector<2x8x32xf32>
    %171 = arith.subf %156, %170 : vector<2x8x32xf32>
    %cst_113 = arith.constant 9.99999974E-6 : f32
    %172 = vector.broadcast %cst_113 : f32 to vector<2x8x1xf32>
    %173 = arith.addf %169, %172 : vector<2x8x1xf32>
    %174 = math.rsqrt %173 : vector<2x8x1xf32>
    %175 = vector.broadcast %174 : vector<2x8x1xf32> to vector<2x8x32xf32>
    %176 = arith.mulf %171, %175 : vector<2x8x32xf32>
    %177 = vector.shape_cast %157 : vector<1x32xf32> to vector<1x1x32xf32>
    %178 = vector.broadcast %177 : vector<1x1x32xf32> to vector<2x8x32xf32>
    %179 = arith.mulf %176, %178 : vector<2x8x32xf32>
    %180 = vector.shape_cast %158 : vector<1x32xf32> to vector<1x1x32xf32>
    %181 = vector.broadcast %180 : vector<1x1x32xf32> to vector<2x8x32xf32>
    %182 = arith.addf %179, %181 : vector<2x8x32xf32>
    %183 = vector.extract_strided_slice %7 {offsets = [6, 0], sizes = [1, 32], strides = [1, 1]} : vector<16x64xf32> to vector<1x32xf32>
    %184 = vector.extract_strided_slice %7 {offsets = [7, 0], sizes = [1, 32], strides = [1, 1]} : vector<16x64xf32> to vector<1x32xf32>
    %185 = vector.extract_strided_slice %7 {offsets = [8, 0], sizes = [1, 32], strides = [1, 1]} : vector<16x64xf32> to vector<1x32xf32>
    %186 = vector.extract_strided_slice %7 {offsets = [9, 0], sizes = [1, 32], strides = [1, 1]} : vector<16x64xf32> to vector<1x32xf32>
    %187 = vector.shape_cast %182 : vector<2x8x32xf32> to vector<16x32xf32>
    %188 = arith.truncf %187 : vector<16x32xf32> to vector<16x32xbf16>
    %189 = vector.shape_cast %4 : vector<2x8x32xf32> to vector<16x32xf32>
    %190 = arith.truncf %189 : vector<16x32xf32> to vector<16x32xbf16>
    %c0_114 = arith.constant 0 : index
    %c3_115 = arith.constant 3 : index
    %c0_116 = arith.constant 0 : index
    %c0_117 = arith.constant 0 : index
    %c0_118 = arith.constant 0 : index
    %191 = vector.load %arg4[%c0_114, %c3_115, %c0_116, %c0_117, %c0_118] : memref<1x6x4x32x8xbf16, #tpu.memory_space<vmem>>, vector<1x1x1x32x8xbf16>
    %192 = vector.shape_cast %191 : vector<1x1x1x32x8xbf16> to vector<32x8xbf16>
    %cst_119 = arith.constant dense<0.000000e+00> : vector<16x8xf32>
    %193 = tpu.matmul %188, %192, %cst_119 {dimension_numbers = #tpu.dot_dimension_numbers<[1], [0], [0], [1], [0, 0, 1, 1], [], []>} : vector<16x32xbf16>, vector<32x8xbf16>, vector<16x8xf32> -> vector<16x8xf32>
    %194 = vector.extract_strided_slice %183 {offsets = [0, 0], sizes = [1, 8], strides = [1, 1]} : vector<1x32xf32> to vector<1x8xf32>
    %195 = vector.broadcast %194 : vector<1x8xf32> to vector<16x8xf32>
    %196 = arith.addf %193, %195 : vector<16x8xf32>
    %c0_120 = arith.constant 0 : index
    %c4 = arith.constant 4 : index
    %c0_121 = arith.constant 0 : index
    %c0_122 = arith.constant 0 : index
    %c0_123 = arith.constant 0 : index
    %197 = vector.load %arg4[%c0_120, %c4, %c0_121, %c0_122, %c0_123] : memref<1x6x4x32x8xbf16, #tpu.memory_space<vmem>>, vector<1x1x1x32x8xbf16>
    %198 = vector.shape_cast %197 : vector<1x1x1x32x8xbf16> to vector<32x8xbf16>
    %cst_124 = arith.constant dense<0.000000e+00> : vector<16x8xf32>
    %199 = tpu.matmul %190, %198, %cst_124 {dimension_numbers = #tpu.dot_dimension_numbers<[1], [0], [0], [1], [0, 0, 1, 1], [], []>} : vector<16x32xbf16>, vector<32x8xbf16>, vector<16x8xf32> -> vector<16x8xf32>
    %200 = vector.extract_strided_slice %184 {offsets = [0, 0], sizes = [1, 8], strides = [1, 1]} : vector<1x32xf32> to vector<1x8xf32>
    %201 = vector.broadcast %200 : vector<1x8xf32> to vector<16x8xf32>
    %202 = arith.addf %199, %201 : vector<16x8xf32>
    %c0_125 = arith.constant 0 : index
    %c5 = arith.constant 5 : index
    %c0_126 = arith.constant 0 : index
    %c0_127 = arith.constant 0 : index
    %c0_128 = arith.constant 0 : index
    %203 = vector.load %arg4[%c0_125, %c5, %c0_126, %c0_127, %c0_128] : memref<1x6x4x32x8xbf16, #tpu.memory_space<vmem>>, vector<1x1x1x32x8xbf16>
    %204 = vector.shape_cast %203 : vector<1x1x1x32x8xbf16> to vector<32x8xbf16>
    %cst_129 = arith.constant dense<0.000000e+00> : vector<16x8xf32>
    %205 = tpu.matmul %190, %204, %cst_129 {dimension_numbers = #tpu.dot_dimension_numbers<[1], [0], [0], [1], [0, 0, 1, 1], [], []>} : vector<16x32xbf16>, vector<32x8xbf16>, vector<16x8xf32> -> vector<16x8xf32>
    %206 = vector.extract_strided_slice %185 {offsets = [0, 0], sizes = [1, 8], strides = [1, 1]} : vector<1x32xf32> to vector<1x8xf32>
    %207 = vector.broadcast %206 : vector<1x8xf32> to vector<16x8xf32>
    %208 = arith.addf %205, %207 : vector<16x8xf32>
    %209 = vector.shape_cast %196 : vector<16x8xf32> to vector<2x8x8xf32>
    %210 = vector.shape_cast %202 : vector<16x8xf32> to vector<2x8x8xf32>
    %211 = vector.shape_cast %208 : vector<16x8xf32> to vector<2x8x8xf32>
    %c0_130 = arith.constant 0 : index
    %c3_131 = arith.constant 3 : index
    %c1_132 = arith.constant 1 : index
    %c0_133 = arith.constant 0 : index
    %c0_134 = arith.constant 0 : index
    %212 = vector.load %arg4[%c0_130, %c3_131, %c1_132, %c0_133, %c0_134] : memref<1x6x4x32x8xbf16, #tpu.memory_space<vmem>>, vector<1x1x1x32x8xbf16>
    %213 = vector.shape_cast %212 : vector<1x1x1x32x8xbf16> to vector<32x8xbf16>
    %cst_135 = arith.constant dense<0.000000e+00> : vector<16x8xf32>
    %214 = tpu.matmul %188, %213, %cst_135 {dimension_numbers = #tpu.dot_dimension_numbers<[1], [0], [0], [1], [0, 0, 1, 1], [], []>} : vector<16x32xbf16>, vector<32x8xbf16>, vector<16x8xf32> -> vector<16x8xf32>
    %215 = vector.extract_strided_slice %183 {offsets = [0, 8], sizes = [1, 8], strides = [1, 1]} : vector<1x32xf32> to vector<1x8xf32>
    %216 = vector.broadcast %215 : vector<1x8xf32> to vector<16x8xf32>
    %217 = arith.addf %214, %216 : vector<16x8xf32>
    %c0_136 = arith.constant 0 : index
    %c4_137 = arith.constant 4 : index
    %c1_138 = arith.constant 1 : index
    %c0_139 = arith.constant 0 : index
    %c0_140 = arith.constant 0 : index
    %218 = vector.load %arg4[%c0_136, %c4_137, %c1_138, %c0_139, %c0_140] : memref<1x6x4x32x8xbf16, #tpu.memory_space<vmem>>, vector<1x1x1x32x8xbf16>
    %219 = vector.shape_cast %218 : vector<1x1x1x32x8xbf16> to vector<32x8xbf16>
    %cst_141 = arith.constant dense<0.000000e+00> : vector<16x8xf32>
    %220 = tpu.matmul %190, %219, %cst_141 {dimension_numbers = #tpu.dot_dimension_numbers<[1], [0], [0], [1], [0, 0, 1, 1], [], []>} : vector<16x32xbf16>, vector<32x8xbf16>, vector<16x8xf32> -> vector<16x8xf32>
    %221 = vector.extract_strided_slice %184 {offsets = [0, 8], sizes = [1, 8], strides = [1, 1]} : vector<1x32xf32> to vector<1x8xf32>
    %222 = vector.broadcast %221 : vector<1x8xf32> to vector<16x8xf32>
    %223 = arith.addf %220, %222 : vector<16x8xf32>
    %c0_142 = arith.constant 0 : index
    %c5_143 = arith.constant 5 : index
    %c1_144 = arith.constant 1 : index
    %c0_145 = arith.constant 0 : index
    %c0_146 = arith.constant 0 : index
    %224 = vector.load %arg4[%c0_142, %c5_143, %c1_144, %c0_145, %c0_146] : memref<1x6x4x32x8xbf16, #tpu.memory_space<vmem>>, vector<1x1x1x32x8xbf16>
    %225 = vector.shape_cast %224 : vector<1x1x1x32x8xbf16> to vector<32x8xbf16>
    %cst_147 = arith.constant dense<0.000000e+00> : vector<16x8xf32>
    %226 = tpu.matmul %190, %225, %cst_147 {dimension_numbers = #tpu.dot_dimension_numbers<[1], [0], [0], [1], [0, 0, 1, 1], [], []>} : vector<16x32xbf16>, vector<32x8xbf16>, vector<16x8xf32> -> vector<16x8xf32>
    %227 = vector.extract_strided_slice %185 {offsets = [0, 8], sizes = [1, 8], strides = [1, 1]} : vector<1x32xf32> to vector<1x8xf32>
    %228 = vector.broadcast %227 : vector<1x8xf32> to vector<16x8xf32>
    %229 = arith.addf %226, %228 : vector<16x8xf32>
    %230 = vector.shape_cast %217 : vector<16x8xf32> to vector<2x8x8xf32>
    %231 = vector.shape_cast %223 : vector<16x8xf32> to vector<2x8x8xf32>
    %232 = vector.shape_cast %229 : vector<16x8xf32> to vector<2x8x8xf32>
    %c0_148 = arith.constant 0 : index
    %c3_149 = arith.constant 3 : index
    %c2_150 = arith.constant 2 : index
    %c0_151 = arith.constant 0 : index
    %c0_152 = arith.constant 0 : index
    %233 = vector.load %arg4[%c0_148, %c3_149, %c2_150, %c0_151, %c0_152] : memref<1x6x4x32x8xbf16, #tpu.memory_space<vmem>>, vector<1x1x1x32x8xbf16>
    %234 = vector.shape_cast %233 : vector<1x1x1x32x8xbf16> to vector<32x8xbf16>
    %cst_153 = arith.constant dense<0.000000e+00> : vector<16x8xf32>
    %235 = tpu.matmul %188, %234, %cst_153 {dimension_numbers = #tpu.dot_dimension_numbers<[1], [0], [0], [1], [0, 0, 1, 1], [], []>} : vector<16x32xbf16>, vector<32x8xbf16>, vector<16x8xf32> -> vector<16x8xf32>
    %236 = vector.extract_strided_slice %183 {offsets = [0, 16], sizes = [1, 8], strides = [1, 1]} : vector<1x32xf32> to vector<1x8xf32>
    %237 = vector.broadcast %236 : vector<1x8xf32> to vector<16x8xf32>
    %238 = arith.addf %235, %237 : vector<16x8xf32>
    %c0_154 = arith.constant 0 : index
    %c4_155 = arith.constant 4 : index
    %c2_156 = arith.constant 2 : index
    %c0_157 = arith.constant 0 : index
    %c0_158 = arith.constant 0 : index
    %239 = vector.load %arg4[%c0_154, %c4_155, %c2_156, %c0_157, %c0_158] : memref<1x6x4x32x8xbf16, #tpu.memory_space<vmem>>, vector<1x1x1x32x8xbf16>
    %240 = vector.shape_cast %239 : vector<1x1x1x32x8xbf16> to vector<32x8xbf16>
    %cst_159 = arith.constant dense<0.000000e+00> : vector<16x8xf32>
    %241 = tpu.matmul %190, %240, %cst_159 {dimension_numbers = #tpu.dot_dimension_numbers<[1], [0], [0], [1], [0, 0, 1, 1], [], []>} : vector<16x32xbf16>, vector<32x8xbf16>, vector<16x8xf32> -> vector<16x8xf32>
    %242 = vector.extract_strided_slice %184 {offsets = [0, 16], sizes = [1, 8], strides = [1, 1]} : vector<1x32xf32> to vector<1x8xf32>
    %243 = vector.broadcast %242 : vector<1x8xf32> to vector<16x8xf32>
    %244 = arith.addf %241, %243 : vector<16x8xf32>
    %c0_160 = arith.constant 0 : index
    %c5_161 = arith.constant 5 : index
    %c2_162 = arith.constant 2 : index
    %c0_163 = arith.constant 0 : index
    %c0_164 = arith.constant 0 : index
    %245 = vector.load %arg4[%c0_160, %c5_161, %c2_162, %c0_163, %c0_164] : memref<1x6x4x32x8xbf16, #tpu.memory_space<vmem>>, vector<1x1x1x32x8xbf16>
    %246 = vector.shape_cast %245 : vector<1x1x1x32x8xbf16> to vector<32x8xbf16>
    %cst_165 = arith.constant dense<0.000000e+00> : vector<16x8xf32>
    %247 = tpu.matmul %190, %246, %cst_165 {dimension_numbers = #tpu.dot_dimension_numbers<[1], [0], [0], [1], [0, 0, 1, 1], [], []>} : vector<16x32xbf16>, vector<32x8xbf16>, vector<16x8xf32> -> vector<16x8xf32>
    %248 = vector.extract_strided_slice %185 {offsets = [0, 16], sizes = [1, 8], strides = [1, 1]} : vector<1x32xf32> to vector<1x8xf32>
    %249 = vector.broadcast %248 : vector<1x8xf32> to vector<16x8xf32>
    %250 = arith.addf %247, %249 : vector<16x8xf32>
    %251 = vector.shape_cast %238 : vector<16x8xf32> to vector<2x8x8xf32>
    %252 = vector.shape_cast %244 : vector<16x8xf32> to vector<2x8x8xf32>
    %253 = vector.shape_cast %250 : vector<16x8xf32> to vector<2x8x8xf32>
    %c0_166 = arith.constant 0 : index
    %c3_167 = arith.constant 3 : index
    %c3_168 = arith.constant 3 : index
    %c0_169 = arith.constant 0 : index
    %c0_170 = arith.constant 0 : index
    %254 = vector.load %arg4[%c0_166, %c3_167, %c3_168, %c0_169, %c0_170] : memref<1x6x4x32x8xbf16, #tpu.memory_space<vmem>>, vector<1x1x1x32x8xbf16>
    %255 = vector.shape_cast %254 : vector<1x1x1x32x8xbf16> to vector<32x8xbf16>
    %cst_171 = arith.constant dense<0.000000e+00> : vector<16x8xf32>
    %256 = tpu.matmul %188, %255, %cst_171 {dimension_numbers = #tpu.dot_dimension_numbers<[1], [0], [0], [1], [0, 0, 1, 1], [], []>} : vector<16x32xbf16>, vector<32x8xbf16>, vector<16x8xf32> -> vector<16x8xf32>
    %257 = vector.extract_strided_slice %183 {offsets = [0, 24], sizes = [1, 8], strides = [1, 1]} : vector<1x32xf32> to vector<1x8xf32>
    %258 = vector.broadcast %257 : vector<1x8xf32> to vector<16x8xf32>
    %259 = arith.addf %256, %258 : vector<16x8xf32>
    %c0_172 = arith.constant 0 : index
    %c4_173 = arith.constant 4 : index
    %c3_174 = arith.constant 3 : index
    %c0_175 = arith.constant 0 : index
    %c0_176 = arith.constant 0 : index
    %260 = vector.load %arg4[%c0_172, %c4_173, %c3_174, %c0_175, %c0_176] : memref<1x6x4x32x8xbf16, #tpu.memory_space<vmem>>, vector<1x1x1x32x8xbf16>
    %261 = vector.shape_cast %260 : vector<1x1x1x32x8xbf16> to vector<32x8xbf16>
    %cst_177 = arith.constant dense<0.000000e+00> : vector<16x8xf32>
    %262 = tpu.matmul %190, %261, %cst_177 {dimension_numbers = #tpu.dot_dimension_numbers<[1], [0], [0], [1], [0, 0, 1, 1], [], []>} : vector<16x32xbf16>, vector<32x8xbf16>, vector<16x8xf32> -> vector<16x8xf32>
    %263 = vector.extract_strided_slice %184 {offsets = [0, 24], sizes = [1, 8], strides = [1, 1]} : vector<1x32xf32> to vector<1x8xf32>
    %264 = vector.broadcast %263 : vector<1x8xf32> to vector<16x8xf32>
    %265 = arith.addf %262, %264 : vector<16x8xf32>
    %c0_178 = arith.constant 0 : index
    %c5_179 = arith.constant 5 : index
    %c3_180 = arith.constant 3 : index
    %c0_181 = arith.constant 0 : index
    %c0_182 = arith.constant 0 : index
    %266 = vector.load %arg4[%c0_178, %c5_179, %c3_180, %c0_181, %c0_182] : memref<1x6x4x32x8xbf16, #tpu.memory_space<vmem>>, vector<1x1x1x32x8xbf16>
    %267 = vector.shape_cast %266 : vector<1x1x1x32x8xbf16> to vector<32x8xbf16>
    %cst_183 = arith.constant dense<0.000000e+00> : vector<16x8xf32>
    %268 = tpu.matmul %190, %267, %cst_183 {dimension_numbers = #tpu.dot_dimension_numbers<[1], [0], [0], [1], [0, 0, 1, 1], [], []>} : vector<16x32xbf16>, vector<32x8xbf16>, vector<16x8xf32> -> vector<16x8xf32>
    %269 = vector.extract_strided_slice %185 {offsets = [0, 24], sizes = [1, 8], strides = [1, 1]} : vector<1x32xf32> to vector<1x8xf32>
    %270 = vector.broadcast %269 : vector<1x8xf32> to vector<16x8xf32>
    %271 = arith.addf %268, %270 : vector<16x8xf32>
    %272 = vector.shape_cast %259 : vector<16x8xf32> to vector<2x8x8xf32>
    %273 = vector.shape_cast %265 : vector<16x8xf32> to vector<2x8x8xf32>
    %274 = vector.shape_cast %271 : vector<16x8xf32> to vector<2x8x8xf32>
    %275 = tpu.concatenate %209, %230, %251, %272 in 0 : vector<2x8x8xf32>, vector<2x8x8xf32>, vector<2x8x8xf32>, vector<2x8x8xf32> -> vector<8x8x8xf32>
    %276 = tpu.concatenate %210, %231, %252, %273 in 0 : vector<2x8x8xf32>, vector<2x8x8xf32>, vector<2x8x8xf32>, vector<2x8x8xf32> -> vector<8x8x8xf32>
    %277 = tpu.concatenate %211, %232, %253, %274 in 0 : vector<2x8x8xf32>, vector<2x8x8xf32>, vector<2x8x8xf32>, vector<2x8x8xf32> -> vector<8x8x8xf32>
    %278 = arith.truncf %275 : vector<8x8x8xf32> to vector<8x8x8xbf16>
    %279 = arith.truncf %276 : vector<8x8x8xf32> to vector<8x8x8xbf16>
    "tpu.trace_start"() <{level = 10 : i32, message = "bqd,bkd->bqk"}> : () -> ()
    %cst_184 = arith.constant dense<0.000000e+00> : vector<8x8x8xf32>
    %280 = tpu.matmul %278, %279, %cst_184 {dimension_numbers = #tpu.dot_dimension_numbers<[2], [2], [1], [1], [0, 0, 0, 1, 1, 1], [0], [0]>} : vector<8x8x8xbf16>, vector<8x8x8xbf16>, vector<8x8x8xf32> -> vector<8x8x8xf32>
    "tpu.trace_stop"() : () -> ()
    %cst_185 = arith.constant 0.353553385 : f32
    %281 = vector.broadcast %cst_185 : f32 to vector<8x8x8xf32>
    %282 = arith.mulf %280, %281 : vector<8x8x8xf32>
    %cst_186 = arith.constant dense<0xFF800000> : vector<8x8xf32>
    %283 = vector.multi_reduction <maximumf>, %282, %cst_186 [2] : vector<8x8x8xf32> to vector<8x8xf32>
    %284 = vector.shape_cast %283 : vector<8x8xf32> to vector<8x8x1xf32>
    %285 = vector.broadcast %284 : vector<8x8x1xf32> to vector<8x8x8xf32>
    %286 = arith.subf %282, %285 : vector<8x8x8xf32>
    %287 = math.exp %286 : vector<8x8x8xf32>
    %cst_187 = arith.constant dense<0.000000e+00> : vector<8x8xf32>
    %288 = vector.multi_reduction <add>, %287, %cst_187 [2] : vector<8x8x8xf32> to vector<8x8xf32>
    %289 = vector.shape_cast %288 : vector<8x8xf32> to vector<8x8x1xf32>
    %290 = tpu.reciprocal %289 {approx = true} : vector<8x8x1xf32> -> vector<8x8x1xf32>
    %291 = vector.broadcast %290 : vector<8x8x1xf32> to vector<8x8x8xf32>
    %292 = arith.mulf %287, %291 : vector<8x8x8xf32>
    %293 = arith.truncf %292 : vector<8x8x8xf32> to vector<8x8x8xbf16>
    %294 = arith.truncf %277 : vector<8x8x8xf32> to vector<8x8x8xbf16>
    "tpu.trace_start"() <{level = 10 : i32, message = "bqk,bkd->bqd"}> : () -> ()
    %cst_188 = arith.constant dense<0.000000e+00> : vector<8x8x8xf32>
    %295 = tpu.matmul %293, %294, %cst_188 {dimension_numbers = #tpu.dot_dimension_numbers<[2], [1], [1], [2], [0, 0, 0, 1, 1, 2], [0], [0]>} : vector<8x8x8xbf16>, vector<8x8x8xbf16>, vector<8x8x8xf32> -> vector<8x8x8xf32>
    %cst_189 = arith.constant 0.000000e+00 : f32
    "tpu.trace_stop"() : () -> ()
    %296 = vector.broadcast %cst_189 : f32 to vector<16x32xf32>
    %297 = vector.extract_strided_slice %295 {offsets = [0, 0, 0], sizes = [2, 8, 8], strides = [1, 1, 1]} : vector<8x8x8xf32> to vector<2x8x8xf32>
    %298 = vector.shape_cast %297 : vector<2x8x8xf32> to vector<16x8xf32>
    %299 = arith.truncf %298 : vector<16x8xf32> to vector<16x8xbf16>
    %c0_190 = arith.constant 0 : index
    %c1_191 = arith.constant 1 : index
    %c0_192 = arith.constant 0 : index
    %c0_193 = arith.constant 0 : index
    %c0_194 = arith.constant 0 : index
    %300 = vector.load %arg5[%c0_190, %c1_191, %c0_192, %c0_193, %c0_194] : memref<1x2x4x8x32xbf16, #tpu.memory_space<vmem>>, vector<1x1x1x8x32xbf16>
    %301 = vector.shape_cast %300 : vector<1x1x1x8x32xbf16> to vector<8x32xbf16>
    %cst_195 = arith.constant dense<0.000000e+00> : vector<16x32xf32>
    %302 = tpu.matmul %299, %301, %cst_195 {dimension_numbers = #tpu.dot_dimension_numbers<[1], [0], [0], [1], [0, 0, 1, 1], [], []>} : vector<16x8xbf16>, vector<8x32xbf16>, vector<16x32xf32> -> vector<16x32xf32>
    %303 = arith.addf %296, %302 : vector<16x32xf32>
    %304 = vector.extract_strided_slice %295 {offsets = [2, 0, 0], sizes = [2, 8, 8], strides = [1, 1, 1]} : vector<8x8x8xf32> to vector<2x8x8xf32>
    %305 = vector.shape_cast %304 : vector<2x8x8xf32> to vector<16x8xf32>
    %306 = arith.truncf %305 : vector<16x8xf32> to vector<16x8xbf16>
    %c0_196 = arith.constant 0 : index
    %c1_197 = arith.constant 1 : index
    %c1_198 = arith.constant 1 : index
    %c0_199 = arith.constant 0 : index
    %c0_200 = arith.constant 0 : index
    %307 = vector.load %arg5[%c0_196, %c1_197, %c1_198, %c0_199, %c0_200] : memref<1x2x4x8x32xbf16, #tpu.memory_space<vmem>>, vector<1x1x1x8x32xbf16>
    %308 = vector.shape_cast %307 : vector<1x1x1x8x32xbf16> to vector<8x32xbf16>
    %cst_201 = arith.constant dense<0.000000e+00> : vector<16x32xf32>
    %309 = tpu.matmul %306, %308, %cst_201 {dimension_numbers = #tpu.dot_dimension_numbers<[1], [0], [0], [1], [0, 0, 1, 1], [], []>} : vector<16x8xbf16>, vector<8x32xbf16>, vector<16x32xf32> -> vector<16x32xf32>
    %310 = arith.addf %303, %309 : vector<16x32xf32>
    %311 = vector.extract_strided_slice %295 {offsets = [4, 0, 0], sizes = [2, 8, 8], strides = [1, 1, 1]} : vector<8x8x8xf32> to vector<2x8x8xf32>
    %312 = vector.shape_cast %311 : vector<2x8x8xf32> to vector<16x8xf32>
    %313 = arith.truncf %312 : vector<16x8xf32> to vector<16x8xbf16>
    %c0_202 = arith.constant 0 : index
    %c1_203 = arith.constant 1 : index
    %c2_204 = arith.constant 2 : index
    %c0_205 = arith.constant 0 : index
    %c0_206 = arith.constant 0 : index
    %314 = vector.load %arg5[%c0_202, %c1_203, %c2_204, %c0_205, %c0_206] : memref<1x2x4x8x32xbf16, #tpu.memory_space<vmem>>, vector<1x1x1x8x32xbf16>
    %315 = vector.shape_cast %314 : vector<1x1x1x8x32xbf16> to vector<8x32xbf16>
    %cst_207 = arith.constant dense<0.000000e+00> : vector<16x32xf32>
    %316 = tpu.matmul %313, %315, %cst_207 {dimension_numbers = #tpu.dot_dimension_numbers<[1], [0], [0], [1], [0, 0, 1, 1], [], []>} : vector<16x8xbf16>, vector<8x32xbf16>, vector<16x32xf32> -> vector<16x32xf32>
    %317 = arith.addf %310, %316 : vector<16x32xf32>
    %318 = vector.extract_strided_slice %295 {offsets = [6, 0, 0], sizes = [2, 8, 8], strides = [1, 1, 1]} : vector<8x8x8xf32> to vector<2x8x8xf32>
    %319 = vector.shape_cast %318 : vector<2x8x8xf32> to vector<16x8xf32>
    %320 = arith.truncf %319 : vector<16x8xf32> to vector<16x8xbf16>
    %c0_208 = arith.constant 0 : index
    %c1_209 = arith.constant 1 : index
    %c3_210 = arith.constant 3 : index
    %c0_211 = arith.constant 0 : index
    %c0_212 = arith.constant 0 : index
    %321 = vector.load %arg5[%c0_208, %c1_209, %c3_210, %c0_211, %c0_212] : memref<1x2x4x8x32xbf16, #tpu.memory_space<vmem>>, vector<1x1x1x8x32xbf16>
    %322 = vector.shape_cast %321 : vector<1x1x1x8x32xbf16> to vector<8x32xbf16>
    %cst_213 = arith.constant dense<0.000000e+00> : vector<16x32xf32>
    %323 = tpu.matmul %320, %322, %cst_213 {dimension_numbers = #tpu.dot_dimension_numbers<[1], [0], [0], [1], [0, 0, 1, 1], [], []>} : vector<16x8xbf16>, vector<8x32xbf16>, vector<16x32xf32> -> vector<16x32xf32>
    %324 = arith.addf %317, %323 : vector<16x32xf32>
    %325 = vector.broadcast %186 : vector<1x32xf32> to vector<16x32xf32>
    %326 = arith.addf %324, %325 : vector<16x32xf32>
    %327 = vector.shape_cast %326 : vector<16x32xf32> to vector<2x8x32xf32>
    %328 = arith.addf %182, %327 : vector<2x8x32xf32>
    %329 = vector.extract_strided_slice %7 {offsets = [10, 0], sizes = [1, 32], strides = [1, 1]} : vector<16x64xf32> to vector<1x32xf32>
    %330 = vector.extract_strided_slice %7 {offsets = [11, 0], sizes = [1, 32], strides = [1, 1]} : vector<16x64xf32> to vector<1x32xf32>
    %cst_214 = arith.constant dense<0.000000e+00> : vector<2x8xf32>
    %331 = vector.multi_reduction <add>, %328, %cst_214 [2] : vector<2x8x32xf32> to vector<2x8xf32>
    %332 = vector.shape_cast %331 : vector<2x8xf32> to vector<2x8x1xf32>
    %cst_215 = arith.constant 3.200000e+01 : f32
    %333 = vector.broadcast %cst_215 : f32 to vector<2x8x1xf32>
    %334 = arith.divf %332, %333 : vector<2x8x1xf32>
    %335 = vector.broadcast %334 : vector<2x8x1xf32> to vector<2x8x32xf32>
    %336 = arith.subf %328, %335 : vector<2x8x32xf32>
    %337 = arith.mulf %336, %336 : vector<2x8x32xf32>
    %cst_216 = arith.constant dense<0.000000e+00> : vector<2x8xf32>
    %338 = vector.multi_reduction <add>, %337, %cst_216 [2] : vector<2x8x32xf32> to vector<2x8xf32>
    %339 = vector.shape_cast %338 : vector<2x8xf32> to vector<2x8x1xf32>
    %cst_217 = arith.constant 3.200000e+01 : f32
    %340 = vector.broadcast %cst_217 : f32 to vector<2x8x1xf32>
    %341 = arith.divf %339, %340 : vector<2x8x1xf32>
    %342 = vector.broadcast %334 : vector<2x8x1xf32> to vector<2x8x32xf32>
    %343 = arith.subf %328, %342 : vector<2x8x32xf32>
    %cst_218 = arith.constant 9.99999974E-6 : f32
    %344 = vector.broadcast %cst_218 : f32 to vector<2x8x1xf32>
    %345 = arith.addf %341, %344 : vector<2x8x1xf32>
    %346 = math.rsqrt %345 : vector<2x8x1xf32>
    %347 = vector.broadcast %346 : vector<2x8x1xf32> to vector<2x8x32xf32>
    %348 = arith.mulf %343, %347 : vector<2x8x32xf32>
    %349 = vector.shape_cast %329 : vector<1x32xf32> to vector<1x1x32xf32>
    %350 = vector.broadcast %349 : vector<1x1x32xf32> to vector<2x8x32xf32>
    %351 = arith.mulf %348, %350 : vector<2x8x32xf32>
    %352 = vector.shape_cast %330 : vector<1x32xf32> to vector<1x1x32xf32>
    %353 = vector.broadcast %352 : vector<1x1x32xf32> to vector<2x8x32xf32>
    %354 = arith.addf %351, %353 : vector<2x8x32xf32>
    %c0_219 = arith.constant 0 : index
    %c0_220 = arith.constant 0 : index
    %c0_221 = arith.constant 0 : index
    %355 = vector.load %arg6[%c0_219, %c0_220, %c0_221] : memref<1x32x64xbf16, #tpu.memory_space<vmem>>, vector<1x32x64xbf16>
    %356 = vector.shape_cast %355 : vector<1x32x64xbf16> to vector<32x64xbf16>
    %357 = vector.extract_strided_slice %7 {offsets = [12, 0], sizes = [1, 64], strides = [1, 1]} : vector<16x64xf32> to vector<1x64xf32>
    %358 = vector.shape_cast %354 : vector<2x8x32xf32> to vector<16x32xf32>
    %359 = arith.truncf %358 : vector<16x32xf32> to vector<16x32xbf16>
    %cst_222 = arith.constant dense<0.000000e+00> : vector<16x64xf32>
    %360 = tpu.matmul %359, %356, %cst_222 {dimension_numbers = #tpu.dot_dimension_numbers<[1], [0], [0], [1], [0, 0, 1, 1], [], []>} : vector<16x32xbf16>, vector<32x64xbf16>, vector<16x64xf32> -> vector<16x64xf32>
    %361 = vector.broadcast %357 : vector<1x64xf32> to vector<16x64xf32>
    %362 = arith.addf %360, %361 : vector<16x64xf32>
    %363 = vector.shape_cast %362 : vector<16x64xf32> to vector<2x8x64xf32>
    %cst_223 = arith.constant 0.000000e+00 : f32
    %364 = vector.broadcast %cst_223 : f32 to vector<2x8x64xf32>
    %365 = arith.maximumf %363, %364 : vector<2x8x64xf32>
    %c0_224 = arith.constant 0 : index
    %c0_225 = arith.constant 0 : index
    %c0_226 = arith.constant 0 : index
    %366 = vector.load %arg7[%c0_224, %c0_225, %c0_226] : memref<1x64x32xbf16, #tpu.memory_space<vmem>>, vector<1x64x32xbf16>
    %367 = vector.shape_cast %366 : vector<1x64x32xbf16> to vector<64x32xbf16>
    %368 = vector.extract_strided_slice %7 {offsets = [13, 0], sizes = [1, 32], strides = [1, 1]} : vector<16x64xf32> to vector<1x32xf32>
    %369 = vector.shape_cast %365 : vector<2x8x64xf32> to vector<16x64xf32>
    %370 = arith.truncf %369 : vector<16x64xf32> to vector<16x64xbf16>
    %cst_227 = arith.constant dense<0.000000e+00> : vector<16x32xf32>
    %371 = tpu.matmul %370, %367, %cst_227 {dimension_numbers = #tpu.dot_dimension_numbers<[1], [0], [0], [1], [0, 0, 1, 1], [], []>} : vector<16x64xbf16>, vector<64x32xbf16>, vector<16x32xf32> -> vector<16x32xf32>
    %372 = vector.broadcast %368 : vector<1x32xf32> to vector<16x32xf32>
    %373 = arith.addf %371, %372 : vector<16x32xf32>
    %374 = vector.shape_cast %373 : vector<16x32xf32> to vector<2x8x32xf32>
    %375 = arith.addf %354, %374 : vector<2x8x32xf32>
    %376 = vector.extract_strided_slice %7 {offsets = [14, 0], sizes = [1, 32], strides = [1, 1]} : vector<16x64xf32> to vector<1x32xf32>
    %377 = vector.extract_strided_slice %7 {offsets = [15, 0], sizes = [1, 32], strides = [1, 1]} : vector<16x64xf32> to vector<1x32xf32>
    %cst_228 = arith.constant dense<0.000000e+00> : vector<2x8xf32>
    %378 = vector.multi_reduction <add>, %375, %cst_228 [2] : vector<2x8x32xf32> to vector<2x8xf32>
    %379 = vector.shape_cast %378 : vector<2x8xf32> to vector<2x8x1xf32>
    %cst_229 = arith.constant 3.200000e+01 : f32
    %380 = vector.broadcast %cst_229 : f32 to vector<2x8x1xf32>
    %381 = arith.divf %379, %380 : vector<2x8x1xf32>
    %382 = vector.broadcast %381 : vector<2x8x1xf32> to vector<2x8x32xf32>
    %383 = arith.subf %375, %382 : vector<2x8x32xf32>
    %384 = arith.mulf %383, %383 : vector<2x8x32xf32>
    %cst_230 = arith.constant dense<0.000000e+00> : vector<2x8xf32>
    %385 = vector.multi_reduction <add>, %384, %cst_230 [2] : vector<2x8x32xf32> to vector<2x8xf32>
    %386 = vector.shape_cast %385 : vector<2x8xf32> to vector<2x8x1xf32>
    %cst_231 = arith.constant 3.200000e+01 : f32
    %387 = vector.broadcast %cst_231 : f32 to vector<2x8x1xf32>
    %388 = arith.divf %386, %387 : vector<2x8x1xf32>
    %389 = vector.broadcast %381 : vector<2x8x1xf32> to vector<2x8x32xf32>
    %390 = arith.subf %375, %389 : vector<2x8x32xf32>
    %cst_232 = arith.constant 9.99999974E-6 : f32
    %391 = vector.broadcast %cst_232 : f32 to vector<2x8x1xf32>
    %392 = arith.addf %388, %391 : vector<2x8x1xf32>
    %393 = math.rsqrt %392 : vector<2x8x1xf32>
    %394 = vector.broadcast %393 : vector<2x8x1xf32> to vector<2x8x32xf32>
    %395 = arith.mulf %390, %394 : vector<2x8x32xf32>
    %396 = vector.shape_cast %376 : vector<1x32xf32> to vector<1x1x32xf32>
    %397 = vector.broadcast %396 : vector<1x1x32xf32> to vector<2x8x32xf32>
    %398 = arith.mulf %395, %397 : vector<2x8x32xf32>
    %399 = vector.shape_cast %377 : vector<1x32xf32> to vector<1x1x32xf32>
    %400 = vector.broadcast %399 : vector<1x1x32xf32> to vector<2x8x32xf32>
    %401 = arith.addf %398, %400 : vector<2x8x32xf32>
    %c1_i32 = arith.constant 1 : i32
    %402 = arith.cmpi slt, %arg1, %c1_i32 : i32
    %403 = arith.extui %402 : i1 to i32
    %c0_i32_233 = arith.constant 0 : i32
    %404 = arith.cmpi ne, %403, %c0_i32_233 : i32
    scf.if %404 {
      %c0_236 = arith.constant 0 : index
      %c0_237 = arith.constant 0 : index
      %c0_238 = arith.constant 0 : index
      %408 = vector.load %arg11[%c0_236, %c0_237, %c0_238] : memref<2x8x32xf32, #tpu.memory_space<vmem>>, vector<2x8x32xf32>
      tpu.vector_store %arg11[%c0_236, %c0_237, %c0_238], %401 {strides = array<i32>} : memref<2x8x32xf32, #tpu.memory_space<vmem>>, vector<2x8x32xf32>,
    } else {
    }
    %c1_i32_234 = arith.constant 1 : i32
    %405 = arith.cmpi eq, %arg1, %c1_i32_234 : i32
    %406 = arith.extui %405 : i1 to i32
    %c0_i32_235 = arith.constant 0 : i32
    %407 = arith.cmpi ne, %406, %c0_i32_235 : i32
    scf.if %407 {
      %c0_236 = arith.constant 0 : index
      %c0_237 = arith.constant 0 : index
      %408 = vector.load %arg9[%c0_236, %c0_237] : memref<1x32xf32, #tpu.memory_space<vmem>>, vector<1x32xf32>
      %c0_238 = arith.constant 0 : index
      %c0_239 = arith.constant 0 : index
      %409 = vector.load %arg10[%c0_238, %c0_239] : memref<1x32xf32, #tpu.memory_space<vmem>>, vector<1x32xf32>
      %cst_240 = arith.constant dense<0.000000e+00> : vector<2x8xf32>
      %410 = vector.multi_reduction <add>, %401, %cst_240 [2] : vector<2x8x32xf32> to vector<2x8xf32>
      %411 = vector.shape_cast %410 : vector<2x8xf32> to vector<2x8x1xf32>
      %cst_241 = arith.constant 3.200000e+01 : f32
      %412 = vector.broadcast %cst_241 : f32 to vector<2x8x1xf32>
      %413 = arith.divf %411, %412 : vector<2x8x1xf32>
      %414 = vector.broadcast %413 : vector<2x8x1xf32> to vector<2x8x32xf32>
      %415 = arith.subf %401, %414 : vector<2x8x32xf32>
      %416 = arith.mulf %415, %415 : vector<2x8x32xf32>
      %cst_242 = arith.constant dense<0.000000e+00> : vector<2x8xf32>
      %417 = vector.multi_reduction <add>, %416, %cst_242 [2] : vector<2x8x32xf32> to vector<2x8xf32>
      %418 = vector.shape_cast %417 : vector<2x8xf32> to vector<2x8x1xf32>
      %cst_243 = arith.constant 3.200000e+01 : f32
      %419 = vector.broadcast %cst_243 : f32 to vector<2x8x1xf32>
      %420 = arith.divf %418, %419 : vector<2x8x1xf32>
      %421 = vector.broadcast %413 : vector<2x8x1xf32> to vector<2x8x32xf32>
      %422 = arith.subf %401, %421 : vector<2x8x32xf32>
      %cst_244 = arith.constant 9.99999974E-6 : f32
      %423 = vector.broadcast %cst_244 : f32 to vector<2x8x1xf32>
      %424 = arith.addf %420, %423 : vector<2x8x1xf32>
      %425 = math.rsqrt %424 : vector<2x8x1xf32>
      %426 = vector.broadcast %425 : vector<2x8x1xf32> to vector<2x8x32xf32>
      %427 = arith.mulf %422, %426 : vector<2x8x32xf32>
      %428 = vector.shape_cast %408 : vector<1x32xf32> to vector<1x1x32xf32>
      %429 = vector.broadcast %428 : vector<1x1x32xf32> to vector<2x8x32xf32>
      %430 = arith.mulf %427, %429 : vector<2x8x32xf32>
      %431 = vector.shape_cast %409 : vector<1x32xf32> to vector<1x1x32xf32>
      %432 = vector.broadcast %431 : vector<1x1x32xf32> to vector<2x8x32xf32>
      %433 = arith.addf %430, %432 : vector<2x8x32xf32>
      %c0_245 = arith.constant 0 : index
      %c0_246 = arith.constant 0 : index
      %c0_247 = arith.constant 0 : index
      %434 = vector.load %arg11[%c0_245, %c0_246, %c0_247] : memref<2x8x32xf32, #tpu.memory_space<vmem>>, vector<2x8x32xf32>
      tpu.vector_store %arg11[%c0_245, %c0_246, %c0_247], %433 {strides = array<i32>} : memref<2x8x32xf32, #tpu.memory_space<vmem>>, vector<2x8x32xf32>,
    } else {
    }
    return
  }
  func.func @transform_0(%arg0: i32, %arg1: i32) -> (i32, i32, i32) {
    %c0_i32 = arith.constant 0 : i32
    %c0_i32_0 = arith.constant 0 : i32
    %c0_i32_1 = arith.constant 0 : i32
    return %arg0, %c0_i32, %c0_i32_0 : i32, i32, i32
  }
  func.func @transform_1(%arg0: i32, %arg1: i32) -> (i32, i32, i32) {
    %c0_i32 = arith.constant 0 : i32
    %c0_i32_0 = arith.constant 0 : i32
    %c0_i32_1 = arith.constant 0 : i32
    return %arg0, %c0_i32, %c0_i32_0 : i32, i32, i32
  }
  func.func @transform_2(%arg0: i32, %arg1: i32) -> (i32, i32, i32, i32, i32) {
    %c0_i32 = arith.constant 0 : i32
    %c0_i32_0 = arith.constant 0 : i32
    %c0_i32_1 = arith.constant 0 : i32
    %c0_i32_2 = arith.constant 0 : i32
    %c0_i32_3 = arith.constant 0 : i32
    return %arg1, %c0_i32, %c0_i32_0, %c0_i32_1, %c0_i32_2 : i32, i32, i32, i32, i32
  }
  func.func @transform_3(%arg0: i32, %arg1: i32) -> (i32, i32, i32, i32, i32) {
    %c0_i32 = arith.constant 0 : i32
    %c0_i32_0 = arith.constant 0 : i32
    %c0_i32_1 = arith.constant 0 : i32
    %c0_i32_2 = arith.constant 0 : i32
    %c0_i32_3 = arith.constant 0 : i32
    return %arg1, %c0_i32, %c0_i32_0, %c0_i32_1, %c0_i32_2 : i32, i32, i32, i32, i32
  }
  func.func @transform_4(%arg0: i32, %arg1: i32) -> (i32, i32, i32) {
    %c0_i32 = arith.constant 0 : i32
    %c0_i32_0 = arith.constant 0 : i32
    %c0_i32_1 = arith.constant 0 : i32
    return %arg1, %c0_i32, %c0_i32_0 : i32, i32, i32
  }
  func.func @transform_5(%arg0: i32, %arg1: i32) -> (i32, i32, i32) {
    %c0_i32 = arith.constant 0 : i32
    %c0_i32_0 = arith.constant 0 : i32
    %c0_i32_1 = arith.constant 0 : i32
    return %arg1, %c0_i32, %c0_i32_0 : i32, i32, i32
  }
  func.func @transform_6(%arg0: i32, %arg1: i32) -> (i32, i32, i32) {
    %c0_i32 = arith.constant 0 : i32
    %c0_i32_0 = arith.constant 0 : i32
    %c0_i32_1 = arith.constant 0 : i32
    return %arg1, %c0_i32, %c0_i32_0 : i32, i32, i32
  }
  func.func @transform_7(%arg0: i32, %arg1: i32) -> (i32, i32) {
    %c0_i32 = arith.constant 0 : i32
    %c0_i32_0 = arith.constant 0 : i32
    %c0_i32_1 = arith.constant 0 : i32
    return %c0_i32, %c0_i32_0 : i32, i32
  }
  func.func @transform_8(%arg0: i32, %arg1: i32) -> (i32, i32) {
    %c0_i32 = arith.constant 0 : i32
    %c0_i32_0 = arith.constant 0 : i32
    %c0_i32_1 = arith.constant 0 : i32
    return %c0_i32, %c0_i32_0 : i32, i32
  }
  func.func @transform_9(%arg0: i32, %arg1: i32) -> (i32, i32, i32) {
    %c0_i32 = arith.constant 0 : i32
    %c0_i32_0 = arith.constant 0 : i32
    %c0_i32_1 = arith.constant 0 : i32
    return %arg0, %c0_i32, %c0_i32_0 : i32, i32, i32
  }
}

</mosaic_0001>

<bundles_post_ra>
// kernel: tpu_custom_call.1
= control target key start
LH: loop header
LB: loop body
LE: loop exit
PB: predicated region body
PF: predicated region fallthrough
CT: control target
= control target key end

     0   :  { %14 = vsyncpa [#allocation4], 0  ;;  %s5746_s30 = smov 0   ;;  %s5748_s10 = smov 0   ;;  %s6536_s0 = inlined_call_operand.vmem [shape: f32[2,8,32], index: 0, kind: input, shape index: {}]   ;;  %s6537_s1 = inlined_call_operand.vmem [shape: f32[2,8,32], index: 1, kind: input, shape index: {}]   ;;  %s6538_s2 = inlined_call_operand.vmem [shape: bf16[2,6,4,32,8], index: 2, kind: input, shape index: {}]   ;;  %s6539_s3 = inlined_call_operand.vmem [shape: bf16[2,2,4,8,32], index: 3, kind: input, shape index: {}]   ;;  %s6540_s4 = inlined_call_operand.vmem [shape: bf16[2,32,64], index: 4, kind: input, shape index: {}]   ;;  %s6541_s5 = inlined_call_operand.vmem [shape: bf16[2,64,32], index: 5, kind: input, shape index: {}]   ;;  %s6542_s6 = inlined_call_operand.vmem [shape: f32[2,16,64], index: 6, kind: input, shape index: {}]   ;;  %s6543_s7 = inlined_call_operand.vmem [shape: f32[1,32], index: 7, kind: input, shape index: {}]   ;;  %s6544_s8 = inlined_call_operand.vmem [shape: f32[1,32], index: 8, kind: input, shape index: {}]   ;;  %s6545_s9 = inlined_call_operand.hbm [shape: f32[2,8,32], index: 9, kind: output, shape index: {}]  }
   0x1   :  { %s5750_s11 = smov 0  }
   0x2 LB: > { %s29_s13 = sadd.s32 1, %s5681_s10  ;;  %p4602_p1 = scmp.ge.s32.totalorder %s5685_s11, 1  ;;  %s5685_s11 = sphi %s5750_s11, %s20_s11   ;;  %s5681_s10 = sphi %s5748_s10, %s6549_s10   ;;  %s5677_s30 = sphi %s5746_s30, %s6548_s30  }
   0x3   : > { %p30_p0 = scmp.ge.s32.totalorder %s29_s13, 2  ;;  %p362_p2 = scmp.lt.s32.totalorder %s5685_s11, 3 }
   0x5   : > { %s6551_s13 = smov (%p30_p0, %s29_s13), 0  ;;  %p363_p3 = pnand %p4602_p1, %p362_p2 }
   0x6   : > { %p435_p4 = scmp.lt.s32.totalorder (!%p363_p3), %s5677_s30, 1  ;;  %p4612_p5 = scmp.ne.s32.totalorder (!%p363_p3), %s5677_s30, 0 }
   0x7   : > { %366 = sbr.rel (%p363_p3) target bundleno = 4264 (0x10a8), region = 56 }
   0xe   : > { %s436_s14 = scalar_select %p435_p4, %s5677_s30, 1 }
   0xf   : > { %465 = sbr.rel (%p4612_p5) target bundleno = 22 (0x16), region = 60  ;;  %v466_v0 = vld [vmem:[%s6536_s0] sm:$0xff] (!%p4612_p5)  ;;  %vm468_vm0 = vcmask (!%p4612_p5), 261120   ;;  %v467_v1 = vld [vmem:[%s6536_s0 + $0x8] sm:$0xff] (!%p4612_p5)  ;;  %v471_v2 = vlaneseq (!%p4612_p5)  ;;  %vm477_vm1 = vcmask (!%p4612_p5), 64512  }
  0x10   : > { %s5456_s15 = smul.u32 384, %s436_s14  ;;  %s4840_s16 = sshll.u32 %s436_s14, 5  ;;  %469 = vst.msk [vmem:[#allocation3] sm:$0xff] (!%p4612_p5), %vm468_vm0, %v466_v0  ;;  %470 = vst.msk [vmem:[#allocation3 + $0x8] sm:$0xff] (!%p4612_p5), %vm468_vm0, %v467_v1  ;;  %v5687_v5 = vmov (!%p4612_p5), -1e+30  }
  0x11   : > { %s5772_s19 = scalar_lea.vmem %s6539_s3, %s4840_s16  ;;  %s4841_s20 = sshll.u32 %s436_s14, 4  ;;  %v472_v3 = vshrl.u32 (!%p4612_p5), %v471_v2, 7  ;;  %v474_v4 = vand.u32 (!%p4612_p5), 127, %v471_v2 }
  0x12   : > { %s5777_s23 = scalar_lea.vmem %s6538_s2, %s5456_s15  ;;  %s5782_s26 = scalar_lea.vmem %s6540_s4, %s4841_s20 }
  0x13   : > { %s5787_s29 = scalar_lea.vmem %s6541_s5, %s4840_s16  ;;  %s5792_s18 = scalar_lea.vmem %s6542_s6, %s4841_s20  ;;  %vm475_vm2 = vcmp.ge.s32.totalorder (!%p4612_p5), %v472_v3, %v474_v4 }
  0x14   : > { %v476_v6 = vsel (!%p4612_p5), %vm475_vm2, 0.0, %v5687_v5 }
  0x15   : > { %478 = vst.msk [vmem:[#allocation2] sm:$0xff] (!%p4612_p5), %vm477_vm1, %v476_v6 }
  0x16 PF: > { %v5496_v7 = vld [vmem:[%s5777_s23] sm:$0xff]   ;;  %v5688_v8 = vmov 0.0   ;;  %v5498_v10 = vld [vmem:[%s5777_s23 + $0x8] sm:$0xff]   ;;  %vm5689_vm3 = vmmov 0   ;;  %vm507_vm4 = vcmask 261120   ;;  %v5501_v16 = vld [vmem:[%s5777_s23 + $0x10] sm:$0xff]   ;;  %v491_v19 = vlaneseq }
  0x17   : > { %5004 = vmatprep.subr.bf16.mxu0 %v5688_v8  ;;  %5012 = vmatprep.subr.bf16.mxu1 %v5688_v8  ;;  %v5497_v9 = vld [vmem:[%s5777_s23 + $0x40] sm:$0xff]   ;;  %v5499_v11 = vld [vmem:[%s5777_s23 + $0x48] sm:$0xff]   ;;  %v480_v13 = vld [vmem:[#allocation3 + $0x8] sm:$0xff]  ;;  %s5690_s12 = smov 120   ;;  %s5691_s16 = smov 112   ;;  %vm1244_vm5 = vcmask 64512  }
  0x18   : > { %5005 = vmatpush3.bf16.msra.mxu0 %v5496_v7  ;;  %5008 = vmatprep.mubr.msk.bf16.mxu0 %vm5689_vm3, %v5688_v8  ;;  %v479_v12 = vld [vmem:[#allocation3] sm:$0xff]  ;;  %v5500_v15 = vld [vmem:[%s5777_s23 + $0x80] sm:$0xff]   ;;  %v5503_v18 = vld [vmem:[%s5777_s23 + $0x18] sm:$0xff]   ;;  %v5834_v22 = vshrl.u32 %v491_v19, 7  ;;  %s5692_s20 = smov 104   ;;  %vm1736_vm6 = vcmask 1043456  }
  0x19   : > { %5013 = vmatpush3.bf16.msra.mxu1 %v5497_v9  ;;  %5006 = vmatprep.subr.bf16.mxu0 %v5688_v8  ;;  %v5813_v14 = vpack.c.bf16 %v480_v13, %v479_v12  ;;  %v5502_v17 = vld [vmem:[%s5777_s23 + $0x88] sm:$0xff]   ;;  %v5504_v20 = vld [vmem:[%s5777_s23 + $0x50] sm:$0xff]   ;;  %v5506_v23 = vld [vmem:[%s5777_s23 + $0x58] sm:$0xff]   ;;  %vm4316_vm7 = vcmask 523264   ;;  %p4832_p6 = scmp.ge.s32.totalorder %s5677_s30, 1 }
  0x1a   : > { %5014 = vmatprep.subr.bf16.mxu1 %v5688_v8  ;;  %5016 = vmatprep.mubr.msk.bf16.mxu1 %vm5689_vm3, %v5688_v8  ;;  %v5505_v21 = vld [vmem:[%s5777_s23 + $0x90] sm:$0xff]   ;;  %v5507_v24 = vld [vmem:[%s5777_s23 + $0x98] sm:$0xff]   ;;  %v559_v25 = vsub.s32 1, %v5834_v22  ;;  %v493_v26 = vsub.s32 0, %v5834_v22  ;;  %v5508_v27 = vld [vmem:[%s5777_s23 + $0x20] sm:$0xff]  }
  0x1b   : > { %v5853_v28 = vld [vmem:[%s5792_s18] sm:$0xff]  ;;  %v5510_v31 = vld [vmem:[%s5777_s23 + $0x28] sm:$0xff]   ;;  %v5516_v35 = vld [vmem:[%s5777_s23 + $0x30] sm:$0xff]  }
  0x1c   : > { %5007 = vmatpush3.bf16.msra.mxu0 %v5498_v10  ;;  %v5509_v29 = vld [vmem:[%s5777_s23 + $0x60] sm:$0xff]   ;;  %v5860_v30 = vrot.slane %v5853_v28, %v559_v25  ;;  %v5511_v32 = vld [vmem:[%s5777_s23 + $0x68] sm:$0xff]   ;;  %v5872_v33 = vrot.slane %v5853_v28, %v493_v26  ;;  %v5517_v37 = vld [vmem:[%s5777_s23 + $0x38] sm:$0xff]  }
  0x1d   : > { %5015 = vmatpush3.bf16.msra.mxu1 %v5499_v11  ;;  %5020 = vmatprep.subr.bf16.mxu0 %v5688_v8  ;;  %v5512_v34 = vld [vmem:[%s5777_s23 + $0xa0] sm:$0xff]   ;;  %v5513_v36 = vld [vmem:[%s5777_s23 + $0xa8] sm:$0xff]   ;;  %v5514_v38 = vld [vmem:[%s5777_s23 + $0x70] sm:$0xff]  }
  0x1e   : > { %5028 = vmatprep.subr.bf16.mxu1 %v5688_v8  ;;  %756 = vrot.lane.b32.xlu0 %v5860_v30, %s5690_s12  ;;  %v5518_v39 = vld [vmem:[%s5777_s23 + $0xb0] sm:$0xff]   ;;  %v5515_v40 = vld [vmem:[%s5777_s23 + $0x78] sm:$0xff]  }
  0x1f   : > { %5009 = vmatmul.mubr.msk.bf16.vlgmr.msra.gmra.mrb[0].mxu0 %vm507_vm4, %v5813_v14  ;;  %940 = vrot.lane.b32.xlu1 %v5860_v30, %s5691_s16  ;;  %v5519_v41 = vld [vmem:[%s5777_s23 + $0xb8] sm:$0xff]  }
  0x20   : > { %5017 = vmatmul.mubr.msk.bf16.vlgmr.msra.gmra.mrb[0].mxu1 %vm507_vm4, %v5813_v14  ;;  %5021 = vmatpush3.bf16.msra.mxu0 %v5500_v15 }
  0x21   : > { %5029 = vmatpush3.bf16.msra.mxu1 %v5501_v16  ;;  %5022 = vmatprep.subr.bf16.mxu0 %v5688_v8 }
  0x22   : > { %5030 = vmatprep.subr.bf16.mxu1 %v5688_v8  ;;  %5024 = vmatprep.mubr.msk.bf16.mxu0 %vm5689_vm3, %v5688_v8 }
  0x23   : > { %5032 = vmatprep.mubr.msk.bf16.mxu1 %vm5689_vm3, %v5688_v8  ;;  %694 = vrot.lane.b32.xlu0 %v5872_v33, %s5690_s12 }
  0x24   : > { %5023 = vmatpush3.bf16.msra.mxu0 %v5502_v17  ;;  %879 = vrot.lane.b32.xlu1 %v5872_v33, %s5691_s16 }
  0x25   : > { %5031 = vmatpush3.bf16.msra.mxu1 %v5503_v18  ;;  %5036 = vmatprep.subr.bf16.mxu0 %v5688_v8 }
  0x26   : > { %5044 = vmatprep.subr.bf16.mxu1 %v5688_v8 }
  0x27   : > { %5025 = vmatmul.mubr.msk.bf16.vlgmr.msra.gmra.mrb[4].mxu0 %vm507_vm4, %v5813_v14  ;;  %1123 = vrot.lane.b32.xlu0 %v5860_v30, %s5692_s20 }
  0x28   : > { %5033 = vmatmul.mubr.msk.bf16.vlgmr.msra.gmra.mrb[4].mxu1 %vm507_vm4, %v5813_v14  ;;  %5037 = vmatpush3.bf16.msra.mxu0 %v5504_v20 }
  0x29   : > { %5045 = vmatpush3.bf16.msra.mxu1 %v5505_v21  ;;  %5038 = vmatprep.subr.bf16.mxu0 %v5688_v8 }
  0x2a   : > { %5046 = vmatprep.subr.bf16.mxu1 %v5688_v8  ;;  %5040 = vmatprep.mubr.msk.bf16.mxu0 %vm5689_vm3, %v5688_v8 }
  0x2b   : > { %5048 = vmatprep.mubr.msk.bf16.mxu1 %vm5689_vm3, %v5688_v8  ;;  %1062 = vrot.lane.b32.xlu1 %v5872_v33, %s5692_s20 }
  0x2c   : > { %5039 = vmatpush3.bf16.msra.mxu0 %v5506_v23 }
  0x2d   : > { %5047 = vmatpush3.bf16.msra.mxu1 %v5507_v24  ;;  %5052 = vmatprep.subr.bf16.mxu0 %v5688_v8 }
  0x2e   : > { %5060 = vmatprep.subr.bf16.mxu1 %v5688_v8 }
  0x2f   : > { %5041 = vmatmul.mubr.msk.bf16.vlgmr.msra.gmra.mrb[8].mxu0 %vm507_vm4, %v5813_v14 }
  0x30   : > { %5049 = vmatmul.mubr.msk.bf16.vlgmr.msra.gmra.mrb[8].mxu1 %vm507_vm4, %v5813_v14  ;;  %5053 = vmatpush3.bf16.msra.mxu0 %v5508_v27 }
  0x31   : > { %5061 = vmatpush3.bf16.msra.mxu1 %v5509_v29  ;;  %5054 = vmatprep.subr.bf16.mxu0 %v5688_v8 }
  0x32   : > { %5062 = vmatprep.subr.bf16.mxu1 %v5688_v8  ;;  %5056 = vmatprep.mubr.msk.bf16.mxu0 %vm5689_vm3, %v5688_v8 }
  0x33   : > { %5064 = vmatprep.mubr.msk.bf16.mxu1 %vm5689_vm3, %v5688_v8 }
  0x34   : > { %5055 = vmatpush3.bf16.msra.mxu0 %v5510_v31 }
  0x35   : > { %5063 = vmatpush3.bf16.msra.mxu1 %v5511_v32  ;;  %5068 = vmatprep.subr.bf16.mxu0 %v5688_v8 }
  0x36   : > { %5076 = vmatprep.subr.bf16.mxu1 %v5688_v8 }
  0x37   : > { %5057 = vmatmul.mubr.msk.bf16.vlgmr.msra.gmra.mrb[12].mxu0 %vm507_vm4, %v5813_v14 }
  0x38   : > { %5065 = vmatmul.mubr.msk.bf16.vlgmr.msra.gmra.mrb[12].mxu1 %vm507_vm4, %v5813_v14  ;;  %5069 = vmatpush3.bf16.msra.mxu0 %v5512_v34 }
  0x39   : > { %5070 = vmatprep.subr.bf16.mxu0 %v5688_v8  ;;  %5072 = vmatprep.mubr.msk.bf16.mxu0 %vm5689_vm3, %v5688_v8 }
  0x3a   : > { %5077 = vmatpush3.bf16.msra.mxu1 %v5516_v35  ;;  %5080 = vmatprep.mubr.msk.bf16.mxu1 %vm5689_vm3, %v5688_v8 }
  0x3b   : > { %5078 = vmatprep.subr.bf16.mxu1 %v5688_v8 }
  0x3c   : > { %5071 = vmatpush3.bf16.msra.mxu0 %v5513_v36 }
  0x3d   : > { %5084 = vmatprep.subr.bf16.mxu0 %v5688_v8 }
  0x3e   : > { %5079 = vmatpush3.bf16.msra.mxu1 %v5517_v37 }
  0x3f   : > { %5073 = vmatmul.mubr.msk.bf16.vlgmr.msra.gmra.mrb[16].mxu0 %vm507_vm4, %v5813_v14  ;;  %5092 = vmatprep.subr.bf16.mxu1 %v5688_v8 }
  0x40   : > { %5085 = vmatpush3.bf16.msra.mxu0 %v5514_v38  ;;  %5088 = vmatprep.mubr.msk.bf16.mxu0 %vm5689_vm3, %v5688_v8 }
  0x41   : > { %5086 = vmatprep.subr.bf16.mxu0 %v5688_v8  ;;  %5081 = vmatmul.mubr.msk.bf16.vlgmr.msra.gmra.mrb[16].mxu1 %vm507_vm4, %v5813_v14 }
  0x42   : > { %5096 = vmatprep.mubr.msk.bf16.mxu1 %vm5689_vm3, %v5688_v8  ;;  %5093 = vmatpush3.bf16.msra.mxu1 %v5518_v39 }
  0x43   : > { %5094 = vmatprep.subr.bf16.mxu1 %v5688_v8 }
  0x44   : > { %5087 = vmatpush3.bf16.msra.mxu0 %v5515_v40 }
  0x45   : > { %5100 = vmatprep.subr.bf16.mxu0 %v5688_v8 }
  0x46   : > { %5095 = vmatpush3.bf16.msra.mxu1 %v5519_v41 }
  0x47   : > { %5089 = vmatmul.mubr.msk.bf16.vlgmr.msra.gmra.mrb[20].mxu0 %vm507_vm4, %v5813_v14  ;;  %5106 = vmatprep.subr.bf16.mxu1 %v5688_v8 }
  0x48   : > { %5102 = vmatprep.mubr.msk.bf16.mxu0 %vm5689_vm3, %v5688_v8 }
  0x49   : > { %5097 = vmatmul.mubr.msk.bf16.vlgmr.msra.gmra.mrb[20].mxu1 %vm507_vm4, %v5813_v14 }
  0x4a   : > { %5108 = vmatprep.mubr.msk.bf16.mxu1 %vm5689_vm3, %v5688_v8 }
  0x90   : > { %v757_v4 = vpop.permute.xlu0 %756 }
  0x91   : > { %v941_v23 = vpop.permute.xlu1 %940 }
  0x95   : > { %v695_v16 = vpop.permute.xlu0 %694 }
  0x96   : > { %v880_v41 = vpop.permute.xlu1 %879 }
  0xf2   : > { %v545_v42 = vpop.f32.mrb[0].mxu0 }
  0xf3   : > { %v607_v43 = vpop.f32.mrb[0].mxu1  ;;  %v5010_v44 = vpop.f32.mrb[1].mxu0  ;;  %v546_v55 = vadd.f32 %v545_v42, %v5872_v33 }
  0xf4   : > { %v608_v45 = vadd.f32 %v607_v43, %v5860_v30  ;;  %v5018_v46 = vpop.f32.mrb[1].mxu1  ;;  %v548_v47 = vpop.f32.mrb[2].mxu0 }
  0xf5   : > { %v610_v48 = vpop.f32.mrb[2].mxu1  ;;  %v5011_v49 = vpop.f32.mrb[3].mxu0  ;;  %v549_v60 = vadd.f32 %v548_v47, %v5872_v33  ;;  %v1228_v1 = vpack.c.bf16 %v546_v55, %v546_v55  ;;  %v621_v55 = vsub.s32 2, %v5834_v22 }
  0xf6   : > { %v1236_v50 = vpack.c.bf16 %v608_v45, %v608_v45  ;;  %v611_v51 = vadd.f32 %v610_v48, %v5860_v30  ;;  %v5019_v52 = vpop.f32.mrb[3].mxu1 }
  0xf7   : > { %v1229_v3 = vpack.c.bf16 %v549_v60, %v549_v60 }
  0xf8   : > { %v1249_v53 = vsel %vm1244_vm5, %v1236_v50, 0  ;;  %v1237_v54 = vpack.c.bf16 %v611_v51, %v611_v51 }
  0xf9   : > { %5101 = vmatpush3.bf16.xpose.msra.mxu0 %v1249_v53 }
  0xfa   : > { %v1295_v56 = vsel %vm1244_vm5, %v1237_v54, 0  ;;  %v5939_v57 = vpop.f32.mrb[4].mxu0  ;;  %5112 = vmatprep.subr.bf16.mxu0 %v5688_v8 }
  0xfb   : > { %5107 = vmatpush3.bf16.xpose.msra.mxu1 %v1295_v56  ;;  %v5026_v58 = vpop.f32.mrb[5].mxu0  ;;  %v731_v59 = vpop.f32.mrb[4].mxu1 }
  0xfc   : > { %v5943_v61 = vpop.f32.mrb[6].mxu0  ;;  %v5034_v62 = vpop.f32.mrb[5].mxu1  ;;  %5118 = vmatprep.subr.bf16.mxu1 %v5688_v8  ;;  %v732_v20 = vadd.f32 %v731_v59, %v695_v16 }
  0xfd   : > { %v5027_v63 = vpop.f32.mrb[7].mxu0  ;;  %v734_v0 = vpop.f32.mrb[6].mxu1  ;;  %v5982_v62 = vrot.slane %v5853_v28, %v621_v55 }
  0xfe   : > { %v5035_v2 = vpop.f32.mrb[7].mxu1  ;;  %v735_v27 = vadd.f32 %v734_v0, %v695_v16  ;;  %v1230_v34 = vpack.c.bf16 %v732_v20, %v732_v20  ;;  %v1124_v59 = vpop.permute.xlu0 %1123 }
  0xff   : > { %v1063_v2 = vpop.permute.xlu1 %1062  ;;  %v673_v16 = vadd.f32 %v5943_v61, %v5982_v62 }
 0x100   : > { %5103 = vmatmul.mubr.msk.bf16.vlgmr.msra.gmra.mrb[24].mxu0 %vm1244_vm5, %v1228_v1  ;;  %v1231_v40 = vpack.c.bf16 %v735_v27, %v735_v27  ;;  %v483_v27 = vld [vmem:[#allocation2] sm:$0xff] }
 0x101   : > { %5114 = vmatprep.mubr.msk.bf16.mxu0 %vm5689_vm3, %v5688_v8 }
 0x102   : > { %5109 = vmatmul.mubr.msk.bf16.vlgmr.msra.gmra.mrb[24].mxu1 %vm1244_vm5, %v1229_v3  ;;  %v793_v5 = vpop.f32.mrb[8].mxu0 }
 0x103   : > { %v794_v6 = vadd.f32 %v793_v5, %v757_v4  ;;  %v5042_v7 = vpop.f32.mrb[9].mxu0  ;;  %v5950_v9 = vpop.f32.mrb[8].mxu1  ;;  %5120 = vmatprep.mubr.msk.bf16.mxu1 %vm5689_vm3, %v5688_v8 }
 0x104   : > { %v796_v10 = vpop.f32.mrb[10].mxu0  ;;  %v5050_v11 = vpop.f32.mrb[9].mxu1 }
 0x105   : > { %v1238_v12 = vpack.c.bf16 %v794_v6, %v794_v6  ;;  %v797_v13 = vadd.f32 %v796_v10, %v757_v4  ;;  %v5043_v14 = vpop.f32.mrb[11].mxu0  ;;  %v5954_v15 = vpop.f32.mrb[10].mxu1  ;;  %v670_v10 = vadd.f32 %v5939_v57, %v5982_v62  ;;  %v1726_v57 = vpack.c.bf16 %v673_v16, %v673_v16 }
 0x106   : > { %v5051_v17 = vpop.f32.mrb[11].mxu1 }
 0x107   : > { %v1341_v18 = vsel %vm1244_vm5, %v1238_v12, 0  ;;  %v1239_v19 = vpack.c.bf16 %v797_v13, %v797_v13  ;;  %v1784_v61 = vsel %vm1736_vm6, %v1726_v57, 0 }
 0x108   : > { %5113 = vmatpush3.bf16.xpose.msra.mxu0 %v1341_v18  ;;  %v1725_v18 = vpack.c.bf16 %v670_v10, %v670_v10 }
 0x109   : > { %v1387_v21 = vsel %vm1244_vm5, %v1239_v19, 0  ;;  %5124 = vmatprep.subr.bf16.mxu0 %v5688_v8 }
 0x10a   : > { %v916_v24 = vpop.f32.mrb[12].mxu0  ;;  %5119 = vmatpush3.bf16.xpose.msra.mxu1 %v1387_v21  ;;  %v1738_v21 = vsel %vm1736_vm6, %v1725_v18, 0 }
 0x10b   : > { %v977_v29 = vpop.f32.mrb[12].mxu1  ;;  %v5058_v30 = vpop.f32.mrb[13].mxu0  ;;  %5130 = vmatprep.subr.bf16.mxu1 %v5688_v8  ;;  %v917_v44 = vadd.f32 %v916_v24, %v880_v41 }
 0x10c   : > { %v978_v31 = vadd.f32 %v977_v29, %v941_v23  ;;  %v5066_v32 = vpop.f32.mrb[13].mxu1  ;;  %v919_v33 = vpop.f32.mrb[14].mxu0 }
 0x10d   : > { %v980_v35 = vpop.f32.mrb[14].mxu1  ;;  %v5059_v36 = vpop.f32.mrb[15].mxu0  ;;  %v920_v48 = vadd.f32 %v919_v33, %v880_v41  ;;  %v1232_v53 = vpack.c.bf16 %v917_v44, %v917_v44 }
 0x10e   : > { %v1240_v37 = vpack.c.bf16 %v978_v31, %v978_v31  ;;  %v981_v38 = vadd.f32 %v980_v35, %v941_v23  ;;  %v5067_v39 = vpop.f32.mrb[15].mxu1 }
 0x10f   : > { %5115 = vmatmul.mubr.msk.bf16.vlgmr.msra.gmra.mrb[28].mxu0 %vm1244_vm5, %v1230_v34  ;;  %v1233_v58 = vpack.c.bf16 %v920_v48, %v920_v48 }
 0x110   : > { %v1433_v42 = vsel %vm1244_vm5, %v1240_v37, 0  ;;  %v1241_v43 = vpack.c.bf16 %v981_v38, %v981_v38  ;;  %5126 = vmatprep.mubr.msk.bf16.mxu0 %vm5689_vm3, %v5688_v8 }
 0x111   : > { %5125 = vmatpush3.bf16.xpose.msra.mxu0 %v1433_v42  ;;  %5121 = vmatmul.mubr.msk.bf16.vlgmr.msra.gmra.mrb[28].mxu1 %vm1244_vm5, %v1231_v40 }
 0x112   : > { %v1479_v45 = vsel %vm1244_vm5, %v1241_v43, 0  ;;  %v5966_v46 = vpop.f32.mrb[16].mxu0  ;;  %5132 = vmatprep.mubr.msk.bf16.mxu1 %vm5689_vm3, %v5688_v8  ;;  %5136 = vmatprep.subr.bf16.mxu0 %v5688_v8 }
 0x113   : > { %5131 = vmatpush3.bf16.xpose.msra.mxu1 %v1479_v45  ;;  %v5074_v47 = vpop.f32.mrb[17].mxu0 }
 0x114   : > { %v5971_v49 = vpop.f32.mrb[18].mxu0  ;;  %v1099_v50 = vpop.f32.mrb[16].mxu1  ;;  %5142 = vmatprep.subr.bf16.mxu1 %v5688_v8 }
 0x115   : > { %v5075_v51 = vpop.f32.mrb[19].mxu0  ;;  %v5082_v52 = vpop.f32.mrb[17].mxu1  ;;  %v1100_v12 = vadd.f32 %v1099_v50, %v1063_v2 }
 0x116   : > { %v1102_v54 = vpop.f32.mrb[18].mxu1 }
 0x117   : > { %v5083_v56 = vpop.f32.mrb[19].mxu1  ;;  %v1103_v19 = vadd.f32 %v1102_v54, %v1063_v2  ;;  %v1234_v20 = vpack.c.bf16 %v1100_v12, %v1100_v12 }
 0x118   : > { %5127 = vmatmul.mubr.msk.bf16.vlgmr.msra.gmra.mrb[32].mxu0 %vm1244_vm5, %v1232_v53 }
 0x119   : > { %5138 = vmatprep.mubr.msk.bf16.mxu0 %vm5689_vm3, %v5688_v8  ;;  %v1235_v23 = vpack.c.bf16 %v1103_v19, %v1103_v19 }
 0x11a   : > { %5133 = vmatmul.mubr.msk.bf16.vlgmr.msra.gmra.mrb[32].mxu1 %vm1244_vm5, %v1233_v58  ;;  %v1160_v60 = vpop.f32.mrb[20].mxu0 }
 0x11b   : > { %v1161_v63 = vadd.f32 %v1160_v60, %v1124_v59  ;;  %v5090_v0 = vpop.f32.mrb[21].mxu0  ;;  %5144 = vmatprep.mubr.msk.bf16.mxu1 %vm5689_vm3, %v5688_v8 }
 0x11c   : > { %v1163_v1 = vpop.f32.mrb[22].mxu0  ;;  %v5986_v6 = vpop.f32.mrb[20].mxu1 }
 0x11d   : > { %v1242_v3 = vpack.c.bf16 %v1161_v63, %v1161_v63  ;;  %v1164_v4 = vadd.f32 %v1163_v1, %v1124_v59  ;;  %v5091_v5 = vpop.f32.mrb[23].mxu0  ;;  %v5098_v7 = vpop.f32.mrb[21].mxu1 }
 0x11e   : > { %v5991_v13 = vpop.f32.mrb[22].mxu1 }
 0x11f   : > { %v1525_v11 = vsel %vm1244_vm5, %v1242_v3, 0  ;;  %v1243_v28 = vpack.c.bf16 %v1164_v4, %v1164_v4  ;;  %v5099_v14 = vpop.f32.mrb[23].mxu1 }
 0x120   : > { %5137 = vmatpush3.bf16.xpose.msra.mxu0 %v1525_v11 }
 0x121   : > { %v1571_v17 = vsel %vm1244_vm5, %v1243_v28, 0  ;;  %5148 = vmatprep.subr.bf16.mxu0 %v5688_v8 }
 0x122   : > { %5143 = vmatpush3.bf16.xpose.msra.mxu1 %v1571_v17 }
 0x123   : > { %5154 = vmatprep.subr.bf16.mxu1 %v5688_v8 }
 0x127   : > { %5139 = vmatmul.mubr.msk.bf16.vlgmr.msra.gmra.mrb[36].mxu0 %vm1244_vm5, %v1234_v20 }
 0x128   : > { %5149 = vmatpush3.bf16.msra.mxu0 %v1738_v21  ;;  %5150 = vmatprep.mubr.msk.bf16.mxu0 %vm5689_vm3, %v5688_v8 }
 0x129   : > { %5145 = vmatmul.mubr.msk.bf16.vlgmr.msra.gmra.mrb[36].mxu1 %vm1244_vm5, %v1235_v23  ;;  %5160 = vmatprep.subr.bf16.mxu0 %v5688_v8 }
 0x12a   : > { %5155 = vmatpush3.bf16.msra.mxu1 %v1784_v61  ;;  %5156 = vmatprep.mubr.msk.bf16.mxu1 %vm5689_vm3, %v5688_v8 }
 0x12b   : > { %5166 = vmatprep.subr.bf16.mxu1 %v5688_v8 }
 0x1d3   : > { %v1285_v24 = vpop.f32.mrb[24].mxu0 }
 0x1d4   : > { %v1613_v29 = vmul.f32 0.35355338, %v1285_v24  ;;  %v5104_v30 = vpop.f32.mrb[25].mxu0 }
 0x1d5   : > { %v1288_v31 = vpop.f32.mrb[26].mxu0  ;;  %v1331_v32 = vpop.f32.mrb[24].mxu1 }
 0x1d6   : > { %v1614_v33 = vmul.f32 0.35355338, %v1331_v32  ;;  %v5105_v34 = vpop.f32.mrb[27].mxu0  ;;  %v5110_v35 = vpop.f32.mrb[25].mxu1  ;;  %v1621_v36 = vadd.f32 %v1613_v29, %v483_v27 }
 0x1d7   : > { %v1334_v37 = vpop.f32.mrb[26].mxu1 }
 0x1d8   : > { %v5111_v38 = vpop.f32.mrb[27].mxu1  ;;  %v1629_v39 = vsel %vm1244_vm5, %v1621_v36, -inf  ;;  %v1622_v40 = vadd.f32 %v1614_v33, %v483_v27 }
 0x1d9   : > { %1630 = vmax.xlane.f32.xlu0 %v1629_v39 }
 0x1da   : > { %v1632_v41 = vsel %vm1244_vm5, %v1622_v40, -inf }
 0x1db   : > { %1633 = vmax.xlane.f32.xlu1 %v1632_v41 }
 0x1e2   : > { %v1377_v42 = vpop.f32.mrb[28].mxu0 }
 0x1e3   : > { %v1615_v43 = vmul.f32 0.35355338, %v1377_v42  ;;  %v5116_v44 = vpop.f32.mrb[29].mxu0 }
 0x1e4   : > { %v1380_v45 = vpop.f32.mrb[30].mxu0  ;;  %v1423_v47 = vpop.f32.mrb[28].mxu1 }
 0x1e5   : > { %v1616_v48 = vmul.f32 0.35355338, %v1423_v47  ;;  %v5117_v50 = vpop.f32.mrb[31].mxu0  ;;  %v5122_v51 = vpop.f32.mrb[29].mxu1  ;;  %v1623_v52 = vadd.f32 %v1615_v43, %v483_v27 }
 0x1e6   : > { %v1426_v53 = vpop.f32.mrb[30].mxu1 }
 0x1e7   : > { %v5123_v54 = vpop.f32.mrb[31].mxu1  ;;  %v1635_v56 = vsel %vm1244_vm5, %v1623_v52, -inf  ;;  %v1624_v58 = vadd.f32 %v1616_v48, %v483_v27 }
 0x1e8   : > { %1636 = vmax.xlane.f32.xlu0 %v1635_v56 }
 0x1e9   : > { %v1638_v60 = vsel %vm1244_vm5, %v1624_v58, -inf }
 0x1eb   : > { %v1469_v59 = vpop.f32.mrb[32].mxu0 }
 0x1ec   : > { %v1617_v63 = vmul.f32 0.35355338, %v1469_v59  ;;  %v5128_v0 = vpop.f32.mrb[33].mxu0  ;;  %1639 = vmax.xlane.f32.xlu0 %v1638_v60 }
 0x1ed   : > { %v1515_v1 = vpop.f32.mrb[32].mxu1  ;;  %v1472_v2 = vpop.f32.mrb[34].mxu0 }
 0x1ee   : > { %v1618_v3 = vmul.f32 0.35355338, %v1515_v1  ;;  %v5129_v4 = vpop.f32.mrb[35].mxu0  ;;  %v5134_v5 = vpop.f32.mrb[33].mxu1  ;;  %v1625_v7 = vadd.f32 %v1617_v63, %v483_v27 }
 0x1ef   : > { %v1518_v10 = vpop.f32.mrb[34].mxu1 }
 0x1f0   : > { %v5135_v11 = vpop.f32.mrb[35].mxu1  ;;  %v1641_v28 = vsel %vm1244_vm5, %v1625_v7, -inf  ;;  %v1626_v12 = vadd.f32 %v1618_v3, %v483_v27 }
 0x1f1   : > { %1642 = vmax.xlane.f32.xlu1 %v1641_v28 }
 0x1f2   : > { %v1644_v14 = vsel %vm1244_vm5, %v1626_v12, -inf }
 0x1f3   : > { %1645 = vmax.xlane.f32.xlu0 %v1644_v14 }
 0x1fa   : > { %v1561_v16 = vpop.f32.mrb[36].mxu0 }
 0x1fb   : > { %v1619_v17 = vmul.f32 0.35355338, %v1561_v16  ;;  %v5140_v18 = vpop.f32.mrb[37].mxu0 }
 0x1fc   : > { %v1564_v19 = vpop.f32.mrb[38].mxu0  ;;  %v1607_v20 = vpop.f32.mrb[36].mxu1 }
 0x1fd   : > { %v1620_v57 = vmul.f32 0.35355338, %v1607_v20  ;;  %v5141_v21 = vpop.f32.mrb[39].mxu0  ;;  %v5146_v23 = vpop.f32.mrb[37].mxu1  ;;  %v1627_v61 = vadd.f32 %v1619_v17, %v483_v27 }
 0x1fe   : > { %v1610_v24 = vpop.f32.mrb[38].mxu1 }
 0x1ff   : > { %v5147_v29 = vpop.f32.mrb[39].mxu1  ;;  %v1647_v30 = vsel %vm1244_vm5, %v1627_v61, -inf  ;;  %v1628_v31 = vadd.f32 %v1620_v57, %v483_v27 }
 0x200   : > { %1648 = vmax.xlane.f32.xlu1 %v1647_v30 }
 0x201   : > { %v1650_v32 = vsel %vm1244_vm5, %v1628_v31, -inf }
 0x202   : > { %1651 = vmax.xlane.f32.xlu0 %v1650_v32 }
 0x211   : > { %818 = vrot.lane.b32.xlu1 %v5982_v62, %s5690_s12 }
 0x266   : > { %v1631_v33 = vpop.xlane.xlu0 %1630 }
 0x267   : > { %v1653_v34 = vsub.f32 %v1621_v36, %v1631_v33 }
 0x268   : > { %v1634_v35 = vpop.xlane.xlu1 %1633 }
 0x269   : > { %v1661_v37 = vmul.f32 1.442695, %v1653_v34  ;;  %v1654_v38 = vsub.f32 %v1622_v40, %v1634_v35 }
 0x26b   : > { %5550 = vpow2.f32 %v1661_v37  ;;  %v1663_v39 = vmul.f32 1.442695, %v1654_v38 }
 0x26d   : > { %5552 = vpow2.f32 %v1663_v39 }
 0x275   : > { %v5551_v41 = vpop.eup %5550  ;;  %v1637_v42 = vpop.xlane.xlu0 %1636 }
 0x276   : > { %v1655_v43 = vsub.f32 %v1623_v52, %v1637_v42  ;;  %v1677_v27 = vsel %vm1244_vm5, %v5551_v41, 0.0 }
 0x277   : > { %v5553_v44 = vpop.eup %5552  ;;  %1678 = vadd.xlane.f32.xlu1 %v1677_v27 }
 0x278   : > { %v1665_v45 = vmul.f32 1.442695, %v1655_v43  ;;  %v1680_v47 = vsel %vm1244_vm5, %v5553_v44, 0.0 }
 0x279   : > { %1681 = vadd.xlane.f32.xlu0 %v1680_v47  ;;  %v1640_v48 = vpop.xlane.xlu0 %1639 }
 0x27a   : > { %5554 = vpow2.f32 %v1665_v45  ;;  %v1656_v36 = vsub.f32 %v1624_v58, %v1640_v48 }
 0x27c   : > { %v1667_v50 = vmul.f32 1.442695, %v1656_v36 }
 0x27e   : > { %5556 = vpow2.f32 %v1667_v50  ;;  %v1643_v40 = vpop.xlane.xlu1 %1642 }
 0x27f   : > { %v1657_v51 = vsub.f32 %v1625_v7, %v1643_v40 }
 0x280   : > { %v1646_v53 = vpop.xlane.xlu0 %1645 }
 0x281   : > { %v1669_v54 = vmul.f32 1.442695, %v1657_v51  ;;  %v1658_v56 = vsub.f32 %v1626_v12, %v1646_v53 }
 0x283   : > { %5558 = vpow2.f32 %v1669_v54  ;;  %v1671_v52 = vmul.f32 1.442695, %v1658_v56 }
 0x284   : > { %v5555_v59 = vpop.eup %5554 }
 0x285   : > { %5560 = vpow2.f32 %v1671_v52  ;;  %v1683_v60 = vsel %vm1244_vm5, %v5555_v59, 0.0 }
 0x286   : > { %1684 = vadd.xlane.f32.xlu1 %v1683_v60 }
 0x288   : > { %v5557_v63 = vpop.eup %5556 }
 0x289   : > { %v1686_v0 = vsel %vm1244_vm5, %v5557_v63, 0.0 }
 0x28a   : > { %1687 = vadd.xlane.f32.xlu0 %v1686_v0 }
 0x28d   : > { %v6022_v1 = vpop.eup %5558  ;;  %v1649_v58 = vpop.xlane.xlu1 %1648 }
 0x28e   : > { %v1659_v2 = vsub.f32 %v1627_v61, %v1649_v58  ;;  %v1689_v3 = vsel %vm1244_vm5, %v6022_v1, 0.0 }
 0x28f   : > { %v6026_v4 = vpop.eup %5560  ;;  %1690 = vadd.xlane.f32.xlu1 %v1689_v3  ;;  %v1652_v5 = vpop.xlane.xlu0 %1651 }
 0x290   : > { %v1673_v7 = vmul.f32 1.442695, %v1659_v2  ;;  %v1660_v10 = vsub.f32 %v1628_v31, %v1652_v5  ;;  %v1692_v11 = vsel %vm1244_vm5, %v6026_v4, 0.0 }
 0x291   : > { %1693 = vadd.xlane.f32.xlu0 %v1692_v11  ;;  %v819_v18 = vpop.permute.xlu1 %818  ;;  %v2103_v11 = vld [vmem:[%s5772_s19] sm:$0xf] }
 0x292   : > { %5562 = vpow2.f32 %v1673_v7  ;;  %v1675_v28 = vmul.f32 1.442695, %v1660_v10  ;;  %v856_v57 = vadd.f32 %v5950_v9, %v819_v18  ;;  %v859_v21 = vadd.f32 %v5954_v15, %v819_v18 }
 0x294   : > { %5564 = vpow2.f32 %v1675_v28  ;;  %v1727_v61 = vpack.c.bf16 %v856_v57, %v856_v57  ;;  %v1728_v30 = vpack.c.bf16 %v859_v21, %v859_v21  ;;  %v2158_v28 = vsel %vm1736_vm6, %v2103_v11, 0 }
 0x296   : > { %v1876_v9 = vsel %vm1736_vm6, %v1728_v30, 0 }
 0x29c   : > { %v6030_v12 = vpop.eup %5562 }
 0x29d   : > { %v1695_v14 = vsel %vm1244_vm5, %v6030_v12, 0.0 }
 0x29e   : > { %v6034_v16 = vpop.eup %5564  ;;  %1696 = vadd.xlane.f32.xlu1 %v1695_v14 }
 0x29f   : > { %v1698_v17 = vsel %vm1244_vm5, %v6034_v16, 0.0 }
 0x2a0   : > { %1699 = vadd.xlane.f32.xlu0 %v1698_v17  ;;  %v4714_v17 = vld [vmem:[%s5772_s19 + $0xc] sm:$0xf] }
 0x2af   : > { %1184 = vrot.lane.b32.xlu1 %v5982_v62, %s5692_s20 }
 0x2b6   : > { %1001 = vrot.lane.b32.xlu0 %v5982_v62, %s5691_s16  ;;  %v1830_v62 = vsel %vm1736_vm6, %v1727_v61, 0  ;;  %v2260_v61 = vsel %vm1736_vm6, %v4714_v17, 0 }
 0x304   : > { %v1679_v19 = vpop.xlane.xlu1 %1678 }
 0x305   : > { %5566 = vrcp.f32 %v1679_v19 }
 0x306   : > { %v1682_v20 = vpop.xlane.xlu0 %1681 }
 0x307   : > { %5568 = vrcp.f32 %v1682_v20 }
 0x30f   : > { %v5567_v23 = vpop.eup %5566 }
 0x310   : > { %v1709_v24 = vmul.f32 %v5567_v23, %v5551_v41 }
 0x311   : > { %v5569_v29 = vpop.eup %5568 }
 0x312   : > { %v1710_v31 = vmul.f32 %v5569_v29, %v5553_v44  ;;  %v1717_v32 = vpack.c.bf16 %v1709_v24, %v1709_v24 }
 0x313   : > { %v1685_v33 = vpop.xlane.xlu1 %1684 }
 0x314   : > { %5151 = vmatmul.mubr.msk.bf16.vlgmr.msra.gmra.mrb[40].mxu0 %vm1244_vm5, %v1717_v32  ;;  %5570 = vrcp.f32 %v1685_v33  ;;  %v1718_v34 = vpack.c.bf16 %v1710_v31, %v1710_v31  ;;  %v4712_v33 = vld [vmem:[%s5772_s19 + $0x8] sm:$0xf] }
 0x315   : > { %5161 = vmatpush3.bf16.msra.mxu0 %v1830_v62  ;;  %5162 = vmatprep.mubr.msk.bf16.mxu0 %vm5689_vm3, %v5688_v8 }
 0x316   : > { %5157 = vmatmul.mubr.msk.bf16.vlgmr.msra.gmra.mrb[40].mxu1 %vm1244_vm5, %v1718_v34  ;;  %5172 = vmatprep.subr.bf16.mxu0 %v5688_v8 }
 0x317   : > { %5167 = vmatpush3.bf16.msra.mxu1 %v1876_v9  ;;  %v1688_v15 = vpop.xlane.xlu0 %1687  ;;  %5168 = vmatprep.mubr.msk.bf16.mxu1 %vm5689_vm3, %v5688_v8 }
 0x318   : > { %5572 = vrcp.f32 %v1688_v15  ;;  %5178 = vmatprep.subr.bf16.mxu1 %v5688_v8 }
 0x31c   : > { %v1691_v42 = vpop.xlane.xlu1 %1690 }
 0x31d   : > { %5574 = vrcp.f32 %v1691_v42 }
 0x31e   : > { %v5571_v35 = vpop.eup %5570  ;;  %v1694_v43 = vpop.xlane.xlu0 %1693 }
 0x31f   : > { %v1711_v37 = vmul.f32 %v5571_v35, %v5555_v59  ;;  %5576 = vrcp.f32 %v1694_v43  ;;  %v2208_v35 = vsel %vm1736_vm6, %v4712_v33, 0 }
 0x321   : > { %v1719_v38 = vpack.c.bf16 %v1711_v37, %v1711_v37 }
 0x322   : > { %v5573_v39 = vpop.eup %5572 }
 0x323   : > { %v1712_v41 = vmul.f32 %v5573_v39, %v5557_v63  ;;  %5163 = vmatmul.mubr.msk.bf16.vlgmr.msra.gmra.mrb[44].mxu0 %vm1244_vm5, %v1719_v38 }
 0x324   : > { %5174 = vmatprep.mubr.msk.bf16.mxu0 %vm5689_vm3, %v5688_v8 }
 0x325   : > { %v1720_v27 = vpack.c.bf16 %v1712_v41, %v1712_v41 }
 0x327   : > { %5169 = vmatmul.mubr.msk.bf16.vlgmr.msra.gmra.mrb[44].mxu1 %vm1244_vm5, %v1720_v27  ;;  %v5575_v48 = vpop.eup %5574 }
 0x328   : > { %5180 = vmatprep.mubr.msk.bf16.mxu1 %vm5689_vm3, %v5688_v8  ;;  %v1713_v56 = vmul.f32 %v5575_v48, %v6022_v1 }
 0x329   : > { %v5577_v36 = vpop.eup %5576 }
 0x32a   : > { %v1714_v52 = vmul.f32 %v5577_v36, %v6026_v4 }
 0x32b   : > { %v1697_v44 = vpop.xlane.xlu1 %1696 }
 0x32c   : > { %5578 = vrcp.f32 %v1697_v44  ;;  %v1722_v3 = vpack.c.bf16 %v1714_v52, %v1714_v52 }
 0x32d   : > { %v1700_v45 = vpop.xlane.xlu0 %1699 }
 0x32e   : > { %5580 = vrcp.f32 %v1700_v45 }
 0x32f   : > { %v1185_v47 = vpop.permute.xlu1 %1184 }
 0x330   : > { %v1222_v40 = vadd.f32 %v5986_v6, %v1185_v47  ;;  %v1225_v51 = vadd.f32 %v5991_v13, %v1185_v47  ;;  %v1721_v13 = vpack.c.bf16 %v1713_v56, %v1713_v56 }
 0x331   : > { %v1002_v50 = vpop.permute.xlu0 %1001 }
 0x332   : > { %v1039_v53 = vadd.f32 %v5966_v46, %v1002_v50  ;;  %v1042_v54 = vadd.f32 %v5971_v49, %v1002_v50  ;;  %v1731_v63 = vpack.c.bf16 %v1222_v40, %v1222_v40  ;;  %v1732_v0 = vpack.c.bf16 %v1225_v51, %v1225_v51 }
 0x334   : > { %v1729_v59 = vpack.c.bf16 %v1039_v53, %v1039_v53  ;;  %v1730_v60 = vpack.c.bf16 %v1042_v54, %v1042_v54  ;;  %v2014_v49 = vsel %vm1736_vm6, %v1731_v63, 0  ;;  %v2060_v1 = vsel %vm1736_vm6, %v1732_v0, 0 }
 0x336   : > { %v1922_v58 = vsel %vm1736_vm6, %v1729_v59, 0  ;;  %v1968_v2 = vsel %vm1736_vm6, %v1730_v60, 0  ;;  %v5579_v6 = vpop.eup %5578 }
 0x337   : > { %5173 = vmatpush3.bf16.msra.mxu0 %v1922_v58  ;;  %5179 = vmatpush3.bf16.msra.mxu1 %v1968_v2  ;;  %v1715_v4 = vmul.f32 %v5579_v6, %v6030_v12  ;;  %v4709_v12 = vld [vmem:[%s5772_s19 + $0x4] sm:$0xf] }
 0x338   : > { %5184 = vmatprep.subr.bf16.mxu0 %v5688_v8  ;;  %5190 = vmatprep.subr.bf16.mxu1 %v5688_v8  ;;  %v5581_v46 = vpop.eup %5580  ;;  %v2111_v14 = vsel %vm1736_vm6, %v4709_v12, 0  ;;  %v6114_v12 = vld [vmem:[%s5792_s18] sm:$0xff] }
 0x339   : > { %v1716_v5 = vmul.f32 %v5581_v46, %v6034_v16  ;;  %v1723_v7 = vpack.c.bf16 %v1715_v4, %v1715_v4 }
 0x33a   : > { %5175 = vmatmul.mubr.msk.bf16.vlgmr.msra.gmra.mrb[48].mxu0 %vm1244_vm5, %v1721_v13  ;;  %5181 = vmatmul.mubr.msk.bf16.vlgmr.msra.gmra.mrb[48].mxu1 %vm1244_vm5, %v1722_v3 }
 0x33b   : > { %5185 = vmatpush3.bf16.msra.mxu0 %v2014_v49  ;;  %5191 = vmatpush3.bf16.msra.mxu1 %v2060_v1  ;;  %v1724_v10 = vpack.c.bf16 %v1716_v5, %v1716_v5 }
 0x33c   : > { %5186 = vmatprep.mubr.msk.bf16.mxu0 %vm5689_vm3, %v5688_v8  ;;  %5192 = vmatprep.mubr.msk.bf16.mxu1 %vm5689_vm3, %v5688_v8 }
 0x33d   : > { %5202 = vmatprep.subr.bf16.mxu1 %v5688_v8  ;;  %5196 = vmatprep.subr.bf16.mxu0 %v5688_v8 }
 0x342   : > { %5187 = vmatmul.mubr.msk.bf16.vlgmr.msra.gmra.mrb[52].mxu0 %vm1244_vm5, %v1723_v7  ;;  %5193 = vmatmul.mubr.msk.bf16.vlgmr.msra.gmra.mrb[52].mxu1 %vm1244_vm5, %v1724_v10 }
 0x343   : > { %5204 = vmatprep.mubr.msk.bf16.mxu1 %vm5689_vm3, %v5688_v8  ;;  %5198 = vmatprep.mubr.msk.bf16.mxu0 %vm5689_vm3, %v5688_v8 }
 0x344   : > { %5203 = vmatpush3.bf16.msra.mxu1 %v2158_v28  ;;  %5197 = vmatpush3.bf16.msra.mxu0 %v2111_v14  ;;  %v2307_v28 = vsub.s32 3, %v5834_v22 }
 0x345   : > { %5214 = vmatprep.subr.bf16.mxu1 %v5688_v8  ;;  %5208 = vmatprep.subr.bf16.mxu0 %v5688_v8 }
 0x346   : > { %v2308_v14 = vrot.slane %v6114_v12, %v2307_v28 }
 0x3e7   : > { %v1774_v16 = vpop.f32.mrb[40].mxu0 }
 0x3e8   : > { %v5152_v18 = vpop.f32.mrb[41].mxu0 }
 0x3e9   : > { %v1777_v19 = vpop.f32.mrb[42].mxu0  ;;  %v1820_v20 = vpop.f32.mrb[40].mxu1 }
 0x3ea   : > { %v2102_v57 = vpack.c.bf16 %v1820_v20, %v1774_v16  ;;  %v5153_v21 = vpop.f32.mrb[43].mxu0  ;;  %v5158_v23 = vpop.f32.mrb[41].mxu1 }
 0x3eb   : > { %v1823_v24 = vpop.f32.mrb[42].mxu1 }
 0x3ec   : > { %v5159_v29 = vpop.f32.mrb[43].mxu1  ;;  %5205 = vmatmul.mubr.msk.bf16.vlgmr.msra.gmra.mrb[56].mxu1 %vm1244_vm5, %v2102_v57 }
 0x3ed   : > { %5215 = vmatpush3.bf16.msra.mxu1 %v2260_v61  ;;  %5216 = vmatprep.mubr.msk.bf16.mxu1 %vm5689_vm3, %v5688_v8  ;;  %v5627_v61 = vld [vmem:[#allocation3] sm:$0xff] }
 0x3ee   : > { %5228 = vmatprep.subr.bf16.mxu1 %v5688_v8 }
 0x3f6   : > { %v1866_v30 = vpop.f32.mrb[44].mxu0 }
 0x3f7   : > { %v5164_v31 = vpop.f32.mrb[45].mxu0 }
 0x3f8   : > { %v1869_v32 = vpop.f32.mrb[46].mxu0 }
 0x3f9   : > { %v5165_v62 = vpop.f32.mrb[47].mxu0 }
 0x3fa   : > { %v1912_v34 = vpop.f32.mrb[44].mxu1 }
 0x3fb   : > { %v2104_v9 = vpack.c.bf16 %v1912_v34, %v1866_v30  ;;  %v5170_v15 = vpop.f32.mrb[45].mxu1  ;;  %v5628_v30 = vld [vmem:[#allocation3 + $0x8] sm:$0xff] }
 0x3fc   : > { %v1915_v37 = vpop.f32.mrb[46].mxu1 }
 0x3fd   : > { %v5171_v38 = vpop.f32.mrb[47].mxu1  ;;  %5199 = vmatmul.mubr.msk.bf16.vlgmr.msra.gmra.mrb[56].mxu0 %vm1244_vm5, %v2104_v9 }
 0x3fe   : > { %5209 = vmatpush3.bf16.msra.mxu0 %v2208_v35  ;;  %5210 = vmatprep.mubr.msk.bf16.mxu0 %vm5689_vm3, %v5688_v8 }
 0x3ff   : > { %5220 = vmatprep.subr.bf16.mxu0 %v5688_v8 }
 0x40d   : > { %v1958_v39 = vpop.f32.mrb[48].mxu0  ;;  %v2004_v41 = vpop.f32.mrb[48].mxu1 }
 0x40e   : > { %v2201_v42 = vpack.c.bf16 %v2004_v41, %v1958_v39  ;;  %v5176_v43 = vpop.f32.mrb[49].mxu0  ;;  %v5182_v27 = vpop.f32.mrb[49].mxu1 }
 0x40f   : > { %v1961_v44 = vpop.f32.mrb[50].mxu0  ;;  %v2007_v45 = vpop.f32.mrb[50].mxu1  ;;  %v5521_v43 = vld [vmem:[%s5777_s23 + $0x108] sm:$0xff]   ;;  %v481_v27 = vld [vmem:[%s6537_s1] sm:$0xff] }
 0x410   : > { %v5177_v47 = vpop.f32.mrb[51].mxu0  ;;  %v5183_v48 = vpop.f32.mrb[51].mxu1  ;;  %5211 = vmatmul.mubr.msk.bf16.vlgmr.msra.gmra.mrb[60].mxu0 %vm1244_vm5, %v2201_v42  ;;  %v5520_v42 = vld [vmem:[%s5777_s23 + $0x100] sm:$0xff]   ;;  %v482_v44 = vld [vmem:[%s6537_s1 + $0x8] sm:$0xff] }
 0x411   : > { %5224 = vmatprep.mubr.msk.bf16.mxu0 %vm5689_vm3, %v5688_v8  ;;  %v6132_v45 = vpack.c.bf16 %v482_v44, %v481_v27  ;;  %v5522_v47 = vld [vmem:[%s5777_s23 + $0xc0] sm:$0xff]   ;;  %v5523_v48 = vld [vmem:[%s5777_s23 + $0xd0] sm:$0xff]  }
 0x412   : > { %5221 = vmatpush3.bf16.msra.mxu0 %v5522_v47 }
 0x413   : > { %5222 = vmatprep.subr.bf16.mxu0 %v5688_v8 }
 0x415   : > { %v2050_v36 = vpop.f32.mrb[52].mxu0  ;;  %v2096_v50 = vpop.f32.mrb[52].mxu1 }
 0x416   : > { %v2253_v40 = vpack.c.bf16 %v2096_v50, %v2050_v36  ;;  %v5188_v51 = vpop.f32.mrb[53].mxu0  ;;  %v5194_v53 = vpop.f32.mrb[53].mxu1  ;;  %v5524_v36 = vld [vmem:[%s5777_s23 + $0xc8] sm:$0xff]   ;;  %v5525_v50 = vld [vmem:[%s5777_s23 + $0xd8] sm:$0xff]  }
 0x417   : > { %v2053_v54 = vpop.f32.mrb[54].mxu0  ;;  %v2099_v56 = vpop.f32.mrb[54].mxu1  ;;  %5223 = vmatpush3.bf16.msra.mxu0 %v5524_v36  ;;  %v2426_v51 = vsub.s32 7, %v5834_v22 }
 0x418   : > { %v5189_v52 = vpop.f32.mrb[55].mxu0  ;;  %v5195_v59 = vpop.f32.mrb[55].mxu1  ;;  %5217 = vmatmul.mubr.msk.bf16.vlgmr.msra.gmra.mrb[60].mxu1 %vm1244_vm5, %v2253_v40  ;;  %5236 = vmatprep.subr.bf16.mxu0 %v5688_v8  ;;  %v2361_v40 = vsub.s32 6, %v5834_v22 }
 0x419   : > { %5232 = vmatprep.mubr.msk.bf16.mxu1 %vm5689_vm3, %v5688_v8  ;;  %5229 = vmatpush3.bf16.msra.mxu1 %v5520_v42  ;;  %v6157_v54 = vrot.slane %v6114_v12, %v2426_v51 }
 0x41a   : > { %5230 = vmatprep.subr.bf16.mxu1 %v5688_v8  ;;  %v6152_v53 = vrot.slane %v6114_v12, %v2361_v40 }
 0x41d   : > { %5231 = vmatpush3.bf16.msra.mxu1 %v5521_v43 }
 0x41e   : > { %5244 = vmatprep.subr.bf16.mxu1 %v5688_v8 }
 0x420   : > { %5233 = vmatmul.mubr.msk.bf16.vlgmr.msra.gmra.mrb[64].mxu1 %vm507_vm4, %v6132_v45 }
 0x421   : > { %5245 = vmatpush3.bf16.msra.mxu1 %v5523_v48  ;;  %5248 = vmatprep.mubr.msk.bf16.mxu1 %vm5689_vm3, %v5688_v8 }
 0x422   : > { %5246 = vmatprep.subr.bf16.mxu1 %v5688_v8 }
 0x425   : > { %5247 = vmatpush3.bf16.msra.mxu1 %v5525_v50 }
 0x426   : > { %5260 = vmatprep.subr.bf16.mxu1 %v5688_v8 }
 0x4bf   : > { %v2194_v60 = vpop.f32.mrb[56].mxu1 }
 0x4c0   : > { %v5206_v63 = vpop.f32.mrb[57].mxu1 }
 0x4c1   : > { %v2197_v0 = vpop.f32.mrb[58].mxu1 }
 0x4c2   : > { %v5207_v58 = vpop.f32.mrb[59].mxu1 }
 0x4c3   : > { %v2342_v58 = vsub.s32 4, %v5834_v22 }
 0x4d0   : > { %v2147_v2 = vpop.f32.mrb[56].mxu0 }
 0x4d1   : > { %v2195_v6 = vadd.f32 %v2194_v60, %v2147_v2  ;;  %v5200_v13 = vpop.f32.mrb[57].mxu0  ;;  %v2343_v2 = vrot.slane %v6114_v12, %v2342_v58 }
 0x4d2   : > { %v2150_v3 = vpop.f32.mrb[58].mxu0 }
 0x4d3   : > { %v2198_v46 = vadd.f32 %v2197_v0, %v2150_v3  ;;  %v5201_v49 = vpop.f32.mrb[59].mxu0 }
 0x4e3   : > { %v2244_v1 = vpop.f32.mrb[60].mxu0 }
 0x4e4   : > { %v2251_v4 = vadd.f32 %v2244_v1, %v2195_v6  ;;  %v5212_v5 = vpop.f32.mrb[61].mxu0  ;;  %v2348_v6 = vsub.s32 5, %v5834_v22 }
 0x4e5   : > { %v2247_v7 = vpop.f32.mrb[62].mxu0 }
 0x4e6   : > { %v2252_v10 = vadd.f32 %v2247_v7, %v2198_v46  ;;  %v5213_v11 = vpop.f32.mrb[63].mxu0 }
 0x4e7   : > { %v5526_v11 = vld [vmem:[%s5777_s23 + $0x140] sm:$0xff]  }
 0x4eb   : > { %v2296_v16 = vpop.f32.mrb[60].mxu1 }
 0x4ec   : > { %v2303_v17 = vadd.f32 %v2296_v16, %v2251_v4  ;;  %v5218_v18 = vpop.f32.mrb[61].mxu1  ;;  %v2349_v4 = vrot.slane %v6114_v12, %v2348_v6  ;;  %v5529_v12 = vld [vmem:[%s5777_s23 + $0x158] sm:$0xff]  }
 0x4ed   : > { %v2299_v19 = vpop.f32.mrb[62].mxu1  ;;  %v5530_v18 = vld [vmem:[%s5777_s23 + $0x110] sm:$0xff]  }
 0x4ee   : > { %v2309_v20 = vadd.f32 %v2308_v14, %v2303_v17  ;;  %v2304_v57 = vadd.f32 %v2299_v19, %v2252_v10  ;;  %v5219_v21 = vpop.f32.mrb[63].mxu1  ;;  %v5528_v17 = vld [vmem:[%s5777_s23 + $0x148] sm:$0xff]   ;;  %v5531_v19 = vld [vmem:[%s5777_s23 + $0x120] sm:$0xff]  }
 0x4ef   : > { %v5534_v21 = vld [vmem:[%s5777_s23 + $0xe0] sm:$0xff]  }
 0x4f0   : > { %v2310_v23 = vadd.f32 %v2308_v14, %v2304_v57  ;;  %v2311_v24 = vadd.f32 %v5627_v61, %v2309_v20  ;;  %v5527_v14 = vld [vmem:[%s5777_s23 + $0x150] sm:$0xff]   ;;  %v5532_v20 = vld [vmem:[%s5777_s23 + $0x118] sm:$0xff]   ;;  %v5533_v57 = vld [vmem:[%s5777_s23 + $0x128] sm:$0xff]  }
 0x4f1   : > { %v5536_v61 = vld [vmem:[%s5777_s23 + $0xe8] sm:$0xff]  }
 0x4f2   : > { %v2313_v29 = vsel %vm507_vm4, %v2311_v24, 0.0  ;;  %v2312_v31 = vadd.f32 %v5628_v30, %v2310_v23  ;;  %v5535_v23 = vld [vmem:[%s5777_s23 + $0xf0] sm:$0xff]  }
 0x4f3   : > { %2314 = vadd.xlane.f32.xlu1 %v2313_v29  ;;  %v5538_v29 = vld [vmem:[%s5777_s23 + $0x160] sm:$0xff]   ;;  %v5542_v30 = vld [vmem:[%s5777_s23 + $0x170] sm:$0xff]  }
 0x4f4   : > { %v2316_v32 = vsel %vm507_vm4, %v2312_v31, 0.0 }
 0x4f5   : > { %2317 = vadd.xlane.f32.xlu0 %v2316_v32  ;;  %v5543_v32 = vld [vmem:[%s5777_s23 + $0x178] sm:$0xff]  }
 0x580   : > { %v2315_v33 = vpop.xlane.xlu1 %2314 }
 0x581   : > { %v2320_v62 = vmul.f32 0.03125, %v2315_v33  ;;  %v5540_v33 = vld [vmem:[%s5777_s23 + $0x130] sm:$0xff]  }
 0x582   : > { %v2318_v34 = vpop.xlane.xlu0 %2317 }
 0x583   : > { %v2322_v9 = vsub.f32 %v2311_v24, %v2320_v62  ;;  %v2321_v15 = vmul.f32 0.03125, %v2318_v34  ;;  %v5537_v24 = vld [vmem:[%s5777_s23 + $0xf8] sm:$0xff]   ;;  %v2477_v34 = vpop.f32.mrb[64].mxu1 }
 0x584   : > { %v5541_v62 = vld [vmem:[%s5777_s23 + $0x138] sm:$0xff]  }
 0x585   : > { %v2323_v35 = vsub.f32 %v2312_v31, %v2321_v15  ;;  %v2324_v37 = vmul.f32 %v2322_v9, %v2322_v9  ;;  %v5539_v31 = vld [vmem:[%s5777_s23 + $0x168] sm:$0xff]   ;;  %v5234_v15 = vpop.f32.mrb[65].mxu1 }
 0x587   : > { %v2326_v38 = vsel %vm507_vm4, %v2324_v37, 0.0  ;;  %v2325_v39 = vmul.f32 %v2323_v35, %v2323_v35 }
 0x588   : > { %2327 = vadd.xlane.f32.xlu0 %v2326_v38 }
 0x589   : > { %v2329_v41 = vsel %vm507_vm4, %v2325_v39, 0.0 }
 0x58a   : > { %2330 = vadd.xlane.f32.xlu1 %v2329_v41 }
 0x59b   : > { %2564 = vrot.lane.b32.xlu1 %v6152_v53, %s5690_s12 }
 0x59e   : > { %2626 = vrot.lane.b32.xlu0 %v6157_v54, %s5690_s12 }
 0x59f   : > { %2810 = vrot.lane.b32.xlu1 %v6157_v54, %s5691_s16 }
 0x5a2   : > { %2749 = vrot.lane.b32.xlu0 %v6152_v53, %s5691_s16 }
 0x5a3   : > { %2993 = vrot.lane.b32.xlu1 %v6157_v54, %s5692_s20 }
 0x5a6   : > { %2932 = vrot.lane.b32.xlu0 %v6152_v53, %s5692_s20 }
 0x615   : > { %v2328_v56 = vpop.xlane.xlu0 %2327 }
 0x616   : > { %v2332_v52 = vmul.f32 0.03125, %v2328_v56 }
 0x617   : > { %v2331_v59 = vpop.xlane.xlu1 %2330 }
 0x618   : > { %v2334_v60 = vadd.f32 1e-05, %v2332_v52  ;;  %v2333_v63 = vmul.f32 0.03125, %v2331_v59 }
 0x61a   : > { %5582 = vrsqrt.f32 %v2334_v60  ;;  %v2335_v0 = vadd.f32 1e-05, %v2333_v63 }
 0x61b   : > { %v2565_v63 = vpop.permute.xlu1 %2564 }
 0x61c   : > { %5584 = vrsqrt.f32 %v2335_v0 }
 0x624   : > { %v5583_v13 = vpop.eup %5582 }
 0x625   : > { %v2338_v3 = vmul.f32 %v5583_v13, %v2322_v9  ;;  %v2478_v9 = vadd.f32 %v2477_v34, %v6157_v54 }
 0x626   : > { %v5585_v46 = vpop.eup %5584 }
 0x627   : > { %v2344_v49 = vmul.f32 %v2343_v2, %v2338_v3  ;;  %v2339_v1 = vmul.f32 %v5585_v46, %v2323_v35  ;;  %v2480_v35 = vpop.f32.mrb[66].mxu1  ;;  %v3106_v37 = vpack.c.bf16 %v2478_v9, %v2478_v9 }
 0x628   : > { %v2481_v38 = vadd.f32 %v2480_v35, %v6157_v54  ;;  %v5235_v39 = vpop.f32.mrb[67].mxu1 }
 0x629   : > { %v2345_v5 = vmul.f32 %v2343_v2, %v2339_v1  ;;  %v6179_v7 = vadd.f32 %v2349_v4, %v2344_v49  ;;  %v3118_v41 = vsel %vm1244_vm5, %v3106_v37, 0 }
 0x62a   : > { %v3107_v42 = vpack.c.bf16 %v2481_v38, %v2481_v38 }
 0x62b   : > { %v6181_v10 = vadd.f32 %v2349_v4, %v2345_v5  ;;  %v2627_v4 = vpop.permute.xlu0 %2626  ;;  %v2811_v5 = vpop.permute.xlu1 %2810 }
 0x62c   : > { %v3164_v43 = vsel %vm1244_vm5, %v3107_v42, 0 }
 0x62d   : > { %v2352_v16 = vpack.c.bf16 %v6181_v10, %v6179_v7 }
 0x62f   : > { %5225 = vmatmul.mubr.msk.bf16.vlgmr.msra.gmra.mrb[64].mxu0 %vm507_vm4, %v2352_v16  ;;  %5249 = vmatmul.mubr.msk.bf16.vlgmr.msra.gmra.mrb[68].mxu1 %vm507_vm4, %v2352_v16 }
 0x630   : > { %5237 = vmatpush3.bf16.msra.mxu0 %v5526_v11  ;;  %5261 = vmatpush3.bf16.msra.mxu1 %v5527_v14 }
 0x631   : > { %5238 = vmatprep.subr.bf16.mxu0 %v5688_v8  ;;  %5262 = vmatprep.subr.bf16.mxu1 %v5688_v8 }
 0x632   : > { %5240 = vmatprep.mubr.msk.bf16.mxu0 %vm5689_vm3, %v5688_v8  ;;  %5264 = vmatprep.mubr.msk.bf16.mxu1 %vm5689_vm3, %v5688_v8 }
 0x634   : > { %5239 = vmatpush3.bf16.msra.mxu0 %v5528_v17  ;;  %5263 = vmatpush3.bf16.msra.mxu1 %v5529_v12 }
 0x635   : > { %5252 = vmatprep.subr.bf16.mxu0 %v5688_v8  ;;  %5276 = vmatprep.subr.bf16.mxu1 %v5688_v8 }
 0x637   : > { %5241 = vmatmul.mubr.msk.bf16.vlgmr.msra.gmra.mrb[68].mxu0 %vm507_vm4, %v6132_v45  ;;  %5265 = vmatmul.mubr.msk.bf16.vlgmr.msra.gmra.mrb[72].mxu1 %vm507_vm4, %v6132_v45 }
 0x638   : > { %5253 = vmatpush3.bf16.msra.mxu0 %v5530_v18  ;;  %5277 = vmatpush3.bf16.msra.mxu1 %v5531_v19 }
 0x639   : > { %5254 = vmatprep.subr.bf16.mxu0 %v5688_v8  ;;  %5278 = vmatprep.subr.bf16.mxu1 %v5688_v8 }
 0x63a   : > { %5256 = vmatprep.mubr.msk.bf16.mxu0 %vm5689_vm3, %v5688_v8  ;;  %5280 = vmatprep.mubr.msk.bf16.mxu1 %vm5689_vm3, %v5688_v8 }
 0x63c   : > { %5255 = vmatpush3.bf16.msra.mxu0 %v5532_v20  ;;  %5279 = vmatpush3.bf16.msra.mxu1 %v5533_v57 }
 0x63d   : > { %5268 = vmatprep.subr.bf16.mxu0 %v5688_v8  ;;  %5292 = vmatprep.subr.bf16.mxu1 %v5688_v8 }
 0x63f   : > { %5257 = vmatmul.mubr.msk.bf16.vlgmr.msra.gmra.mrb[72].mxu0 %vm507_vm4, %v6132_v45  ;;  %5281 = vmatmul.mubr.msk.bf16.vlgmr.msra.gmra.mrb[76].mxu1 %vm507_vm4, %v6132_v45 }
 0x640   : > { %5269 = vmatpush3.bf16.msra.mxu0 %v5534_v21  ;;  %5293 = vmatpush3.bf16.msra.mxu1 %v5535_v23 }
 0x641   : > { %5270 = vmatprep.subr.bf16.mxu0 %v5688_v8  ;;  %5294 = vmatprep.subr.bf16.mxu1 %v5688_v8 }
 0x642   : > { %5272 = vmatprep.mubr.msk.bf16.mxu0 %vm5689_vm3, %v5688_v8  ;;  %5296 = vmatprep.mubr.msk.bf16.mxu1 %vm5689_vm3, %v5688_v8 }
 0x644   : > { %5271 = vmatpush3.bf16.msra.mxu0 %v5536_v61  ;;  %5295 = vmatpush3.bf16.msra.mxu1 %v5537_v24 }
 0x645   : > { %5284 = vmatprep.subr.bf16.mxu0 %v5688_v8  ;;  %5308 = vmatprep.subr.bf16.mxu1 %v5688_v8 }
 0x647   : > { %5273 = vmatmul.mubr.msk.bf16.vlgmr.msra.gmra.mrb[76].mxu0 %vm507_vm4, %v2352_v16  ;;  %5297 = vmatmul.mubr.msk.bf16.vlgmr.msra.gmra.mrb[80].mxu1 %vm507_vm4, %v2352_v16 }
 0x648   : > { %5285 = vmatpush3.bf16.msra.mxu0 %v5538_v29  ;;  %5288 = vmatprep.mubr.msk.bf16.mxu0 %vm5689_vm3, %v5688_v8 }
 0x649   : > { %5286 = vmatprep.subr.bf16.mxu0 %v5688_v8  ;;  %5309 = vmatpush3.bf16.msra.mxu1 %v5542_v30 }
 0x64a   : > { %5310 = vmatprep.subr.bf16.mxu1 %v5688_v8  ;;  %5312 = vmatprep.mubr.msk.bf16.mxu1 %vm5689_vm3, %v5688_v8 }
 0x64c   : > { %5287 = vmatpush3.bf16.msra.mxu0 %v5539_v31 }
 0x64d   : > { %5300 = vmatprep.subr.bf16.mxu0 %v5688_v8  ;;  %5311 = vmatpush3.bf16.msra.mxu1 %v5543_v32 }
 0x64e   : > { %5322 = vmatprep.subr.bf16.mxu1 %v5688_v8 }
 0x64f   : > { %5289 = vmatmul.mubr.msk.bf16.vlgmr.msra.gmra.mrb[80].mxu0 %vm507_vm4, %v6132_v45 }
 0x650   : > { %5301 = vmatpush3.bf16.msra.mxu0 %v5540_v33  ;;  %5304 = vmatprep.mubr.msk.bf16.mxu0 %vm5689_vm3, %v5688_v8 }
 0x651   : > { %5302 = vmatprep.subr.bf16.mxu0 %v5688_v8  ;;  %5313 = vmatmul.mubr.msk.bf16.vlgmr.msra.gmra.mrb[84].mxu1 %vm507_vm4, %v6132_v45 }
 0x652   : > { %5324 = vmatprep.mubr.msk.bf16.mxu1 %vm5689_vm3, %v5688_v8 }
 0x654   : > { %5303 = vmatpush3.bf16.msra.mxu0 %v5541_v62 }
 0x655   : > { %5316 = vmatprep.subr.bf16.mxu0 %v5688_v8 }
 0x656   : > { %5323 = vmatpush3.bf16.xpose.msra.mxu1 %v3164_v43 }
 0x657   : > { %5305 = vmatmul.mubr.msk.bf16.vlgmr.msra.gmra.mrb[84].mxu0 %vm507_vm4, %v6132_v45  ;;  %5334 = vmatprep.subr.bf16.mxu1 %v5688_v8 }
 0x658   : > { %5318 = vmatprep.mubr.msk.bf16.mxu0 %vm5689_vm3, %v5688_v8 }
 0x65d   : > { %5317 = vmatpush3.bf16.xpose.msra.mxu0 %v3118_v41 }
 0x65e   : > { %5328 = vmatprep.subr.bf16.mxu0 %v5688_v8 }
 0x702   : > { %v2412_v27 = vpop.f32.mrb[64].mxu0  ;;  %v2601_v44 = vpop.f32.mrb[68].mxu1 }
 0x703   : > { %v2413_v45 = vadd.f32 %v2412_v27, %v6152_v53  ;;  %v5226_v47 = vpop.f32.mrb[65].mxu0  ;;  %v5250_v48 = vpop.f32.mrb[69].mxu1  ;;  %v2602_v30 = vadd.f32 %v2601_v44, %v2565_v63 }
 0x704   : > { %v2415_v36 = vpop.f32.mrb[66].mxu0  ;;  %v2604_v50 = vpop.f32.mrb[70].mxu1 }
 0x705   : > { %v3098_v54 = vpack.c.bf16 %v2413_v45, %v2413_v45  ;;  %v2416_v56 = vadd.f32 %v2415_v36, %v6152_v53  ;;  %v5227_v52 = vpop.f32.mrb[67].mxu0  ;;  %v5251_v59 = vpop.f32.mrb[71].mxu1  ;;  %v2605_v9 = vadd.f32 %v2604_v50, %v2565_v63  ;;  %v3100_v39 = vpack.c.bf16 %v2602_v30, %v2602_v30 }
 0x706   : > { %v2750_v45 = vpop.permute.xlu0 %2749 }
 0x707   : > { %v3099_v60 = vpack.c.bf16 %v2416_v56, %v2416_v56  ;;  %5319 = vmatmul.mubr.msk.bf16.vlgmr.msra.gmra.mrb[88].mxu0 %vm1244_vm5, %v3098_v54  ;;  %v3101_v44 = vpack.c.bf16 %v2605_v9, %v2605_v9 }
 0x708   : > { %5330 = vmatprep.mubr.msk.bf16.mxu0 %vm5689_vm3, %v5688_v8 }
 0x709   : > { %5325 = vmatmul.mubr.msk.bf16.vlgmr.msra.gmra.mrb[88].mxu1 %vm1244_vm5, %v3099_v60 }
 0x70a   : > { %v6273_v0 = vpop.f32.mrb[68].mxu0  ;;  %v6275_v2 = vpop.f32.mrb[72].mxu1  ;;  %5336 = vmatprep.mubr.msk.bf16.mxu1 %vm5689_vm3, %v5688_v8 }
 0x70b   : > { %v5242_v13 = vpop.f32.mrb[69].mxu0  ;;  %v5266_v53 = vpop.f32.mrb[73].mxu1 }
 0x70c   : > { %v6279_v3 = vpop.f32.mrb[70].mxu0  ;;  %v6281_v46 = vpop.f32.mrb[74].mxu1 }
 0x70d   : > { %v5243_v49 = vpop.f32.mrb[71].mxu0  ;;  %v5267_v1 = vpop.f32.mrb[75].mxu1 }
 0x70e   : > { %v6307_v1 = vld [vmem:[%s5792_s18 + $0x8] sm:$0xff] }
 0x712   : > { %v2663_v11 = vpop.f32.mrb[72].mxu0  ;;  %v2847_v14 = vpop.f32.mrb[76].mxu1 }
 0x713   : > { %v2664_v16 = vadd.f32 %v2663_v11, %v2627_v4  ;;  %v5258_v17 = vpop.f32.mrb[73].mxu0  ;;  %v5282_v12 = vpop.f32.mrb[77].mxu1  ;;  %v2848_v61 = vadd.f32 %v2847_v14, %v2811_v5  ;;  %v6317_v11 = vrot.slane %v6307_v1, %v493_v26 }
 0x714   : > { %v2666_v18 = vpop.f32.mrb[74].mxu0  ;;  %v2850_v19 = vpop.f32.mrb[78].mxu1 }
 0x715   : > { %v3108_v20 = vpack.c.bf16 %v2664_v16, %v2664_v16  ;;  %v2667_v57 = vadd.f32 %v2666_v18, %v2627_v4  ;;  %v5259_v21 = vpop.f32.mrb[75].mxu0  ;;  %v5283_v23 = vpop.f32.mrb[79].mxu1  ;;  %v2851_v32 = vadd.f32 %v2850_v19, %v2811_v5  ;;  %v3110_v33 = vpack.c.bf16 %v2848_v61, %v2848_v61 }
 0x716   : > { %v2994_v4 = vpop.permute.xlu1 %2993  ;;  %v2543_v61 = vadd.f32 %v6279_v3, %v6317_v11 }
 0x717   : > { %v3210_v24 = vsel %vm1244_vm5, %v3108_v20, 0  ;;  %v3109_v29 = vpack.c.bf16 %v2667_v57, %v2667_v57  ;;  %v3111_v41 = vpack.c.bf16 %v2851_v32, %v2851_v32  ;;  %v3302_v27 = vsel %vm1244_vm5, %v3110_v33, 0  ;;  %v2933_v20 = vpop.permute.xlu0 %2932 }
 0x718   : > { %5329 = vmatpush3.bf16.xpose.msra.mxu0 %v3210_v24  ;;  %v2540_v57 = vadd.f32 %v6273_v0, %v6317_v11 }
 0x719   : > { %v3256_v31 = vsel %vm1244_vm5, %v3109_v29, 0  ;;  %5340 = vmatprep.subr.bf16.mxu0 %v5688_v8  ;;  %v3348_v48 = vsel %vm1244_vm5, %v3111_v41, 0 }
 0x71a   : > { %v2969_v62 = vpop.f32.mrb[80].mxu1  ;;  %v2786_v34 = vpop.f32.mrb[76].mxu0  ;;  %5335 = vmatpush3.bf16.xpose.msra.mxu1 %v3256_v31  ;;  %v3586_v29 = vpack.c.bf16 %v2540_v57, %v2540_v57  ;;  %v3587_v31 = vpack.c.bf16 %v2543_v61, %v2543_v61 }
 0x71b   : > { %v5274_v15 = vpop.f32.mrb[77].mxu0  ;;  %v5298_v35 = vpop.f32.mrb[81].mxu1  ;;  %5346 = vmatprep.subr.bf16.mxu1 %v5688_v8  ;;  %v2787_v47 = vadd.f32 %v2786_v34, %v2750_v45  ;;  %v2970_v24 = vadd.f32 %v2969_v62, %v2933_v20 }
 0x71c   : > { %v2789_v37 = vpop.f32.mrb[78].mxu0  ;;  %v2972_v38 = vpop.f32.mrb[82].mxu1  ;;  %v3598_v0 = vsel %vm1736_vm6, %v3586_v29, 0  ;;  %v3644_v3 = vsel %vm1736_vm6, %v3587_v31, 0 }
 0x71d   : > { %v5275_v42 = vpop.f32.mrb[79].mxu0  ;;  %v5299_v43 = vpop.f32.mrb[83].mxu1  ;;  %v2790_v50 = vadd.f32 %v2789_v37, %v2750_v45  ;;  %v3102_v59 = vpack.c.bf16 %v2787_v47, %v2787_v47  ;;  %v2973_v30 = vadd.f32 %v2972_v38, %v2933_v20  ;;  %v3104_v32 = vpack.c.bf16 %v2970_v24, %v2970_v24 }
 0x71f   : > { %5331 = vmatmul.mubr.msk.bf16.vlgmr.msra.gmra.mrb[92].mxu0 %vm1244_vm5, %v3100_v39  ;;  %v3103_v53 = vpack.c.bf16 %v2790_v50, %v2790_v50  ;;  %v3105_v33 = vpack.c.bf16 %v2973_v30, %v2973_v30 }
 0x720   : > { %5341 = vmatpush3.bf16.xpose.msra.mxu0 %v3302_v27  ;;  %5342 = vmatprep.mubr.msk.bf16.mxu0 %vm5689_vm3, %v5688_v8 }
 0x721   : > { %5337 = vmatmul.mubr.msk.bf16.vlgmr.msra.gmra.mrb[92].mxu1 %vm1244_vm5, %v3101_v44  ;;  %5352 = vmatprep.subr.bf16.mxu0 %v5688_v8 }
 0x722   : > { %5347 = vmatpush3.bf16.xpose.msra.mxu1 %v3348_v48  ;;  %v6294_v36 = vpop.f32.mrb[80].mxu0  ;;  %5348 = vmatprep.mubr.msk.bf16.mxu1 %vm5689_vm3, %v5688_v8 }
 0x723   : > { %v5290_v54 = vpop.f32.mrb[81].mxu0  ;;  %5358 = vmatprep.subr.bf16.mxu1 %v5688_v8 }
 0x724   : > { %v6299_v56 = vpop.f32.mrb[82].mxu0  ;;  %v6301_v52 = vpop.f32.mrb[84].mxu1 }
 0x725   : > { %v5291_v60 = vpop.f32.mrb[83].mxu0  ;;  %v5314_v63 = vpop.f32.mrb[85].mxu1 }
 0x726   : > { %v6303_v13 = vpop.f32.mrb[86].mxu1 }
 0x727   : > { %5343 = vmatmul.mubr.msk.bf16.vlgmr.msra.gmra.mrb[96].mxu0 %vm1244_vm5, %v3102_v59  ;;  %v5315_v49 = vpop.f32.mrb[87].mxu1 }
 0x728   : > { %5354 = vmatprep.mubr.msk.bf16.mxu0 %vm5689_vm3, %v5688_v8 }
 0x729   : > { %5349 = vmatmul.mubr.msk.bf16.vlgmr.msra.gmra.mrb[96].mxu1 %vm1244_vm5, %v3103_v53 }
 0x72a   : > { %v3030_v5 = vpop.f32.mrb[84].mxu0  ;;  %5360 = vmatprep.mubr.msk.bf16.mxu1 %vm5689_vm3, %v5688_v8 }
 0x72b   : > { %v3031_v14 = vadd.f32 %v3030_v5, %v2994_v4  ;;  %v5306_v16 = vpop.f32.mrb[85].mxu0 }
 0x72c   : > { %v3033_v17 = vpop.f32.mrb[86].mxu0 }
 0x72d   : > { %v3112_v12 = vpack.c.bf16 %v3031_v14, %v3031_v14  ;;  %v3034_v18 = vadd.f32 %v3033_v17, %v2994_v4  ;;  %v5307_v19 = vpop.f32.mrb[87].mxu0 }
 0x72f   : > { %v3394_v21 = vsel %vm1244_vm5, %v3112_v12, 0  ;;  %v3113_v23 = vpack.c.bf16 %v3034_v18, %v3034_v18 }
 0x730   : > { %5353 = vmatpush3.bf16.xpose.msra.mxu0 %v3394_v21 }
 0x731   : > { %v3440_v26 = vsel %vm1244_vm5, %v3113_v23, 0  ;;  %5364 = vmatprep.subr.bf16.mxu0 %v5688_v8 }
 0x732   : > { %5359 = vmatpush3.bf16.xpose.msra.mxu1 %v3440_v26 }
 0x733   : > { %5370 = vmatprep.subr.bf16.mxu1 %v5688_v8 }
 0x737   : > { %5355 = vmatmul.mubr.msk.bf16.vlgmr.msra.gmra.mrb[100].mxu0 %vm1244_vm5, %v3104_v32 }
 0x738   : > { %5365 = vmatpush3.bf16.msra.mxu0 %v3598_v0  ;;  %5366 = vmatprep.mubr.msk.bf16.mxu0 %vm5689_vm3, %v5688_v8 }
 0x739   : > { %5361 = vmatmul.mubr.msk.bf16.vlgmr.msra.gmra.mrb[100].mxu1 %vm1244_vm5, %v3105_v33  ;;  %5376 = vmatprep.subr.bf16.mxu0 %v5688_v8 }
 0x73a   : > { %5371 = vmatpush3.bf16.msra.mxu1 %v3644_v3  ;;  %5372 = vmatprep.mubr.msk.bf16.mxu1 %vm5689_vm3, %v5688_v8 }
 0x73b   : > { %5382 = vmatprep.subr.bf16.mxu1 %v5688_v8 }
 0x7da   : > { %v3154_v62 = vpop.f32.mrb[88].mxu0 }
 0x7db   : > { %v3482_v34 = vmul.f32 0.35355338, %v3154_v62  ;;  %v5320_v9 = vpop.f32.mrb[89].mxu0 }
 0x7dc   : > { %v3157_v15 = vpop.f32.mrb[90].mxu0  ;;  %v3200_v35 = vpop.f32.mrb[88].mxu1 }
 0x7dd   : > { %v3483_v37 = vmul.f32 0.35355338, %v3200_v35  ;;  %v5321_v38 = vpop.f32.mrb[91].mxu0  ;;  %v5326_v39 = vpop.f32.mrb[89].mxu1  ;;  %v3490_v41 = vsel %vm1244_vm5, %v3482_v34, -inf }
 0x7de   : > { %v3203_v42 = vpop.f32.mrb[90].mxu1  ;;  %3491 = vmax.xlane.f32.xlu1 %v3490_v41 }
 0x7df   : > { %v5327_v43 = vpop.f32.mrb[91].mxu1  ;;  %v3493_v27 = vsel %vm1244_vm5, %v3483_v37, -inf }
 0x7e0   : > { %3494 = vmax.xlane.f32.xlu0 %v3493_v27 }
 0x7f2   : > { %v3246_v44 = vpop.f32.mrb[92].mxu0 }
 0x7f3   : > { %v3484_v45 = vmul.f32 0.35355338, %v3246_v44  ;;  %v5332_v47 = vpop.f32.mrb[93].mxu0 }
 0x7f4   : > { %v3249_v48 = vpop.f32.mrb[94].mxu0  ;;  %v3292_v50 = vpop.f32.mrb[92].mxu1 }
 0x7f5   : > { %v3485_v54 = vmul.f32 0.35355338, %v3292_v50  ;;  %v5333_v59 = vpop.f32.mrb[95].mxu0  ;;  %v5338_v60 = vpop.f32.mrb[93].mxu1  ;;  %v3496_v63 = vsel %vm1244_vm5, %v3484_v45, -inf }
 0x7f6   : > { %v3295_v53 = vpop.f32.mrb[94].mxu1  ;;  %3497 = vmax.xlane.f32.xlu0 %v3496_v63 }
 0x7f7   : > { %v5339_v49 = vpop.f32.mrb[95].mxu1  ;;  %v3499_v4 = vsel %vm1244_vm5, %v3485_v54, -inf }
 0x7f8   : > { %3500 = vmax.xlane.f32.xlu1 %v3499_v4 }
 0x7fa   : > { %v3338_v5 = vpop.f32.mrb[96].mxu0 }
 0x7fb   : > { %v3486_v14 = vmul.f32 0.35355338, %v3338_v5  ;;  %v5344_v16 = vpop.f32.mrb[97].mxu0 }
 0x7fc   : > { %v3341_v17 = vpop.f32.mrb[98].mxu0  ;;  %v3384_v12 = vpop.f32.mrb[96].mxu1 }
 0x7fd   : > { %v3487_v18 = vmul.f32 0.35355338, %v3384_v12  ;;  %v5345_v19 = vpop.f32.mrb[99].mxu0  ;;  %v5350_v20 = vpop.f32.mrb[97].mxu1  ;;  %v3502_v57 = vsel %vm1244_vm5, %v3486_v14, -inf }
 0x7fe   : > { %v3387_v21 = vpop.f32.mrb[98].mxu1  ;;  %3503 = vmax.xlane.f32.xlu0 %v3502_v57 }
 0x7ff   : > { %v5351_v23 = vpop.f32.mrb[99].mxu1  ;;  %v3505_v61 = vsel %vm1244_vm5, %v3487_v18, -inf }
 0x800   : > { %3506 = vmax.xlane.f32.xlu1 %v3505_v61 }
 0x80a   : > { %v3430_v24 = vpop.f32.mrb[100].mxu0 }
 0x80b   : > { %v3488_v26 = vmul.f32 0.35355338, %v3430_v24  ;;  %v5356_v29 = vpop.f32.mrb[101].mxu0 }
 0x80c   : > { %v3433_v30 = vpop.f32.mrb[102].mxu0  ;;  %v3476_v31 = vpop.f32.mrb[100].mxu1 }
 0x80d   : > { %v3489_v32 = vmul.f32 0.35355338, %v3476_v31  ;;  %v5357_v0 = vpop.f32.mrb[103].mxu0  ;;  %v5362_v33 = vpop.f32.mrb[101].mxu1  ;;  %v3508_v3 = vsel %vm1244_vm5, %v3488_v26, -inf }
 0x80e   : > { %v3479_v62 = vpop.f32.mrb[102].mxu1  ;;  %3509 = vmax.xlane.f32.xlu0 %v3508_v3 }
 0x80f   : > { %v5363_v9 = vpop.f32.mrb[103].mxu1  ;;  %v3511_v15 = vsel %vm1244_vm5, %v3489_v32, -inf }
 0x810   : > { %3512 = vmax.xlane.f32.xlu1 %v3511_v15 }
 0x86b   : > { %v3492_v35 = vpop.xlane.xlu1 %3491 }
 0x86c   : > { %v3514_v38 = vsub.f32 %v3482_v34, %v3492_v35 }
 0x86d   : > { %v3495_v39 = vpop.xlane.xlu0 %3494 }
 0x86e   : > { %v3522_v41 = vmul.f32 1.442695, %v3514_v38  ;;  %v3515_v42 = vsub.f32 %v3483_v37, %v3495_v39 }
 0x870   : > { %5586 = vpow2.f32 %v3522_v41  ;;  %v3524_v43 = vmul.f32 1.442695, %v3515_v42 }
 0x872   : > { %5588 = vpow2.f32 %v3524_v43 }
 0x87a   : > { %v5587_v27 = vpop.eup %5586 }
 0x87b   : > { %v3538_v44 = vsel %vm1244_vm5, %v5587_v27, 0.0 }
 0x87c   : > { %v5589_v47 = vpop.eup %5588  ;;  %3539 = vadd.xlane.f32.xlu0 %v3538_v44 }
 0x87d   : > { %v3541_v48 = vsel %vm1244_vm5, %v5589_v47, 0.0 }
 0x87e   : > { %3542 = vadd.xlane.f32.xlu1 %v3541_v48 }
 0x883   : > { %v3498_v50 = vpop.xlane.xlu0 %3497 }
 0x884   : > { %v3516_v59 = vsub.f32 %v3484_v45, %v3498_v50 }
 0x885   : > { %v3501_v60 = vpop.xlane.xlu1 %3500 }
 0x886   : > { %v3526_v63 = vmul.f32 1.442695, %v3516_v59  ;;  %v3517_v53 = vsub.f32 %v3485_v54, %v3501_v60 }
 0x888   : > { %5590 = vpow2.f32 %v3526_v63  ;;  %v3528_v34 = vmul.f32 1.442695, %v3517_v53 }
 0x88a   : > { %5592 = vpow2.f32 %v3528_v34 }
 0x88b   : > { %v3504_v37 = vpop.xlane.xlu0 %3503 }
 0x88c   : > { %v3518_v49 = vsub.f32 %v3486_v14, %v3504_v37 }
 0x88d   : > { %v3507_v4 = vpop.xlane.xlu1 %3506 }
 0x88e   : > { %v3530_v5 = vmul.f32 1.442695, %v3518_v49  ;;  %v3519_v16 = vsub.f32 %v3487_v18, %v3507_v4 }
 0x890   : > { %5594 = vpow2.f32 %v3530_v5  ;;  %v3532_v17 = vmul.f32 1.442695, %v3519_v16 }
 0x892   : > { %v5591_v12 = vpop.eup %5590  ;;  %5596 = vpow2.f32 %v3532_v17 }
 0x893   : > { %v3544_v19 = vsel %vm1244_vm5, %v5591_v12, 0.0 }
 0x894   : > { %v5593_v20 = vpop.eup %5592  ;;  %3545 = vadd.xlane.f32.xlu0 %v3544_v19 }
 0x895   : > { %v3547_v45 = vsel %vm1244_vm5, %v5593_v20, 0.0 }
 0x896   : > { %3548 = vadd.xlane.f32.xlu1 %v3547_v45 }
 0x89a   : > { %v6349_v54 = vpop.eup %5594 }
 0x89b   : > { %v3510_v57 = vpop.xlane.xlu0 %3509  ;;  %v3550_v14 = vsel %vm1244_vm5, %v6349_v54, 0.0 }
 0x89c   : > { %v6353_v21 = vpop.eup %5596  ;;  %v3520_v18 = vsub.f32 %v3488_v26, %v3510_v57  ;;  %3551 = vadd.xlane.f32.xlu0 %v3550_v14 }
 0x89d   : > { %v3553_v23 = vsel %vm1244_vm5, %v6353_v21, 0.0  ;;  %v3513_v30 = vpop.xlane.xlu1 %3512 }
 0x89e   : > { %v3534_v61 = vmul.f32 1.442695, %v3520_v18  ;;  %3554 = vadd.xlane.f32.xlu1 %v3553_v23  ;;  %v3521_v31 = vsub.f32 %v3489_v32, %v3513_v30 }
 0x8a0   : > { %5598 = vpow2.f32 %v3534_v61  ;;  %v3536_v0 = vmul.f32 1.442695, %v3521_v31 }
 0x8a2   : > { %5600 = vpow2.f32 %v3536_v0 }
 0x8aa   : > { %v6357_v24 = vpop.eup %5598 }
 0x8ab   : > { %v3556_v29 = vsel %vm1244_vm5, %v6357_v24, 0.0 }
 0x8ac   : > { %3557 = vadd.xlane.f32.xlu0 %v3556_v29  ;;  %v6365_v26 = vpop.eup %5600 }
 0x8ad   : > { %v3559_v33 = vsel %vm1244_vm5, %v6365_v26, 0.0 }
 0x8af   : > { %2871 = vrot.lane.b32.xlu1 %v6317_v11, %s5691_s16 }
 0x8c2   : > { %2688 = vrot.lane.b32.xlu0 %v6317_v11, %s5690_s12 }
 0x8d3   : > { %3560 = vadd.xlane.f32.xlu1 %v3559_v33 }
 0x8e4   : > { %3054 = vrot.lane.b32.xlu1 %v6317_v11, %s5692_s20 }
 0x909   : > { %v3540_v3 = vpop.xlane.xlu0 %3539 }
 0x90a   : > { %5602 = vrcp.f32 %v3540_v3 }
 0x90b   : > { %v3543_v62 = vpop.xlane.xlu1 %3542 }
 0x90c   : > { %5604 = vrcp.f32 %v3543_v62 }
 0x914   : > { %v5603_v9 = vpop.eup %5602 }
 0x915   : > { %v3570_v32 = vmul.f32 %v5603_v9, %v5587_v27 }
 0x916   : > { %v5605_v15 = vpop.eup %5604 }
 0x917   : > { %v3571_v35 = vmul.f32 %v5605_v15, %v5589_v47  ;;  %v3578_v38 = vpack.c.bf16 %v3570_v32, %v3570_v32  ;;  %v4817_v15 = vld [vmem:[%s5772_s19 + $0x14] sm:$0xf] }
 0x919   : > { %5367 = vmatmul.mubr.msk.bf16.vlgmr.msra.gmra.mrb[104].mxu0 %vm1244_vm5, %v3578_v38  ;;  %v3579_v39 = vpack.c.bf16 %v3571_v35, %v3571_v35  ;;  %v4822_v38 = vld [vmem:[%s5772_s19 + $0x1c] sm:$0xf] }
 0x91a   : > { %5378 = vmatprep.mubr.msk.bf16.mxu0 %vm5689_vm3, %v5688_v8 }
 0x91b   : > { %5373 = vmatmul.mubr.msk.bf16.vlgmr.msra.gmra.mrb[104].mxu1 %vm1244_vm5, %v3579_v39 }
 0x91c   : > { %5384 = vmatprep.mubr.msk.bf16.mxu1 %vm5689_vm3, %v5688_v8 }
 0x921   : > { %v3546_v11 = vpop.xlane.xlu0 %3545 }
 0x922   : > { %5606 = vrcp.f32 %v3546_v11 }
 0x923   : > { %v3549_v41 = vpop.xlane.xlu1 %3548 }
 0x924   : > { %5608 = vrcp.f32 %v3549_v41 }
 0x929   : > { %v3552_v42 = vpop.xlane.xlu0 %3551 }
 0x92a   : > { %5610 = vrcp.f32 %v3552_v42 }
 0x92b   : > { %v3555_v43 = vpop.xlane.xlu1 %3554 }
 0x92c   : > { %5612 = vrcp.f32 %v3555_v43  ;;  %v5607_v47 = vpop.eup %5606 }
 0x92d   : > { %v3572_v34 = vmul.f32 %v5607_v47, %v5591_v12 }
 0x92e   : > { %v5609_v48 = vpop.eup %5608 }
 0x92f   : > { %v2872_v44 = vpop.permute.xlu1 %2871  ;;  %v3573_v37 = vmul.f32 %v5609_v48, %v5593_v20 }
 0x930   : > { %v2909_v59 = vadd.f32 %v6294_v36, %v2872_v44  ;;  %v2912_v60 = vadd.f32 %v6299_v56, %v2872_v44  ;;  %v3580_v36 = vpack.c.bf16 %v3572_v34, %v3572_v34  ;;  %v4121_v44 = vsel %vm1736_vm6, %v4822_v38, 0 }
 0x931   : > { %v3581_v57 = vpack.c.bf16 %v3573_v37, %v3573_v37 }
 0x932   : > { %v3590_v5 = vpack.c.bf16 %v2909_v59, %v2909_v59  ;;  %v3591_v16 = vpack.c.bf16 %v2912_v60, %v2912_v60 }
 0x934   : > { %v5611_v45 = vpop.eup %5610  ;;  %v3828_v56 = vsel %vm1736_vm6, %v3591_v16, 0 }
 0x935   : > { %v3574_v12 = vmul.f32 %v5611_v45, %v6349_v54 }
 0x937   : > { %v3582_v14 = vpack.c.bf16 %v3574_v12, %v3574_v12 }
 0x939   : > { %v3558_v27 = vpop.xlane.xlu0 %3557 }
 0x93a   : > { %5614 = vrcp.f32 %v3558_v27 }
 0x93d   : > { %v2689_v50 = vpop.permute.xlu0 %2688 }
 0x93e   : > { %v2726_v63 = vadd.f32 %v6275_v2, %v2689_v50  ;;  %v2729_v53 = vadd.f32 %v6281_v46, %v2689_v50  ;;  %v5613_v2 = vpop.eup %5612  ;;  %v3782_v46 = vsel %vm1736_vm6, %v3590_v5, 0  ;;  %v4820_v50 = vld [vmem:[%s5772_s19 + $0x18] sm:$0xf] }
 0x93f   : > { %v3575_v20 = vmul.f32 %v5613_v2, %v6353_v21  ;;  %v4069_v37 = vsel %vm1736_vm6, %v4820_v50, 0 }
 0x940   : > { %v3588_v49 = vpack.c.bf16 %v2726_v63, %v2726_v63  ;;  %v3589_v4 = vpack.c.bf16 %v2729_v53, %v2729_v53 }
 0x941   : > { %v3583_v18 = vpack.c.bf16 %v3575_v20, %v3575_v20 }
 0x942   : > { %v3690_v17 = vsel %vm1736_vm6, %v3588_v49, 0  ;;  %v3736_v19 = vsel %vm1736_vm6, %v3589_v4, 0 }
 0x943   : > { %5377 = vmatpush3.bf16.msra.mxu0 %v3690_v17  ;;  %5383 = vmatpush3.bf16.msra.mxu1 %v3736_v19 }
 0x944   : > { %5388 = vmatprep.subr.bf16.mxu0 %v5688_v8  ;;  %5394 = vmatprep.subr.bf16.mxu1 %v5688_v8  ;;  %v5615_v21 = vpop.eup %5614 }
 0x945   : > { %v3576_v30 = vmul.f32 %v5615_v21, %v6357_v24  ;;  %v4816_v24 = vld [vmem:[%s5772_s19 + $0x10] sm:$0xf] }
 0x946   : > { %5379 = vmatmul.mubr.msk.bf16.vlgmr.msra.gmra.mrb[108].mxu0 %vm1244_vm5, %v3580_v36  ;;  %5385 = vmatmul.mubr.msk.bf16.vlgmr.msra.gmra.mrb[108].mxu1 %vm1244_vm5, %v3581_v57  ;;  %v4019_v32 = vsel %vm1736_vm6, %v4816_v24, 0 }
 0x947   : > { %5389 = vmatpush3.bf16.msra.mxu0 %v3782_v46  ;;  %5395 = vmatpush3.bf16.msra.mxu1 %v3828_v56  ;;  %v3584_v9 = vpack.c.bf16 %v3576_v30, %v3576_v30 }
 0x948   : > { %5390 = vmatprep.mubr.msk.bf16.mxu0 %vm5689_vm3, %v5688_v8  ;;  %5396 = vmatprep.mubr.msk.bf16.mxu1 %vm5689_vm3, %v5688_v8 }
 0x949   : > { %5400 = vmatprep.subr.bf16.mxu0 %v5688_v8  ;;  %5406 = vmatprep.subr.bf16.mxu1 %v5688_v8 }
 0x94e   : > { %5391 = vmatmul.mubr.msk.bf16.vlgmr.msra.gmra.mrb[112].mxu0 %vm1244_vm5, %v3582_v14  ;;  %5397 = vmatmul.mubr.msk.bf16.vlgmr.msra.gmra.mrb[112].mxu1 %vm1244_vm5, %v3583_v18 }
 0x94f   : > { %5402 = vmatprep.mubr.msk.bf16.mxu0 %vm5689_vm3, %v5688_v8  ;;  %5408 = vmatprep.mubr.msk.bf16.mxu1 %vm5689_vm3, %v5688_v8 }
 0x960   : > { %v3561_v54 = vpop.xlane.xlu1 %3560 }
 0x961   : > { %5616 = vrcp.f32 %v3561_v54 }
 0x964   : > { %v3055_v23 = vpop.permute.xlu1 %3054 }
 0x965   : > { %v3092_v61 = vadd.f32 %v6301_v52, %v3055_v23  ;;  %v3095_v29 = vadd.f32 %v6303_v13, %v3055_v23 }
 0x967   : > { %v3592_v31 = vpack.c.bf16 %v3092_v61, %v3092_v61  ;;  %v3593_v0 = vpack.c.bf16 %v3095_v29, %v3095_v29 }
 0x969   : > { %v3874_v33 = vsel %vm1736_vm6, %v3592_v31, 0  ;;  %v3920_v3 = vsel %vm1736_vm6, %v3593_v0, 0 }
 0x96a   : > { %5401 = vmatpush3.bf16.msra.mxu0 %v3874_v33  ;;  %5407 = vmatpush3.bf16.msra.mxu1 %v3920_v3 }
 0x96b   : > { %v5617_v62 = vpop.eup %5616  ;;  %5418 = vmatprep.subr.bf16.mxu1 %v5688_v8  ;;  %5412 = vmatprep.subr.bf16.mxu0 %v5688_v8 }
 0x96c   : > { %v3577_v52 = vmul.f32 %v5617_v62, %v6365_v26  ;;  %v3972_v26 = vsel %vm1736_vm6, %v4817_v15, 0 }
 0x96d   : > { %5403 = vmatmul.mubr.msk.bf16.vlgmr.msra.gmra.mrb[116].mxu0 %vm1244_vm5, %v3584_v9 }
 0x96e   : > { %v3585_v13 = vpack.c.bf16 %v3577_v52, %v3577_v52  ;;  %5414 = vmatprep.mubr.msk.bf16.mxu0 %vm5689_vm3, %v5688_v8  ;;  %5413 = vmatpush3.bf16.msra.mxu0 %v3972_v26 }
 0x96f   : > { %5424 = vmatprep.subr.bf16.mxu0 %v5688_v8 }
 0x970   : > { %5409 = vmatmul.mubr.msk.bf16.vlgmr.msra.gmra.mrb[116].mxu1 %vm1244_vm5, %v3585_v13 }
 0x971   : > { %5419 = vmatpush3.bf16.msra.mxu1 %v4019_v32  ;;  %5420 = vmatprep.mubr.msk.bf16.mxu1 %vm5689_vm3, %v5688_v8 }
 0x972   : > { %5430 = vmatprep.subr.bf16.mxu1 %v5688_v8 }
 0x9ec   : > { %v3634_v35 = vpop.f32.mrb[104].mxu0 }
 0x9ed   : > { %v5368_v39 = vpop.f32.mrb[105].mxu0 }
 0x9ee   : > { %v3637_v11 = vpop.f32.mrb[106].mxu0  ;;  %v3680_v41 = vpop.f32.mrb[104].mxu1 }
 0x9ef   : > { %v3962_v42 = vpack.c.bf16 %v3680_v41, %v3634_v35  ;;  %v5369_v43 = vpop.f32.mrb[107].mxu0  ;;  %v5374_v27 = vpop.f32.mrb[105].mxu1  ;;  %v4169_v41 = vrot.slane %v6307_v1, %v559_v25 }
 0x9f0   : > { %v3683_v47 = vpop.f32.mrb[106].mxu1 }
 0x9f1   : > { %v5375_v48 = vpop.f32.mrb[107].mxu1  ;;  %5421 = vmatmul.mubr.msk.bf16.vlgmr.msra.gmra.mrb[120].mxu1 %vm1244_vm5, %v3962_v42 }
 0x9f2   : > { %5431 = vmatpush3.bf16.msra.mxu1 %v4121_v44  ;;  %5432 = vmatprep.mubr.msk.bf16.mxu1 %vm5689_vm3, %v5688_v8 }
 0x9f3   : > { %5444 = vmatprep.subr.bf16.mxu1 %v5688_v8 }
 0xa19   : > { %v3726_v59 = vpop.f32.mrb[108].mxu0  ;;  %v3772_v60 = vpop.f32.mrb[108].mxu1 }
 0xa1a   : > { %v3965_v63 = vpack.c.bf16 %v3772_v60, %v3726_v59  ;;  %v5380_v53 = vpop.f32.mrb[109].mxu0  ;;  %v5386_v34 = vpop.f32.mrb[109].mxu1 }
 0xa1b   : > { %v3729_v49 = vpop.f32.mrb[110].mxu0  ;;  %v3775_v4 = vpop.f32.mrb[110].mxu1 }
 0xa1c   : > { %v5381_v5 = vpop.f32.mrb[111].mxu0  ;;  %v5387_v16 = vpop.f32.mrb[111].mxu1  ;;  %5415 = vmatmul.mubr.msk.bf16.vlgmr.msra.gmra.mrb[120].mxu0 %vm1244_vm5, %v3965_v63 }
 0xa1d   : > { %5425 = vmatpush3.bf16.msra.mxu0 %v4069_v37  ;;  %5426 = vmatprep.mubr.msk.bf16.mxu0 %vm5689_vm3, %v5688_v8 }
 0xa1e   : > { %5436 = vmatprep.subr.bf16.mxu0 %v5688_v8 }
 0xa21   : > { %v3818_v17 = vpop.f32.mrb[112].mxu0  ;;  %v3864_v19 = vpop.f32.mrb[112].mxu1 }
 0xa22   : > { %v4062_v45 = vpack.c.bf16 %v3864_v19, %v3818_v17  ;;  %v5392_v36 = vpop.f32.mrb[113].mxu0  ;;  %v5398_v57 = vpop.f32.mrb[113].mxu1 }
 0xa23   : > { %v3821_v2 = vpop.f32.mrb[114].mxu0  ;;  %v3867_v46 = vpop.f32.mrb[114].mxu1  ;;  %v5545_v36 = vld [vmem:[%s5782_s26 + $0x8] sm:$0xff]   ;;  %v5546_v57 = vld [vmem:[%s5787_s29] sm:$0xff]  }
 0xa24   : > { %v5393_v56 = vpop.f32.mrb[115].mxu0  ;;  %v5399_v12 = vpop.f32.mrb[115].mxu1  ;;  %5427 = vmatmul.mubr.msk.bf16.vlgmr.msra.gmra.mrb[124].mxu0 %vm1244_vm5, %v4062_v45  ;;  %v5544_v45 = vld [vmem:[%s5782_s26] sm:$0xff]   ;;  %v5547_v2 = vld [vmem:[%s5787_s29 + $0x8] sm:$0xff]  }
 0xa25   : > { %5440 = vmatprep.mubr.msk.bf16.mxu0 %vm5689_vm3, %v5688_v8  ;;  %5437 = vmatpush3.bf16.msra.mxu0 %v5544_v45  ;;  %v4392_v45 = vrot.slane %v6307_v1, %v2361_v40 }
 0xa26   : > { %5438 = vmatprep.subr.bf16.mxu0 %v5688_v8 }
 0xa29   : > { %5439 = vmatpush3.bf16.msra.mxu0 %v5545_v36 }
 0xa40   : > { %v3910_v20 = vpop.f32.mrb[116].mxu0 }
 0xa41   : > { %v5404_v14 = vpop.f32.mrb[117].mxu0 }
 0xa42   : > { %v3913_v18 = vpop.f32.mrb[118].mxu0 }
 0xa43   : > { %v5405_v54 = vpop.f32.mrb[119].mxu0  ;;  %v3956_v21 = vpop.f32.mrb[116].mxu1 }
 0xa44   : > { %v4114_v23 = vpack.c.bf16 %v3956_v21, %v3910_v20  ;;  %v5410_v61 = vpop.f32.mrb[117].mxu1  ;;  %v4203_v21 = vrot.slane %v6307_v1, %v621_v55  ;;  %v4220_v55 = vrot.slane %v6307_v1, %v2342_v58 }
 0xa45   : > { %v3959_v29 = vpop.f32.mrb[118].mxu1 }
 0xa46   : > { %v5411_v30 = vpop.f32.mrb[119].mxu1  ;;  %5433 = vmatmul.mubr.msk.bf16.vlgmr.msra.gmra.mrb[124].mxu1 %vm1244_vm5, %v4114_v23  ;;  %v4209_v29 = vrot.slane %v6307_v1, %v2307_v28 }
 0xa47   : > { %5452 = vmatprep.mubr.msk.bf16.mxu1 %vm5689_vm3, %v5688_v8  ;;  %5445 = vmatpush3.bf16.msra.mxu1 %v5546_v57  ;;  %v4398_v57 = vrot.slane %v6307_v1, %v2426_v51 }
 0xa48   : > { %5446 = vmatprep.subr.bf16.mxu1 %v5688_v8 }
 0xa4b   : > { %5447 = vmatpush3.bf16.msra.mxu1 %v5547_v2 }
 0xa4c   : > { %5448 = vmatprep.subr.bf16.mxu1 %v5688_v8 }
 0xac4   : > { %v4055_v31 = vpop.f32.mrb[120].mxu1 }
 0xac5   : > { %v5422_v0 = vpop.f32.mrb[121].mxu1 }
 0xac6   : > { %v4058_v33 = vpop.f32.mrb[122].mxu1 }
 0xac7   : > { %v5423_v3 = vpop.f32.mrb[123].mxu1 }
 0xaef   : > { %v4008_v62 = vpop.f32.mrb[120].mxu0 }
 0xaf0   : > { %v4056_v9 = vadd.f32 %v4055_v31, %v4008_v62  ;;  %v5416_v52 = vpop.f32.mrb[121].mxu0 }
 0xaf1   : > { %v4011_v13 = vpop.f32.mrb[122].mxu0  ;;  %v5549_v52 = vld [vmem:[%s5787_s29 + $0x18] sm:$0xff]  }
 0xaf2   : > { %v4059_v24 = vadd.f32 %v4058_v33, %v4011_v13  ;;  %v5417_v32 = vpop.f32.mrb[123].mxu0 }
 0xaf7   : > { %v4105_v15 = vpop.f32.mrb[124].mxu0 }
 0xaf8   : > { %v4112_v26 = vadd.f32 %v4105_v15, %v4056_v9  ;;  %v5428_v35 = vpop.f32.mrb[125].mxu0  ;;  %v5548_v9 = vld [vmem:[%s5787_s29 + $0x10] sm:$0xff]  }
 0xaf9   : > { %v4108_v38 = vpop.f32.mrb[126].mxu0  ;;  %5449 = vmatpush3.bf16.msra.mxu1 %v5548_v9 }
 0xafa   : > { %v4113_v39 = vadd.f32 %v4108_v38, %v4059_v24  ;;  %v5429_v11 = vpop.f32.mrb[127].mxu0  ;;  %5450 = vmatprep.subr.bf16.mxu1 %v5688_v8  ;;  %v4291_v8 = vrot.slane %v6307_v1, %v2348_v6 }
 0xafd   : > { %5451 = vmatpush3.bf16.msra.mxu1 %v5549_v52 }
 0xb19   : > { %v4157_v42 = vpop.f32.mrb[124].mxu1 }
 0xb1a   : > { %v4164_v43 = vadd.f32 %v4157_v42, %v4112_v26  ;;  %v5434_v27 = vpop.f32.mrb[125].mxu1 }
 0xb1b   : > { %v4160_v44 = vpop.f32.mrb[126].mxu1 }
 0xb1c   : > { %v4170_v47 = vadd.f32 %v4169_v41, %v4164_v43  ;;  %v4165_v48 = vadd.f32 %v4160_v44, %v4113_v39  ;;  %v5435_v50 = vpop.f32.mrb[127].mxu1 }
 0xb1e   : > { %v4171_v59 = vadd.f32 %v4169_v41, %v4165_v48  ;;  %v4172_v60 = vadd.f32 %v4170_v47, %v6179_v7 }
 0xb20   : > { %v4174_v63 = vsel %vm507_vm4, %v4172_v60, 0.0  ;;  %v4173_v53 = vadd.f32 %v4171_v59, %v6181_v10 }
 0xb21   : > { %4175 = vadd.xlane.f32.xlu0 %v4174_v63 }
 0xb22   : > { %v4177_v34 = vsel %vm507_vm4, %v4173_v53, 0.0 }
 0xb23   : > { %4178 = vadd.xlane.f32.xlu1 %v4177_v34 }
 0xbae   : > { %v4176_v25 = vpop.xlane.xlu0 %4175 }
 0xbaf   : > { %v4180_v37 = vmul.f32 0.03125, %v4176_v25 }
 0xbb0   : > { %v4179_v49 = vpop.xlane.xlu1 %4178 }
 0xbb1   : > { %v4182_v4 = vsub.f32 %v4172_v60, %v4180_v37  ;;  %v4181_v5 = vmul.f32 0.03125, %v4179_v49 }
 0xbb3   : > { %v4183_v16 = vsub.f32 %v4173_v53, %v4181_v5  ;;  %v4184_v17 = vmul.f32 %v4182_v4, %v4182_v4 }
 0xbb5   : > { %v4186_v7 = vsel %vm507_vm4, %v4184_v17, 0.0  ;;  %v4185_v19 = vmul.f32 %v4183_v16, %v4183_v16 }
 0xbb6   : > { %4187 = vadd.xlane.f32.xlu0 %v4186_v7 }
 0xbb7   : > { %v4189_v10 = vsel %vm507_vm4, %v4185_v19, 0.0 }
 0xbba   : > { %4190 = vadd.xlane.f32.xlu0 %v4189_v10 }
 0xc43   : > { %v4188_v46 = vpop.xlane.xlu0 %4187 }
 0xc44   : > { %v4192_v56 = vmul.f32 0.03125, %v4188_v46 }
 0xc46   : > { %v4194_v12 = vadd.f32 1e-05, %v4192_v56 }
 0xc47   : > { %v4191_v20 = vpop.xlane.xlu0 %4190 }
 0xc48   : > { %5618 = vrsqrt.f32 %v4194_v12  ;;  %v4193_v14 = vmul.f32 0.03125, %v4191_v20 }
 0xc4a   : > { %v4195_v18 = vadd.f32 1e-05, %v4193_v14 }
 0xc4c   : > { %5620 = vrsqrt.f32 %v4195_v18 }
 0xc52   : > { %v5619_v54 = vpop.eup %5618 }
 0xc53   : > { %v4198_v23 = vmul.f32 %v5619_v54, %v4182_v4 }
 0xc55   : > { %v4204_v30 = vmul.f32 %v4203_v21, %v4198_v23 }
 0xc56   : > { %v5621_v61 = vpop.eup %5620 }
 0xc57   : > { %v4199_v31 = vmul.f32 %v5621_v61, %v4183_v16  ;;  %v4210_v33 = vadd.f32 %v4209_v29, %v4204_v30 }
 0xc59   : > { %v4205_v0 = vmul.f32 %v4203_v21, %v4199_v31 }
 0xc5b   : > { %v4211_v3 = vadd.f32 %v4209_v29, %v4205_v0 }
 0xc5d   : > { %v4216_v62 = vpack.c.bf16 %v4211_v3, %v4210_v33 }
 0xc5f   : > { %5441 = vmatmul.mubr.msk.bf16.vlgmr.msra.gmra.mrb[128].mxu0 %vm507_vm4, %v4216_v62 }
 0xd32   : > { %v4270_v13 = vpop.f32.mrb[128].mxu0 }
 0xd33   : > { %v4271_v28 = vadd.f32 %v4270_v13, %v4220_v55  ;;  %v5442_v24 = vpop.f32.mrb[129].mxu0 }
 0xd34   : > { %v4273_v32 = vpop.f32.mrb[130].mxu0 }
 0xd35   : > { %v4274_v15 = vadd.f32 %v4273_v32, %v4220_v55  ;;  %v5443_v26 = vpop.f32.mrb[131].mxu0  ;;  %v4277_v35 = vmax.f32 %v4271_v28, 0.0 }
 0xd37   : > { %v4278_v38 = vmax.f32 %v4274_v15, 0.0 }
 0xd39   : > { %v4287_v39 = vpack.c.bf16 %v4278_v38, %v4277_v35 }
 0xd3b   : > { %5453 = vmatmul.mubr.msk.bf16.vlgmr.msra.gmra.mrb[128].mxu1 %vm4316_vm7, %v4287_v39 }
 0xe0e   : > { %v4354_v11 = vpop.f32.mrb[128].mxu1 }
 0xe0f   : > { %v4355_v41 = vadd.f32 %v4354_v11, %v4291_v8  ;;  %v5454_v42 = vpop.f32.mrb[129].mxu1 }
 0xe10   : > { %v4357_v43 = vpop.f32.mrb[130].mxu1 }
 0xe11   : > { %v4358_v58 = vadd.f32 %v4357_v43, %v4291_v8  ;;  %v5455_v27 = vpop.f32.mrb[131].mxu1  ;;  %v4361_v44 = vadd.f32 %v4355_v41, %v4210_v33 }
 0xe13   : > { %v4363_v47 = vsel %vm507_vm4, %v4361_v44, 0.0  ;;  %v4362_v48 = vadd.f32 %v4358_v58, %v4211_v3 }
 0xe14   : > { %4364 = vadd.xlane.f32.xlu1 %v4363_v47 }
 0xe15   : > { %v4366_v50 = vsel %vm507_vm4, %v4362_v48, 0.0 }
 0xe16   : > { %4367 = vadd.xlane.f32.xlu0 %v4366_v50 }
 0xea1   : > { %v4365_v59 = vpop.xlane.xlu1 %4364 }
 0xea2   : > { %v4369_v60 = vmul.f32 0.03125, %v4365_v59 }
 0xea3   : > { %v4368_v63 = vpop.xlane.xlu0 %4367 }
 0xea4   : > { %v4371_v53 = vsub.f32 %v4361_v44, %v4369_v60  ;;  %v4370_v34 = vmul.f32 0.03125, %v4368_v63 }
 0xea6   : > { %v4372_v6 = vsub.f32 %v4362_v48, %v4370_v34  ;;  %v4373_v25 = vmul.f32 %v4371_v53, %v4371_v53 }
 0xea8   : > { %v4375_v37 = vsel %vm507_vm4, %v4373_v25, 0.0  ;;  %v4374_v49 = vmul.f32 %v4372_v6, %v4372_v6 }
 0xea9   : > { %4376 = vadd.xlane.f32.xlu1 %v4375_v37 }
 0xeaa   : > { %v4378_v4 = vsel %vm507_vm4, %v4374_v49, 0.0 }
 0xeab   : > { %4379 = vadd.xlane.f32.xlu0 %v4378_v4 }
 0xf36   : > { %v4377_v5 = vpop.xlane.xlu1 %4376 }
 0xf37   : > { %v4381_v16 = vmul.f32 0.03125, %v4377_v5 }
 0xf38   : > { %v4380_v17 = vpop.xlane.xlu0 %4379 }
 0xf39   : > { %v4383_v7 = vadd.f32 1e-05, %v4381_v16  ;;  %v4382_v19 = vmul.f32 0.03125, %v4380_v17 }
 0xf3b   : > { %5622 = vrsqrt.f32 %v4383_v7  ;;  %v4384_v10 = vadd.f32 1e-05, %v4382_v19 }
 0xf3d   : > { %5624 = vrsqrt.f32 %v4384_v10 }
 0xf45   : > { %v5623_v36 = vpop.eup %5622 }
 0xf46   : > { %v4387_v2 = vmul.f32 %v5623_v36, %v4371_v53  ;;  %4404 = sbr.rel (%p4832_p6) target bundleno = 3919 (0xf4f), region = 64 }
 0xf47   : > { %v5625_v46 = vpop.eup %5624 }
 0xf48   : > { %v4393_v56 = vmul.f32 %v4392_v45, %v4387_v2  ;;  %v4388_v12 = vmul.f32 %v5625_v46, %v4372_v6 }
 0xf4a   : > { %v4399_v20 = vadd.f32 %v4398_v57, %v4393_v56  ;;  %v4394_v14 = vmul.f32 %v4392_v45, %v4388_v12 }
 0xf4c   : > { %v4400_v18 = vadd.f32 %v4398_v57, %v4394_v14  ;;  %4405 = vst.msk [vmem:[#allocation3] sm:$0xff] (!%p4832_p6), %vm507_vm4, %v4399_v20 }
 0xf4e   : > { %4406 = vst.msk [vmem:[#allocation3 + $0x8] sm:$0xff] %vm507_vm4, %v4400_v18 }
 0xf4f PF: > { %p4833_p7 = scmp.ne.s32.totalorder %s5677_s30, 1 }
 0xf50   : > { %v4413_v22 = vsel (!%p4833_p7), %vm507_vm4, %v4399_v20, 0.0  ;;  %v4416_v40 = vsel (!%p4833_p7), %vm507_vm4, %v4400_v18, 0.0  ;;  %v4834_v28 = vld [vmem:[%s6543_s7] ss:$0 sm:$0xff] (!%p4833_p7) }
 0xf51   : > { %4410 = sbr.rel (%p4833_p7) target bundleno = 4238 (0x108e), region = 68  ;;  %4414 = vadd.xlane.f32.xlu0 (!%p4833_p7), %v4413_v22  ;;  %v4835_v32 = vld [vmem:[%s6544_s8] ss:$0 sm:$0xff] (!%p4833_p7) }
 0xf55   : > { %4417 = vadd.xlane.f32.xlu0 (!%p4833_p7), %v4416_v40 }
 0xfde   : > { %v4415_v51 = vpop.xlane.xlu0 %4414 }
 0xfdf   : > { %v4419_v1 = vmul.f32 0.03125, %v4415_v51 }
 0xfe1   : > { %v4421_v54 = vsub.f32 %v4399_v20, %v4419_v1 }
 0xfe2   : > { %v4418_v21 = vpop.xlane.xlu0 %4417 }
 0xfe3   : > { %v4420_v23 = vmul.f32 0.03125, %v4418_v21  ;;  %v4423_v61 = vmul.f32 %v4421_v54, %v4421_v54 }
 0xfe5   : > { %v4422_v29 = vsub.f32 %v4400_v18, %v4420_v23  ;;  %v4425_v30 = vsel %vm507_vm4, %v4423_v61, 0.0 }
 0xfe6   : > { %4426 = vadd.xlane.f32.xlu1 %v4425_v30 }
 0xfe7   : > { %v4424_v31 = vmul.f32 %v4422_v29, %v4422_v29 }
 0xfe9   : > { %v4428_v0 = vsel %vm507_vm4, %v4424_v31, 0.0 }
 0xfea   : > { %4429 = vadd.xlane.f32.xlu1 %v4428_v0 }
0x1073   : > { %v4427_v33 = vpop.xlane.xlu1 %4426 }
0x1074   : > { %v4431_v3 = vmul.f32 0.03125, %v4427_v33 }
0x1076   : > { %v4433_v62 = vadd.f32 1e-05, %v4431_v3 }
0x1077   : > { %v4430_v9 = vpop.xlane.xlu1 %4429 }
0x1078   : > { %5629 = vrsqrt.f32 %v4433_v62  ;;  %v4432_v52 = vmul.f32 0.03125, %v4430_v9 }
0x107a   : > { %v4434_v55 = vadd.f32 1e-05, %v4432_v52 }
0x107c   : > { %5631 = vrsqrt.f32 %v4434_v55 }
0x1082   : > { %v5630_v13 = vpop.eup %5629 }
0x1083   : > { %v4437_v24 = vmul.f32 %v5630_v13, %v4421_v54 }
0x1085   : > { %v4445_v15 = vmul.f32 %v4834_v28, %v4437_v24 }
0x1086   : > { %v5632_v26 = vpop.eup %5631 }
0x1087   : > { %v4453_v35 = vadd.f32 %v4835_v32, %v4445_v15  ;;  %v4438_v38 = vmul.f32 %v5632_v26, %v4422_v29 }
0x1089   : > { %4455 = vst.msk [vmem:[#allocation3] sm:$0xff] %vm507_vm4, %v4453_v35  ;;  %v4446_v39 = vmul.f32 %v4834_v28, %v4438_v38 }
0x108b   : > { %v4454_v8 = vadd.f32 %v4835_v32, %v4446_v39 }
0x108d   : > { %4456 = vst.msk [vmem:[#allocation3 + $0x8] sm:$0xff] %vm507_vm4, %v4454_v8 }
0x108e PF: > { %s6546_s29 = sadd.s32 4294967295, %s5685_s11   ;;  %s5693_s18 = smov [#allocation3]  }
0x108f   : > { %p6501_p8 = scmp.eq.s32.totalorder %s6546_s29, 1  ;;  %s4466_s14 = sshll.u32 %s5693_s18, 4  ;;  %s4467_s14 = int_to_ptr.vmem [resolvable:$true] %s4466_s14 }
0x1090   : > { %s5633_s15 = scalar_lea.vmem %s4467_s14, 256  ;;  %p5640_p12 = scmp.lt.s32.totalorder %s4467_s14, %s4467_s14 }
0x1091   : > { %p5634_p9 = scmp.ne.s32.totalorder %s4467_s14, %s5633_s15  ;;  %p5641_p13 = scmp.lt.s32.totalorder %s5633_s15, %s5633_s15 }
0x1093   : > { %p5635_p10 = pnand %p5634_p9, %p6501_p8  ;;  %p5642_p0 = por %p5641_p13, %p5640_p12 }
0x1095   : > { %p5636_p11 = pneg %p5635_p10 }
0x1097   : > { %p5643_p1 = pnand %p5642_p0, %p5636_p11 }
0x1099   : > { %5646 = shalt.err (!%p5643_p1)
}
0x109a   : > { %s5647_s12 = scalar_lea.hbm %s6545_s9, 256 }
0x109b   : > { %p5648_p2 = scmp.ne.s32.totalorder %s6545_s9, %s5647_s12  ;;  %p5653_p5 = scmp.lt.u32.totalorder %s5647_s12, %s6545_s9 }
0x109d   : > { %p5649_p3 = pnand %p5648_p2, %p6501_p8 }
0x109f   : > { %p5650_p4 = pneg %p5649_p3 }
0x10a1   : > { %p5655_p6 = pnand %p5653_p5, %p5650_p4 }
0x10a3   : > { %5658 = shalt.err (!%p5655_p6)
}
0x10a4   : > { %s5694_s27 = smov 128   ;;  %s5695_s28 = smov 8  }
0x10a5   : > { %5458 = dma.vmem_to_hbm [thread:$0]  (%p6501_p8), %s4467_s14, 256, %s6545_s9, [#allocation4], %s5694_s27, %s5694_s27, %s5695_s28  }
0x10a6   : > { %5672 = dma.done.wait (%p6501_p8), [#allocation4], 256  }
0x10a7   : > { %5674 = vsyncadd (%p6501_p8), [#allocation4], 4294967040 }
0x10a8 PF: > { %s20_s11 = sadd.s32 1, %s5685_s11   ;;  %s6548_s30 = smov %s5681_s10 }
0x10a9   : > { %p17_p7 = scmp.ge.s32.totalorder %s20_s11, 4   ;;  %s6549_s10 = smov %s6551_s13 }
0x10ab   :  { %19 = sbr.rel (!%p17_p7) target bundleno = 2 (0x2), region = 144 }
0x10b2   :  { %4482 = vsyncpa [#allocation4], 1 }
0x10b3   :  { %4484 = vsyncpa [#allocation4 + $0x1], 1 }

</bundles_post_ra>
